<compile_context>
chip_gen: v7x
topology: tpu7x:2x2x1
jax: 0.10.0
libtpu: 0.0.40
codegen_flags: <defaults>
</compile_context>

<pallas_src>
import functools

import jax
import jax.numpy as jnp
from jax.experimental import pallas as pl
from jax.experimental.pallas import tpu as pltpu


# ----------------------------------------------------------------------------- in-kernel stages
# (Plain traced functions called from inside the single fused kernel body.)

def _gated(z, width):
    # z: (rows, 3*width) packed as [P | Q | R] -> relu(P * sigmoid(Q) + R)
    p = z[:, :width]
    q = z[:, width:2 * width]
    r = z[:, 2 * width:3 * width]
    return jax.nn.relu(p * jax.nn.sigmoid(q) + r)


def _temporal_gated_conv(h, w, b, kt):
    # h: (T, B, N, Cin); w: (Kt, Cin, 3*Cout) packed P|Q|R; b: (1, 3*Cout)
    T, B, N, Cin = h.shape
    t_out = T - kt + 1
    rows = t_out * B * N
    cout = w.shape[-1] // 3
    z = b                                              # broadcasts to (rows, 3*Cout)
    for tau in range(kt):                              # per-tap accumulate: no im2col, no lane concat
        xt = h[tau:tau + t_out].reshape(rows, Cin)     # leading-dim slice + tile-aligned leading merge
        z = z + jnp.dot(xt, w[tau], preferred_element_type=jnp.float32)
    return _gated(z, cout).reshape(t_out, B, N, cout)


def _cheb_conv_relu(h, L, wk, bk, K):
    # h: (T, B, N, H); L: (N, N) scaled Laplacian; wk: (K, H, H); bk: (1, H)
    T, B, N, H = h.shape
    G = T * B
    rows = G * N
    t0_rows = h.reshape(rows, H)
    # order 0: identity term, straight from the rows layout
    out = jnp.dot(t0_rows, wk[0], preferred_element_type=jnp.float32) + bk
    if K > 1:
        # Lane-dense (N, G*H) layout: each Chebyshev order costs ONE (N,N)@(N,G*H) MXU matmul.
        t0_wide = jnp.transpose(h.reshape(G, N, H), (1, 0, 2)).reshape(N, G * H)
        tkm2_w = t0_wide
        tkm1_w = jnp.dot(L, t0_wide, preferred_element_type=jnp.float32)        # T1 = L X
        t_rows = jnp.transpose(tkm1_w.reshape(N, G, H), (1, 0, 2)).reshape(rows, H)
        out = out + jnp.dot(t_rows, wk[1], preferred_element_type=jnp.float32)
        for k in range(2, K):                                                    # T_k = 2 L T_{k-1} - T_{k-2}
            tk_w = 2.0 * jnp.dot(L, tkm1_w, preferred_element_type=jnp.float32) - tkm2_w
            t_rows = jnp.transpose(tk_w.reshape(N, G, H), (1, 0, 2)).reshape(rows, H)
            out = out + jnp.dot(t_rows, wk[k], preferred_element_type=jnp.float32)
            tkm2_w, tkm1_w = tkm1_w, tk_w
    return jax.nn.relu(out).reshape(T, B, N, H)        # F.relu after the graph conv (STConv)


def _batchnorm_relu(h, gamma, beta, eps=1e-5):
    # h: (T, B, N, C); BatchNorm2d(num_nodes): per-node batch stats over (T, B, C),
    # training mode, biased variance. Model-level ReLU fused. Single-pass stats.
    T, B, N, C = h.shape
    hs = h.reshape(T * B, N, C)
    inv_n = 1.0 / (T * B * C)
    s = jnp.sum(jnp.sum(hs, axis=2, keepdims=True), axis=0, keepdims=True)       # (1, N, 1)
    ss = jnp.sum(jnp.sum(hs * hs, axis=2, keepdims=True), axis=0, keepdims=True)
    mean = s * inv_n
    var = jnp.maximum(ss * inv_n - mean * mean, 0.0)   # E[x^2]-mean^2; clamp tiny negatives
    xn = (hs - mean) * jax.lax.rsqrt(var + eps)
    return jax.nn.relu(xn * gamma + beta).reshape(T, B, N, C)


# ----------------------------------------------------------------------------- fused kernel

def stconv_model_kernel(x_ref, w1_ref, b1_ref, l_ref, wk_ref, bk_ref,
                        w2_ref, b2_ref, gamma_ref, beta_ref, lw_ref, lb_ref,
                        o_ref, *, kernel_size, num_blocks):
    kt = kernel_size
    K = wk_ref.shape[0]

    L = l_ref[...]
    w1, b1 = w1_ref[...], b1_ref[...]
    wk, bk = wk_ref[...], bk_ref[...]
    w2, b2 = w2_ref[...], b2_ref[...]
    gamma, beta = gamma_ref[...], beta_ref[...]

    h = x_ref[...]                                     # (T, B, N, C), all-VMEM from here on
    for _ in range(num_blocks):                        # SAME STConv params reused 3x (matches PyTorch spec)
        h = _temporal_gated_conv(h, w1, b1, kt)        # C -> H, gated + relu
        h = _cheb_conv_relu(h, L, wk, bk, K)           # graph conv + relu
        h = _temporal_gated_conv(h, w2, b2, kt)        # H -> C, gated + relu
        h = _batchnorm_relu(h, gamma, beta)            # BN (training stats) + model-level ReLU

    # Linear(F, 1) head on the VPU: multiply + lane reduce (MXU would waste 127/128 result lanes).
    Tf, B, N, C = h.shape
    lin = jnp.sum(h * lw_ref[...].reshape(1, 1, 1, C), axis=-1)   # (Tf, B, N)
    o_ref[...] = lin.reshape(Tf * B, N) + lb_ref[...]             # lane-dense (Tf*B, N) store


# ----------------------------------------------------------------------------- wrapper

def _full_spec(shape):
    nd = len(shape)
    return pl.BlockSpec(shape, lambda i: (0,) * nd)


@functools.partial(jax.jit, static_argnames=("kernel_size", "num_blocks"))
def stconv_model(x, params, L, kernel_size, num_blocks=3):
    # x: (B, T, N, F)  ->  (B, T - num_blocks*2*(Kt-1), N, 1)
    B, T, N, F = x.shape
    Tf = T - num_blocks * 2 * (kernel_size - 1)
    xt = jnp.transpose(x, (1, 0, 2, 3))                # (T, B, N, F): kernel-native layout
    args = (xt,
            params["w1"], params["b1"], L, params["wk"], params["bk"],
            params["w2"], params["b2"], params["bn_gamma"], params["bn_beta"],
            params["lin_w"], params["lin_b"])
    out2d = pl.pallas_call(
        functools.partial(stconv_model_kernel,
                          kernel_size=kernel_size, num_blocks=num_blocks),
        grid=(1,),
        in_specs=[_full_spec(a.shape) for a in args],
        out_specs=_full_spec((Tf * B, N)),
        out_shape=jax.ShapeDtypeStruct((Tf * B, N), jnp.float32),
        compiler_params=pltpu.CompilerParams(dimension_semantics=("arbitrary",)),
    )(*args)
    # Wrapper-side layout plumbing back to the PyTorch output shape (B, Tf, N, 1).
    return jnp.transpose(out2d.reshape(Tf, B, N), (1, 0, 2))[..., None]


# ----------------------------------------------------------------------------- model glue

def build_scaled_laplacian(edge_index, edge_weight, num_nodes):
    # PyG ChebConv(normalization='sym', default lambda_max=2.0):
    #   L_hat = (2/lambda_max) * (I - D^{-1/2} A D^{-1/2}) - I = -D^{-1/2} A D^{-1/2}
    # (assumes a symmetric edge list with no self-loops)
    src, dst = edge_index[0], edge_index[1]
    deg = jnp.zeros((num_nodes,), jnp.float32).at[src].add(edge_weight)
    dinv = jnp.where(deg > 0, 1.0 / jnp.sqrt(deg), 0.0)
    w = -dinv[src] * edge_weight * dinv[dst]
    return jnp.zeros((num_nodes, num_nodes), jnp.float32).at[dst, src].add(w)


def init_params(key, node_features, num_nodes, hidden_channels, kernel_size, K):
    F, N, H, Kt = node_features, num_nodes, hidden_channels, kernel_size
    ks = iter(jax.random.split(key, 12))

    def gated_conv(cin, cout):
        # PyTorch Conv2d weight (cout, cin, 1, Kt) per gate, re-laid-out to (Kt, cin, cout)
        # and packed [P | Q | R] along the output axis -> (Kt, cin, 3*cout).
        w = jax.random.normal(next(ks), (3, Kt, cin, cout), jnp.float32) * 0.1
        b = jax.random.normal(next(ks), (3, cout), jnp.float32) * 0.1
        return jnp.concatenate([w[0], w[1], w[2]], axis=-1), b.reshape(1, 3 * cout)

    w1, b1 = gated_conv(F, H)     # TemporalConv 1: F -> H
    w2, b2 = gated_conv(H, F)     # TemporalConv 2: H -> F
    wk = jax.random.normal(next(ks), (K, H, H), jnp.float32) * 0.1   # ChebConv weights, per order
    bk = (jax.random.normal(next(ks), (H,), jnp.float32) * 0.1).reshape(1, H)
    return {
        "w1": w1, "b1": b1,
        "wk": wk, "bk": bk,
        "w2": w2, "b2": b2,
        "bn_gamma": jnp.ones((1, N, 1), jnp.float32),   # BatchNorm2d(num_nodes) defaults
        "bn_beta": jnp.zeros((1, N, 1), jnp.float32),
        "lin_w": jax.random.normal(next(ks), (1, F), jnp.float32) * 0.1,  # Linear(F,1) weight (row form)
        "lin_b": jax.random.normal(next(ks), (1, 1), jnp.float32) * 0.1,
    }


# ----------------------------------------------------------------------------- main

if __name__ == "__main__":
    key = jax.random.PRNGKey(0)
    k_x, k_w, k_p = jax.random.split(key, 3)

    # Small hyperparameters consistent with STConvModel.__init__
    node_features = 4
    num_nodes = 8
    hidden_channels = 16
    kernel_size = 2     # each STConv shrinks time by 2*(Kt-1)=2; 3 blocks need T >= 7
    K = 3
    batch = 2
    T = 8

    # Input x: (batch, time, nodes, features) — STConv's expected layout
    x = jax.random.normal(k_x, (batch, T, num_nodes, node_features), jnp.float32)

    # Bidirectional ring graph with deterministic positive weights
    src = jnp.arange(num_nodes, dtype=jnp.int32)
    dst = (src + 1) % num_nodes
    edge_index = jnp.stack([jnp.concatenate([src, dst]), jnp.concatenate([dst, src])])
    edge_weight = jax.random.uniform(k_w, (edge_index.shape[1],), jnp.float32,
                                     minval=0.5, maxval=1.5)

    L = build_scaled_laplacian(edge_index, edge_weight, num_nodes)
    params = init_params(k_p, node_features, num_nodes, hidden_channels, kernel_size, K)

    out = stconv_model(x, params, L, kernel_size=kernel_size, num_blocks=3)
    out = jax.block_until_ready(out)
    assert out.shape == (batch, T - 6 * (kernel_size - 1), num_nodes, 1)
    assert jnp.all(jnp.isfinite(out))
    print("KERNEL_OK")
</pallas_src>

<mosaic_0001>
module attributes {stable_mosaic.version = 11 : i64} {
  func.func @stconv_model_kernel(%arg0: i32, %arg1: memref<8x2x8x4xf32, #tpu.memory_space<vmem>>, %arg2: memref<2x4x48xf32, #tpu.memory_space<vmem>>, %arg3: memref<1x48xf32, #tpu.memory_space<vmem>>, %arg4: memref<8x8xf32, #tpu.memory_space<vmem>>, %arg5: memref<3x16x16xf32, #tpu.memory_space<vmem>>, %arg6: memref<1x16xf32, #tpu.memory_space<vmem>>, %arg7: memref<2x16x12xf32, #tpu.memory_space<vmem>>, %arg8: memref<1x12xf32, #tpu.memory_space<vmem>>, %arg9: memref<1x8x1xf32, #tpu.memory_space<vmem>>, %arg10: memref<1x8x1xf32, #tpu.memory_space<vmem>>, %arg11: memref<1x4xf32, #tpu.memory_space<vmem>>, %arg12: memref<1x1xf32, #tpu.memory_space<vmem>>, %arg13: memref<4x8xf32, #tpu.memory_space<vmem>>) attributes {dimension_semantics = [#tpu.dimension_semantics<arbitrary>], iteration_bounds = array<i64: 1>, scalar_prefetch = 0 : i64, scratch_operands = 0 : i64, tpu.core_type = #tpu.core_type<tc>, window_params = [{pipeline_mode = #tpu.pipeline_mode<synchronous>, transform_indices = @transform_0, window_bounds = array<i64: 8, 2, 8, 4>}, {pipeline_mode = #tpu.pipeline_mode<synchronous>, transform_indices = @transform_1, window_bounds = array<i64: 2, 4, 48>}, {pipeline_mode = #tpu.pipeline_mode<synchronous>, transform_indices = @transform_2, window_bounds = array<i64: 1, 48>}, {pipeline_mode = #tpu.pipeline_mode<synchronous>, transform_indices = @transform_3, window_bounds = array<i64: 8, 8>}, {pipeline_mode = #tpu.pipeline_mode<synchronous>, transform_indices = @transform_4, window_bounds = array<i64: 3, 16, 16>}, {pipeline_mode = #tpu.pipeline_mode<synchronous>, transform_indices = @transform_5, window_bounds = array<i64: 1, 16>}, {pipeline_mode = #tpu.pipeline_mode<synchronous>, transform_indices = @transform_6, window_bounds = array<i64: 2, 16, 12>}, {pipeline_mode = #tpu.pipeline_mode<synchronous>, transform_indices = @transform_7, window_bounds = array<i64: 1, 12>}, {pipeline_mode = #tpu.pipeline_mode<synchronous>, transform_indices = @transform_8, window_bounds = array<i64: 1, 8, 1>}, {pipeline_mode = #tpu.pipeline_mode<synchronous>, transform_indices = @transform_9, window_bounds = array<i64: 1, 8, 1>}, {pipeline_mode = #tpu.pipeline_mode<synchronous>, transform_indices = @transform_10, window_bounds = array<i64: 1, 4>}, {pipeline_mode = #tpu.pipeline_mode<synchronous>, transform_indices = @transform_11, window_bounds = array<i64: 1, 1>}, {pipeline_mode = #tpu.pipeline_mode<synchronous>, transform_indices = @transform_12, window_bounds = array<i64: 4, 8>}]} {
    %c0 = arith.constant 0 : index
    %c0_0 = arith.constant 0 : index
    %0 = vector.load %arg4[%c0, %c0_0] : memref<8x8xf32, #tpu.memory_space<vmem>>, vector<8x8xf32>
    %c0_1 = arith.constant 0 : index
    %c0_2 = arith.constant 0 : index
    %c0_3 = arith.constant 0 : index
    %1 = vector.load %arg2[%c0_1, %c0_2, %c0_3] : memref<2x4x48xf32, #tpu.memory_space<vmem>>, vector<2x4x48xf32>
    %c0_4 = arith.constant 0 : index
    %c0_5 = arith.constant 0 : index
    %2 = vector.load %arg3[%c0_4, %c0_5] : memref<1x48xf32, #tpu.memory_space<vmem>>, vector<1x48xf32>
    %c0_6 = arith.constant 0 : index
    %c0_7 = arith.constant 0 : index
    %c0_8 = arith.constant 0 : index
    %3 = vector.load %arg5[%c0_6, %c0_7, %c0_8] : memref<3x16x16xf32, #tpu.memory_space<vmem>>, vector<3x16x16xf32>
    %c0_9 = arith.constant 0 : index
    %c0_10 = arith.constant 0 : index
    %4 = vector.load %arg6[%c0_9, %c0_10] : memref<1x16xf32, #tpu.memory_space<vmem>>, vector<1x16xf32>
    %c0_11 = arith.constant 0 : index
    %c0_12 = arith.constant 0 : index
    %c0_13 = arith.constant 0 : index
    %5 = vector.load %arg7[%c0_11, %c0_12, %c0_13] : memref<2x16x12xf32, #tpu.memory_space<vmem>>, vector<2x16x12xf32>
    %c0_14 = arith.constant 0 : index
    %c0_15 = arith.constant 0 : index
    %6 = vector.load %arg8[%c0_14, %c0_15] : memref<1x12xf32, #tpu.memory_space<vmem>>, vector<1x12xf32>
    %c0_16 = arith.constant 0 : index
    %c0_17 = arith.constant 0 : index
    %c0_18 = arith.constant 0 : index
    %7 = vector.load %arg9[%c0_16, %c0_17, %c0_18] : memref<1x8x1xf32, #tpu.memory_space<vmem>>, vector<1x8x1xf32>
    %c0_19 = arith.constant 0 : index
    %c0_20 = arith.constant 0 : index
    %c0_21 = arith.constant 0 : index
    %8 = vector.load %arg10[%c0_19, %c0_20, %c0_21] : memref<1x8x1xf32, #tpu.memory_space<vmem>>, vector<1x8x1xf32>
    %c0_22 = arith.constant 0 : index
    %c0_23 = arith.constant 0 : index
    %c0_24 = arith.constant 0 : index
    %c0_25 = arith.constant 0 : index
    %9 = vector.load %arg1[%c0_22, %c0_23, %c0_24, %c0_25] : memref<8x2x8x4xf32, #tpu.memory_space<vmem>>, vector<8x2x8x4xf32>
    %10 = vector.extract_strided_slice %9 {offsets = [0, 0, 0, 0], sizes = [7, 2, 8, 4], strides = [1, 1, 1, 1]} : vector<8x2x8x4xf32> to vector<7x2x8x4xf32>
    %11 = vector.shape_cast %10 : vector<7x2x8x4xf32> to vector<112x4xf32>
    %12 = vector.extract_strided_slice %1 {offsets = [0, 0, 0], sizes = [1, 4, 48], strides = [1, 1, 1]} : vector<2x4x48xf32> to vector<1x4x48xf32>
    %13 = vector.shape_cast %12 : vector<1x4x48xf32> to vector<4x48xf32>
    %cst = arith.constant dense<0.000000e+00> : vector<112x48xf32>
    %14 = tpu.matmul %11, %13, %cst {dimension_numbers = #tpu.dot_dimension_numbers<[1], [0], [0], [1], [0, 0, 1, 1], [], []>} : vector<112x4xf32>, vector<4x48xf32>, vector<112x48xf32> -> vector<112x48xf32>
    %15 = vector.broadcast %2 : vector<1x48xf32> to vector<112x48xf32>
    %16 = arith.addf %15, %14 : vector<112x48xf32>
    %17 = vector.extract_strided_slice %9 {offsets = [1, 0, 0, 0], sizes = [7, 2, 8, 4], strides = [1, 1, 1, 1]} : vector<8x2x8x4xf32> to vector<7x2x8x4xf32>
    %18 = vector.shape_cast %17 : vector<7x2x8x4xf32> to vector<112x4xf32>
    %19 = vector.extract_strided_slice %1 {offsets = [1, 0, 0], sizes = [1, 4, 48], strides = [1, 1, 1]} : vector<2x4x48xf32> to vector<1x4x48xf32>
    %20 = vector.shape_cast %19 : vector<1x4x48xf32> to vector<4x48xf32>
    %cst_26 = arith.constant dense<0.000000e+00> : vector<112x48xf32>
    %21 = tpu.matmul %18, %20, %cst_26 {dimension_numbers = #tpu.dot_dimension_numbers<[1], [0], [0], [1], [0, 0, 1, 1], [], []>} : vector<112x4xf32>, vector<4x48xf32>, vector<112x48xf32> -> vector<112x48xf32>
    %22 = arith.addf %16, %21 : vector<112x48xf32>
    %23 = vector.extract_strided_slice %22 {offsets = [0, 0], sizes = [112, 16], strides = [1, 1]} : vector<112x48xf32> to vector<112x16xf32>
    %24 = vector.extract_strided_slice %22 {offsets = [0, 16], sizes = [112, 16], strides = [1, 1]} : vector<112x48xf32> to vector<112x16xf32>
    %25 = vector.extract_strided_slice %22 {offsets = [0, 32], sizes = [112, 16], strides = [1, 1]} : vector<112x48xf32> to vector<112x16xf32>
    %26 = arith.negf %24 : vector<112x16xf32>
    %27 = math.exp %26 : vector<112x16xf32>
    %cst_27 = arith.constant 1.000000e+00 : f32
    %28 = vector.broadcast %cst_27 : f32 to vector<112x16xf32>
    %29 = arith.addf %28, %27 : vector<112x16xf32>
    %30 = arith.divf %28, %29 : vector<112x16xf32>
    %31 = arith.mulf %23, %30 : vector<112x16xf32>
    %32 = arith.addf %31, %25 : vector<112x16xf32>
    %cst_28 = arith.constant 0.000000e+00 : f32
    %33 = vector.broadcast %cst_28 : f32 to vector<112x16xf32>
    %34 = arith.maximumf %32, %33 : vector<112x16xf32>
    %35 = vector.shape_cast %34 : vector<112x16xf32> to vector<7x2x8x16xf32>
    %36 = vector.shape_cast %35 : vector<7x2x8x16xf32> to vector<112x16xf32>
    %37 = vector.extract_strided_slice %3 {offsets = [0, 0, 0], sizes = [1, 16, 16], strides = [1, 1, 1]} : vector<3x16x16xf32> to vector<1x16x16xf32>
    %38 = vector.shape_cast %37 : vector<1x16x16xf32> to vector<16x16xf32>
    %cst_29 = arith.constant dense<0.000000e+00> : vector<112x16xf32>
    %39 = tpu.matmul %36, %38, %cst_29 {dimension_numbers = #tpu.dot_dimension_numbers<[1], [0], [0], [1], [0, 0, 1, 1], [], []>} : vector<112x16xf32>, vector<16x16xf32>, vector<112x16xf32> -> vector<112x16xf32>
    %40 = vector.broadcast %4 : vector<1x16xf32> to vector<112x16xf32>
    %41 = arith.addf %39, %40 : vector<112x16xf32>
    %42 = vector.shape_cast %35 : vector<7x2x8x16xf32> to vector<14x8x16xf32>
    %43 = tpu.transpose %42, [1, 0, 2] : vector<14x8x16xf32> -> vector<8x14x16xf32>
    %44 = vector.shape_cast %43 : vector<8x14x16xf32> to vector<8x224xf32>
    %cst_30 = arith.constant dense<0.000000e+00> : vector<8x224xf32>
    %45 = tpu.matmul %0, %44, %cst_30 {dimension_numbers = #tpu.dot_dimension_numbers<[1], [0], [0], [1], [0, 0, 1, 1], [], []>} : vector<8x8xf32>, vector<8x224xf32>, vector<8x224xf32> -> vector<8x224xf32>
    %46 = vector.shape_cast %45 : vector<8x224xf32> to vector<8x14x16xf32>
    %47 = tpu.transpose %46, [1, 0, 2] : vector<8x14x16xf32> -> vector<14x8x16xf32>
    %48 = vector.shape_cast %47 : vector<14x8x16xf32> to vector<112x16xf32>
    %49 = vector.extract_strided_slice %3 {offsets = [1, 0, 0], sizes = [1, 16, 16], strides = [1, 1, 1]} : vector<3x16x16xf32> to vector<1x16x16xf32>
    %50 = vector.shape_cast %49 : vector<1x16x16xf32> to vector<16x16xf32>
    %cst_31 = arith.constant dense<0.000000e+00> : vector<112x16xf32>
    %51 = tpu.matmul %48, %50, %cst_31 {dimension_numbers = #tpu.dot_dimension_numbers<[1], [0], [0], [1], [0, 0, 1, 1], [], []>} : vector<112x16xf32>, vector<16x16xf32>, vector<112x16xf32> -> vector<112x16xf32>
    %52 = arith.addf %41, %51 : vector<112x16xf32>
    %cst_32 = arith.constant dense<0.000000e+00> : vector<8x224xf32>
    %53 = tpu.matmul %0, %45, %cst_32 {dimension_numbers = #tpu.dot_dimension_numbers<[1], [0], [0], [1], [0, 0, 1, 1], [], []>} : vector<8x8xf32>, vector<8x224xf32>, vector<8x224xf32> -> vector<8x224xf32>
    %cst_33 = arith.constant 2.000000e+00 : f32
    %54 = vector.broadcast %cst_33 : f32 to vector<8x224xf32>
    %55 = arith.mulf %54, %53 : vector<8x224xf32>
    %56 = arith.subf %55, %44 : vector<8x224xf32>
    %57 = vector.shape_cast %56 : vector<8x224xf32> to vector<8x14x16xf32>
    %58 = tpu.transpose %57, [1, 0, 2] : vector<8x14x16xf32> -> vector<14x8x16xf32>
    %59 = vector.shape_cast %58 : vector<14x8x16xf32> to vector<112x16xf32>
    %60 = vector.extract_strided_slice %3 {offsets = [2, 0, 0], sizes = [1, 16, 16], strides = [1, 1, 1]} : vector<3x16x16xf32> to vector<1x16x16xf32>
    %61 = vector.shape_cast %60 : vector<1x16x16xf32> to vector<16x16xf32>
    %cst_34 = arith.constant dense<0.000000e+00> : vector<112x16xf32>
    %62 = tpu.matmul %59, %61, %cst_34 {dimension_numbers = #tpu.dot_dimension_numbers<[1], [0], [0], [1], [0, 0, 1, 1], [], []>} : vector<112x16xf32>, vector<16x16xf32>, vector<112x16xf32> -> vector<112x16xf32>
    %63 = arith.addf %52, %62 : vector<112x16xf32>
    %cst_35 = arith.constant 0.000000e+00 : f32
    %64 = vector.broadcast %cst_35 : f32 to vector<112x16xf32>
    %65 = arith.maximumf %63, %64 : vector<112x16xf32>
    %66 = vector.shape_cast %65 : vector<112x16xf32> to vector<7x2x8x16xf32>
    %67 = vector.extract_strided_slice %66 {offsets = [0, 0, 0, 0], sizes = [6, 2, 8, 16], strides = [1, 1, 1, 1]} : vector<7x2x8x16xf32> to vector<6x2x8x16xf32>
    %68 = vector.shape_cast %67 : vector<6x2x8x16xf32> to vector<96x16xf32>
    %69 = vector.extract_strided_slice %5 {offsets = [0, 0, 0], sizes = [1, 16, 12], strides = [1, 1, 1]} : vector<2x16x12xf32> to vector<1x16x12xf32>
    %70 = vector.shape_cast %69 : vector<1x16x12xf32> to vector<16x12xf32>
    %cst_36 = arith.constant dense<0.000000e+00> : vector<96x12xf32>
    %71 = tpu.matmul %68, %70, %cst_36 {dimension_numbers = #tpu.dot_dimension_numbers<[1], [0], [0], [1], [0, 0, 1, 1], [], []>} : vector<96x16xf32>, vector<16x12xf32>, vector<96x12xf32> -> vector<96x12xf32>
    %72 = vector.broadcast %6 : vector<1x12xf32> to vector<96x12xf32>
    %73 = arith.addf %72, %71 : vector<96x12xf32>
    %74 = vector.extract_strided_slice %66 {offsets = [1, 0, 0, 0], sizes = [6, 2, 8, 16], strides = [1, 1, 1, 1]} : vector<7x2x8x16xf32> to vector<6x2x8x16xf32>
    %75 = vector.shape_cast %74 : vector<6x2x8x16xf32> to vector<96x16xf32>
    %76 = vector.extract_strided_slice %5 {offsets = [1, 0, 0], sizes = [1, 16, 12], strides = [1, 1, 1]} : vector<2x16x12xf32> to vector<1x16x12xf32>
    %77 = vector.shape_cast %76 : vector<1x16x12xf32> to vector<16x12xf32>
    %cst_37 = arith.constant dense<0.000000e+00> : vector<96x12xf32>
    %78 = tpu.matmul %75, %77, %cst_37 {dimension_numbers = #tpu.dot_dimension_numbers<[1], [0], [0], [1], [0, 0, 1, 1], [], []>} : vector<96x16xf32>, vector<16x12xf32>, vector<96x12xf32> -> vector<96x12xf32>
    %79 = arith.addf %73, %78 : vector<96x12xf32>
    %80 = vector.extract_strided_slice %79 {offsets = [0, 0], sizes = [96, 4], strides = [1, 1]} : vector<96x12xf32> to vector<96x4xf32>
    %81 = vector.extract_strided_slice %79 {offsets = [0, 4], sizes = [96, 4], strides = [1, 1]} : vector<96x12xf32> to vector<96x4xf32>
    %82 = vector.extract_strided_slice %79 {offsets = [0, 8], sizes = [96, 4], strides = [1, 1]} : vector<96x12xf32> to vector<96x4xf32>
    %83 = arith.negf %81 : vector<96x4xf32>
    %84 = math.exp %83 : vector<96x4xf32>
    %cst_38 = arith.constant 1.000000e+00 : f32
    %85 = vector.broadcast %cst_38 : f32 to vector<96x4xf32>
    %86 = arith.addf %85, %84 : vector<96x4xf32>
    %87 = arith.divf %85, %86 : vector<96x4xf32>
    %88 = arith.mulf %80, %87 : vector<96x4xf32>
    %89 = arith.addf %88, %82 : vector<96x4xf32>
    %cst_39 = arith.constant 0.000000e+00 : f32
    %90 = vector.broadcast %cst_39 : f32 to vector<96x4xf32>
    %91 = arith.maximumf %89, %90 : vector<96x4xf32>
    %92 = vector.shape_cast %91 : vector<96x4xf32> to vector<6x2x8x4xf32>
    %93 = vector.shape_cast %92 : vector<6x2x8x4xf32> to vector<12x8x4xf32>
    %cst_40 = arith.constant dense<0.000000e+00> : vector<12x8xf32>
    %94 = vector.multi_reduction <add>, %93, %cst_40 [2] : vector<12x8x4xf32> to vector<12x8xf32>
    %95 = vector.shape_cast %94 : vector<12x8xf32> to vector<12x8x1xf32>
    %cst_41 = arith.constant dense<0.000000e+00> : vector<8x1xf32>
    %96 = vector.multi_reduction <add>, %95, %cst_41 [0] : vector<12x8x1xf32> to vector<8x1xf32>
    %97 = vector.shape_cast %96 : vector<8x1xf32> to vector<1x8x1xf32>
    %98 = arith.mulf %93, %93 : vector<12x8x4xf32>
    %cst_42 = arith.constant dense<0.000000e+00> : vector<12x8xf32>
    %99 = vector.multi_reduction <add>, %98, %cst_42 [2] : vector<12x8x4xf32> to vector<12x8xf32>
    %100 = vector.shape_cast %99 : vector<12x8xf32> to vector<12x8x1xf32>
    %cst_43 = arith.constant dense<0.000000e+00> : vector<8x1xf32>
    %101 = vector.multi_reduction <add>, %100, %cst_43 [0] : vector<12x8x1xf32> to vector<8x1xf32>
    %102 = vector.shape_cast %101 : vector<8x1xf32> to vector<1x8x1xf32>
    %cst_44 = arith.constant 0.020833334 : f32
    %103 = vector.broadcast %cst_44 : f32 to vector<1x8x1xf32>
    %104 = arith.mulf %97, %103 : vector<1x8x1xf32>
    %cst_45 = arith.constant 0.020833334 : f32
    %105 = vector.broadcast %cst_45 : f32 to vector<1x8x1xf32>
    %106 = arith.mulf %102, %105 : vector<1x8x1xf32>
    %107 = arith.mulf %104, %104 : vector<1x8x1xf32>
    %108 = arith.subf %106, %107 : vector<1x8x1xf32>
    %cst_46 = arith.constant 0.000000e+00 : f32
    %109 = vector.broadcast %cst_46 : f32 to vector<1x8x1xf32>
    %110 = arith.maximumf %108, %109 : vector<1x8x1xf32>
    %111 = vector.broadcast %104 : vector<1x8x1xf32> to vector<12x8x4xf32>
    %112 = arith.subf %93, %111 : vector<12x8x4xf32>
    %cst_47 = arith.constant 9.99999974E-6 : f32
    %113 = vector.broadcast %cst_47 : f32 to vector<1x8x1xf32>
    %114 = arith.addf %110, %113 : vector<1x8x1xf32>
    %115 = math.rsqrt %114 : vector<1x8x1xf32>
    %116 = vector.broadcast %115 : vector<1x8x1xf32> to vector<12x8x4xf32>
    %117 = arith.mulf %112, %116 : vector<12x8x4xf32>
    %118 = vector.broadcast %7 : vector<1x8x1xf32> to vector<12x8x4xf32>
    %119 = arith.mulf %117, %118 : vector<12x8x4xf32>
    %120 = vector.broadcast %8 : vector<1x8x1xf32> to vector<12x8x4xf32>
    %121 = arith.addf %119, %120 : vector<12x8x4xf32>
    %cst_48 = arith.constant 0.000000e+00 : f32
    %122 = vector.broadcast %cst_48 : f32 to vector<12x8x4xf32>
    %123 = arith.maximumf %121, %122 : vector<12x8x4xf32>
    %124 = vector.shape_cast %123 : vector<12x8x4xf32> to vector<6x2x8x4xf32>
    %125 = vector.extract_strided_slice %124 {offsets = [0, 0, 0, 0], sizes = [5, 2, 8, 4], strides = [1, 1, 1, 1]} : vector<6x2x8x4xf32> to vector<5x2x8x4xf32>
    %126 = vector.shape_cast %125 : vector<5x2x8x4xf32> to vector<80x4xf32>
    %127 = vector.extract_strided_slice %1 {offsets = [0, 0, 0], sizes = [1, 4, 48], strides = [1, 1, 1]} : vector<2x4x48xf32> to vector<1x4x48xf32>
    %128 = vector.shape_cast %127 : vector<1x4x48xf32> to vector<4x48xf32>
    %cst_49 = arith.constant dense<0.000000e+00> : vector<80x48xf32>
    %129 = tpu.matmul %126, %128, %cst_49 {dimension_numbers = #tpu.dot_dimension_numbers<[1], [0], [0], [1], [0, 0, 1, 1], [], []>} : vector<80x4xf32>, vector<4x48xf32>, vector<80x48xf32> -> vector<80x48xf32>
    %130 = vector.broadcast %2 : vector<1x48xf32> to vector<80x48xf32>
    %131 = arith.addf %130, %129 : vector<80x48xf32>
    %132 = vector.extract_strided_slice %124 {offsets = [1, 0, 0, 0], sizes = [5, 2, 8, 4], strides = [1, 1, 1, 1]} : vector<6x2x8x4xf32> to vector<5x2x8x4xf32>
    %133 = vector.shape_cast %132 : vector<5x2x8x4xf32> to vector<80x4xf32>
    %134 = vector.extract_strided_slice %1 {offsets = [1, 0, 0], sizes = [1, 4, 48], strides = [1, 1, 1]} : vector<2x4x48xf32> to vector<1x4x48xf32>
    %135 = vector.shape_cast %134 : vector<1x4x48xf32> to vector<4x48xf32>
    %cst_50 = arith.constant dense<0.000000e+00> : vector<80x48xf32>
    %136 = tpu.matmul %133, %135, %cst_50 {dimension_numbers = #tpu.dot_dimension_numbers<[1], [0], [0], [1], [0, 0, 1, 1], [], []>} : vector<80x4xf32>, vector<4x48xf32>, vector<80x48xf32> -> vector<80x48xf32>
    %137 = arith.addf %131, %136 : vector<80x48xf32>
    %138 = vector.extract_strided_slice %137 {offsets = [0, 0], sizes = [80, 16], strides = [1, 1]} : vector<80x48xf32> to vector<80x16xf32>
    %139 = vector.extract_strided_slice %137 {offsets = [0, 16], sizes = [80, 16], strides = [1, 1]} : vector<80x48xf32> to vector<80x16xf32>
    %140 = vector.extract_strided_slice %137 {offsets = [0, 32], sizes = [80, 16], strides = [1, 1]} : vector<80x48xf32> to vector<80x16xf32>
    %141 = arith.negf %139 : vector<80x16xf32>
    %142 = math.exp %141 : vector<80x16xf32>
    %cst_51 = arith.constant 1.000000e+00 : f32
    %143 = vector.broadcast %cst_51 : f32 to vector<80x16xf32>
    %144 = arith.addf %143, %142 : vector<80x16xf32>
    %145 = arith.divf %143, %144 : vector<80x16xf32>
    %146 = arith.mulf %138, %145 : vector<80x16xf32>
    %147 = arith.addf %146, %140 : vector<80x16xf32>
    %cst_52 = arith.constant 0.000000e+00 : f32
    %148 = vector.broadcast %cst_52 : f32 to vector<80x16xf32>
    %149 = arith.maximumf %147, %148 : vector<80x16xf32>
    %150 = vector.shape_cast %149 : vector<80x16xf32> to vector<5x2x8x16xf32>
    %151 = vector.shape_cast %150 : vector<5x2x8x16xf32> to vector<80x16xf32>
    %152 = vector.extract_strided_slice %3 {offsets = [0, 0, 0], sizes = [1, 16, 16], strides = [1, 1, 1]} : vector<3x16x16xf32> to vector<1x16x16xf32>
    %153 = vector.shape_cast %152 : vector<1x16x16xf32> to vector<16x16xf32>
    %cst_53 = arith.constant dense<0.000000e+00> : vector<80x16xf32>
    %154 = tpu.matmul %151, %153, %cst_53 {dimension_numbers = #tpu.dot_dimension_numbers<[1], [0], [0], [1], [0, 0, 1, 1], [], []>} : vector<80x16xf32>, vector<16x16xf32>, vector<80x16xf32> -> vector<80x16xf32>
    %155 = vector.broadcast %4 : vector<1x16xf32> to vector<80x16xf32>
    %156 = arith.addf %154, %155 : vector<80x16xf32>
    %157 = vector.shape_cast %150 : vector<5x2x8x16xf32> to vector<10x8x16xf32>
    %158 = tpu.transpose %157, [1, 0, 2] : vector<10x8x16xf32> -> vector<8x10x16xf32>
    %159 = vector.shape_cast %158 : vector<8x10x16xf32> to vector<8x160xf32>
    %cst_54 = arith.constant dense<0.000000e+00> : vector<8x160xf32>
    %160 = tpu.matmul %0, %159, %cst_54 {dimension_numbers = #tpu.dot_dimension_numbers<[1], [0], [0], [1], [0, 0, 1, 1], [], []>} : vector<8x8xf32>, vector<8x160xf32>, vector<8x160xf32> -> vector<8x160xf32>
    %161 = vector.shape_cast %160 : vector<8x160xf32> to vector<8x10x16xf32>
    %162 = tpu.transpose %161, [1, 0, 2] : vector<8x10x16xf32> -> vector<10x8x16xf32>
    %163 = vector.shape_cast %162 : vector<10x8x16xf32> to vector<80x16xf32>
    %164 = vector.extract_strided_slice %3 {offsets = [1, 0, 0], sizes = [1, 16, 16], strides = [1, 1, 1]} : vector<3x16x16xf32> to vector<1x16x16xf32>
    %165 = vector.shape_cast %164 : vector<1x16x16xf32> to vector<16x16xf32>
    %cst_55 = arith.constant dense<0.000000e+00> : vector<80x16xf32>
    %166 = tpu.matmul %163, %165, %cst_55 {dimension_numbers = #tpu.dot_dimension_numbers<[1], [0], [0], [1], [0, 0, 1, 1], [], []>} : vector<80x16xf32>, vector<16x16xf32>, vector<80x16xf32> -> vector<80x16xf32>
    %167 = arith.addf %156, %166 : vector<80x16xf32>
    %cst_56 = arith.constant dense<0.000000e+00> : vector<8x160xf32>
    %168 = tpu.matmul %0, %160, %cst_56 {dimension_numbers = #tpu.dot_dimension_numbers<[1], [0], [0], [1], [0, 0, 1, 1], [], []>} : vector<8x8xf32>, vector<8x160xf32>, vector<8x160xf32> -> vector<8x160xf32>
    %cst_57 = arith.constant 2.000000e+00 : f32
    %169 = vector.broadcast %cst_57 : f32 to vector<8x160xf32>
    %170 = arith.mulf %169, %168 : vector<8x160xf32>
    %171 = arith.subf %170, %159 : vector<8x160xf32>
    %172 = vector.shape_cast %171 : vector<8x160xf32> to vector<8x10x16xf32>
    %173 = tpu.transpose %172, [1, 0, 2] : vector<8x10x16xf32> -> vector<10x8x16xf32>
    %174 = vector.shape_cast %173 : vector<10x8x16xf32> to vector<80x16xf32>
    %175 = vector.extract_strided_slice %3 {offsets = [2, 0, 0], sizes = [1, 16, 16], strides = [1, 1, 1]} : vector<3x16x16xf32> to vector<1x16x16xf32>
    %176 = vector.shape_cast %175 : vector<1x16x16xf32> to vector<16x16xf32>
    %cst_58 = arith.constant dense<0.000000e+00> : vector<80x16xf32>
    %177 = tpu.matmul %174, %176, %cst_58 {dimension_numbers = #tpu.dot_dimension_numbers<[1], [0], [0], [1], [0, 0, 1, 1], [], []>} : vector<80x16xf32>, vector<16x16xf32>, vector<80x16xf32> -> vector<80x16xf32>
    %178 = arith.addf %167, %177 : vector<80x16xf32>
    %cst_59 = arith.constant 0.000000e+00 : f32
    %179 = vector.broadcast %cst_59 : f32 to vector<80x16xf32>
    %180 = arith.maximumf %178, %179 : vector<80x16xf32>
    %181 = vector.shape_cast %180 : vector<80x16xf32> to vector<5x2x8x16xf32>
    %182 = vector.extract_strided_slice %181 {offsets = [0, 0, 0, 0], sizes = [4, 2, 8, 16], strides = [1, 1, 1, 1]} : vector<5x2x8x16xf32> to vector<4x2x8x16xf32>
    %183 = vector.shape_cast %182 : vector<4x2x8x16xf32> to vector<64x16xf32>
    %184 = vector.extract_strided_slice %5 {offsets = [0, 0, 0], sizes = [1, 16, 12], strides = [1, 1, 1]} : vector<2x16x12xf32> to vector<1x16x12xf32>
    %185 = vector.shape_cast %184 : vector<1x16x12xf32> to vector<16x12xf32>
    %cst_60 = arith.constant dense<0.000000e+00> : vector<64x12xf32>
    %186 = tpu.matmul %183, %185, %cst_60 {dimension_numbers = #tpu.dot_dimension_numbers<[1], [0], [0], [1], [0, 0, 1, 1], [], []>} : vector<64x16xf32>, vector<16x12xf32>, vector<64x12xf32> -> vector<64x12xf32>
    %187 = vector.broadcast %6 : vector<1x12xf32> to vector<64x12xf32>
    %188 = arith.addf %187, %186 : vector<64x12xf32>
    %189 = vector.extract_strided_slice %181 {offsets = [1, 0, 0, 0], sizes = [4, 2, 8, 16], strides = [1, 1, 1, 1]} : vector<5x2x8x16xf32> to vector<4x2x8x16xf32>
    %190 = vector.shape_cast %189 : vector<4x2x8x16xf32> to vector<64x16xf32>
    %191 = vector.extract_strided_slice %5 {offsets = [1, 0, 0], sizes = [1, 16, 12], strides = [1, 1, 1]} : vector<2x16x12xf32> to vector<1x16x12xf32>
    %192 = vector.shape_cast %191 : vector<1x16x12xf32> to vector<16x12xf32>
    %cst_61 = arith.constant dense<0.000000e+00> : vector<64x12xf32>
    %193 = tpu.matmul %190, %192, %cst_61 {dimension_numbers = #tpu.dot_dimension_numbers<[1], [0], [0], [1], [0, 0, 1, 1], [], []>} : vector<64x16xf32>, vector<16x12xf32>, vector<64x12xf32> -> vector<64x12xf32>
    %194 = arith.addf %188, %193 : vector<64x12xf32>
    %195 = vector.extract_strided_slice %194 {offsets = [0, 0], sizes = [64, 4], strides = [1, 1]} : vector<64x12xf32> to vector<64x4xf32>
    %196 = vector.extract_strided_slice %194 {offsets = [0, 4], sizes = [64, 4], strides = [1, 1]} : vector<64x12xf32> to vector<64x4xf32>
    %197 = vector.extract_strided_slice %194 {offsets = [0, 8], sizes = [64, 4], strides = [1, 1]} : vector<64x12xf32> to vector<64x4xf32>
    %198 = arith.negf %196 : vector<64x4xf32>
    %199 = math.exp %198 : vector<64x4xf32>
    %cst_62 = arith.constant 1.000000e+00 : f32
    %200 = vector.broadcast %cst_62 : f32 to vector<64x4xf32>
    %201 = arith.addf %200, %199 : vector<64x4xf32>
    %202 = arith.divf %200, %201 : vector<64x4xf32>
    %203 = arith.mulf %195, %202 : vector<64x4xf32>
    %204 = arith.addf %203, %197 : vector<64x4xf32>
    %cst_63 = arith.constant 0.000000e+00 : f32
    %205 = vector.broadcast %cst_63 : f32 to vector<64x4xf32>
    %206 = arith.maximumf %204, %205 : vector<64x4xf32>
    %207 = vector.shape_cast %206 : vector<64x4xf32> to vector<4x2x8x4xf32>
    %208 = vector.shape_cast %207 : vector<4x2x8x4xf32> to vector<8x8x4xf32>
    %cst_64 = arith.constant dense<0.000000e+00> : vector<8x8xf32>
    %209 = vector.multi_reduction <add>, %208, %cst_64 [2] : vector<8x8x4xf32> to vector<8x8xf32>
    %210 = vector.shape_cast %209 : vector<8x8xf32> to vector<8x8x1xf32>
    %cst_65 = arith.constant dense<0.000000e+00> : vector<8x1xf32>
    %211 = vector.multi_reduction <add>, %210, %cst_65 [0] : vector<8x8x1xf32> to vector<8x1xf32>
    %212 = vector.shape_cast %211 : vector<8x1xf32> to vector<1x8x1xf32>
    %213 = arith.mulf %208, %208 : vector<8x8x4xf32>
    %cst_66 = arith.constant dense<0.000000e+00> : vector<8x8xf32>
    %214 = vector.multi_reduction <add>, %213, %cst_66 [2] : vector<8x8x4xf32> to vector<8x8xf32>
    %215 = vector.shape_cast %214 : vector<8x8xf32> to vector<8x8x1xf32>
    %cst_67 = arith.constant dense<0.000000e+00> : vector<8x1xf32>
    %216 = vector.multi_reduction <add>, %215, %cst_67 [0] : vector<8x8x1xf32> to vector<8x1xf32>
    %217 = vector.shape_cast %216 : vector<8x1xf32> to vector<1x8x1xf32>
    %cst_68 = arith.constant 3.125000e-02 : f32
    %218 = vector.broadcast %cst_68 : f32 to vector<1x8x1xf32>
    %219 = arith.mulf %212, %218 : vector<1x8x1xf32>
    %cst_69 = arith.constant 3.125000e-02 : f32
    %220 = vector.broadcast %cst_69 : f32 to vector<1x8x1xf32>
    %221 = arith.mulf %217, %220 : vector<1x8x1xf32>
    %222 = arith.mulf %219, %219 : vector<1x8x1xf32>
    %223 = arith.subf %221, %222 : vector<1x8x1xf32>
    %cst_70 = arith.constant 0.000000e+00 : f32
    %224 = vector.broadcast %cst_70 : f32 to vector<1x8x1xf32>
    %225 = arith.maximumf %223, %224 : vector<1x8x1xf32>
    %226 = vector.broadcast %219 : vector<1x8x1xf32> to vector<8x8x4xf32>
    %227 = arith.subf %208, %226 : vector<8x8x4xf32>
    %cst_71 = arith.constant 9.99999974E-6 : f32
    %228 = vector.broadcast %cst_71 : f32 to vector<1x8x1xf32>
    %229 = arith.addf %225, %228 : vector<1x8x1xf32>
    %230 = math.rsqrt %229 : vector<1x8x1xf32>
    %231 = vector.broadcast %230 : vector<1x8x1xf32> to vector<8x8x4xf32>
    %232 = arith.mulf %227, %231 : vector<8x8x4xf32>
    %233 = vector.broadcast %7 : vector<1x8x1xf32> to vector<8x8x4xf32>
    %234 = arith.mulf %232, %233 : vector<8x8x4xf32>
    %235 = vector.broadcast %8 : vector<1x8x1xf32> to vector<8x8x4xf32>
    %236 = arith.addf %234, %235 : vector<8x8x4xf32>
    %cst_72 = arith.constant 0.000000e+00 : f32
    %237 = vector.broadcast %cst_72 : f32 to vector<8x8x4xf32>
    %238 = arith.maximumf %236, %237 : vector<8x8x4xf32>
    %239 = vector.shape_cast %238 : vector<8x8x4xf32> to vector<4x2x8x4xf32>
    %240 = vector.extract_strided_slice %239 {offsets = [0, 0, 0, 0], sizes = [3, 2, 8, 4], strides = [1, 1, 1, 1]} : vector<4x2x8x4xf32> to vector<3x2x8x4xf32>
    %241 = vector.shape_cast %240 : vector<3x2x8x4xf32> to vector<48x4xf32>
    %242 = vector.extract_strided_slice %1 {offsets = [0, 0, 0], sizes = [1, 4, 48], strides = [1, 1, 1]} : vector<2x4x48xf32> to vector<1x4x48xf32>
    %243 = vector.shape_cast %242 : vector<1x4x48xf32> to vector<4x48xf32>
    %cst_73 = arith.constant dense<0.000000e+00> : vector<48x48xf32>
    %244 = tpu.matmul %241, %243, %cst_73 {dimension_numbers = #tpu.dot_dimension_numbers<[1], [0], [0], [1], [0, 0, 1, 1], [], []>} : vector<48x4xf32>, vector<4x48xf32>, vector<48x48xf32> -> vector<48x48xf32>
    %245 = vector.broadcast %2 : vector<1x48xf32> to vector<48x48xf32>
    %246 = arith.addf %245, %244 : vector<48x48xf32>
    %247 = vector.extract_strided_slice %239 {offsets = [1, 0, 0, 0], sizes = [3, 2, 8, 4], strides = [1, 1, 1, 1]} : vector<4x2x8x4xf32> to vector<3x2x8x4xf32>
    %248 = vector.shape_cast %247 : vector<3x2x8x4xf32> to vector<48x4xf32>
    %249 = vector.extract_strided_slice %1 {offsets = [1, 0, 0], sizes = [1, 4, 48], strides = [1, 1, 1]} : vector<2x4x48xf32> to vector<1x4x48xf32>
    %250 = vector.shape_cast %249 : vector<1x4x48xf32> to vector<4x48xf32>
    %cst_74 = arith.constant dense<0.000000e+00> : vector<48x48xf32>
    %251 = tpu.matmul %248, %250, %cst_74 {dimension_numbers = #tpu.dot_dimension_numbers<[1], [0], [0], [1], [0, 0, 1, 1], [], []>} : vector<48x4xf32>, vector<4x48xf32>, vector<48x48xf32> -> vector<48x48xf32>
    %252 = arith.addf %246, %251 : vector<48x48xf32>
    %253 = vector.extract_strided_slice %252 {offsets = [0, 0], sizes = [48, 16], strides = [1, 1]} : vector<48x48xf32> to vector<48x16xf32>
    %254 = vector.extract_strided_slice %252 {offsets = [0, 16], sizes = [48, 16], strides = [1, 1]} : vector<48x48xf32> to vector<48x16xf32>
    %255 = vector.extract_strided_slice %252 {offsets = [0, 32], sizes = [48, 16], strides = [1, 1]} : vector<48x48xf32> to vector<48x16xf32>
    %256 = arith.negf %254 : vector<48x16xf32>
    %257 = math.exp %256 : vector<48x16xf32>
    %cst_75 = arith.constant 1.000000e+00 : f32
    %258 = vector.broadcast %cst_75 : f32 to vector<48x16xf32>
    %259 = arith.addf %258, %257 : vector<48x16xf32>
    %260 = arith.divf %258, %259 : vector<48x16xf32>
    %261 = arith.mulf %253, %260 : vector<48x16xf32>
    %262 = arith.addf %261, %255 : vector<48x16xf32>
    %cst_76 = arith.constant 0.000000e+00 : f32
    %263 = vector.broadcast %cst_76 : f32 to vector<48x16xf32>
    %264 = arith.maximumf %262, %263 : vector<48x16xf32>
    %265 = vector.shape_cast %264 : vector<48x16xf32> to vector<3x2x8x16xf32>
    %266 = vector.shape_cast %265 : vector<3x2x8x16xf32> to vector<48x16xf32>
    %267 = vector.extract_strided_slice %3 {offsets = [0, 0, 0], sizes = [1, 16, 16], strides = [1, 1, 1]} : vector<3x16x16xf32> to vector<1x16x16xf32>
    %268 = vector.shape_cast %267 : vector<1x16x16xf32> to vector<16x16xf32>
    %cst_77 = arith.constant dense<0.000000e+00> : vector<48x16xf32>
    %269 = tpu.matmul %266, %268, %cst_77 {dimension_numbers = #tpu.dot_dimension_numbers<[1], [0], [0], [1], [0, 0, 1, 1], [], []>} : vector<48x16xf32>, vector<16x16xf32>, vector<48x16xf32> -> vector<48x16xf32>
    %270 = vector.broadcast %4 : vector<1x16xf32> to vector<48x16xf32>
    %271 = arith.addf %269, %270 : vector<48x16xf32>
    %272 = vector.shape_cast %265 : vector<3x2x8x16xf32> to vector<6x8x16xf32>
    %273 = tpu.transpose %272, [1, 0, 2] : vector<6x8x16xf32> -> vector<8x6x16xf32>
    %274 = vector.shape_cast %273 : vector<8x6x16xf32> to vector<8x96xf32>
    %cst_78 = arith.constant dense<0.000000e+00> : vector<8x96xf32>
    %275 = tpu.matmul %0, %274, %cst_78 {dimension_numbers = #tpu.dot_dimension_numbers<[1], [0], [0], [1], [0, 0, 1, 1], [], []>} : vector<8x8xf32>, vector<8x96xf32>, vector<8x96xf32> -> vector<8x96xf32>
    %276 = vector.shape_cast %275 : vector<8x96xf32> to vector<8x6x16xf32>
    %277 = tpu.transpose %276, [1, 0, 2] : vector<8x6x16xf32> -> vector<6x8x16xf32>
    %278 = vector.shape_cast %277 : vector<6x8x16xf32> to vector<48x16xf32>
    %279 = vector.extract_strided_slice %3 {offsets = [1, 0, 0], sizes = [1, 16, 16], strides = [1, 1, 1]} : vector<3x16x16xf32> to vector<1x16x16xf32>
    %280 = vector.shape_cast %279 : vector<1x16x16xf32> to vector<16x16xf32>
    %cst_79 = arith.constant dense<0.000000e+00> : vector<48x16xf32>
    %281 = tpu.matmul %278, %280, %cst_79 {dimension_numbers = #tpu.dot_dimension_numbers<[1], [0], [0], [1], [0, 0, 1, 1], [], []>} : vector<48x16xf32>, vector<16x16xf32>, vector<48x16xf32> -> vector<48x16xf32>
    %282 = arith.addf %271, %281 : vector<48x16xf32>
    %cst_80 = arith.constant dense<0.000000e+00> : vector<8x96xf32>
    %283 = tpu.matmul %0, %275, %cst_80 {dimension_numbers = #tpu.dot_dimension_numbers<[1], [0], [0], [1], [0, 0, 1, 1], [], []>} : vector<8x8xf32>, vector<8x96xf32>, vector<8x96xf32> -> vector<8x96xf32>
    %cst_81 = arith.constant 2.000000e+00 : f32
    %284 = vector.broadcast %cst_81 : f32 to vector<8x96xf32>
    %285 = arith.mulf %284, %283 : vector<8x96xf32>
    %286 = arith.subf %285, %274 : vector<8x96xf32>
    %287 = vector.shape_cast %286 : vector<8x96xf32> to vector<8x6x16xf32>
    %288 = tpu.transpose %287, [1, 0, 2] : vector<8x6x16xf32> -> vector<6x8x16xf32>
    %289 = vector.shape_cast %288 : vector<6x8x16xf32> to vector<48x16xf32>
    %290 = vector.extract_strided_slice %3 {offsets = [2, 0, 0], sizes = [1, 16, 16], strides = [1, 1, 1]} : vector<3x16x16xf32> to vector<1x16x16xf32>
    %291 = vector.shape_cast %290 : vector<1x16x16xf32> to vector<16x16xf32>
    %cst_82 = arith.constant dense<0.000000e+00> : vector<48x16xf32>
    %292 = tpu.matmul %289, %291, %cst_82 {dimension_numbers = #tpu.dot_dimension_numbers<[1], [0], [0], [1], [0, 0, 1, 1], [], []>} : vector<48x16xf32>, vector<16x16xf32>, vector<48x16xf32> -> vector<48x16xf32>
    %293 = arith.addf %282, %292 : vector<48x16xf32>
    %cst_83 = arith.constant 0.000000e+00 : f32
    %294 = vector.broadcast %cst_83 : f32 to vector<48x16xf32>
    %295 = arith.maximumf %293, %294 : vector<48x16xf32>
    %296 = vector.shape_cast %295 : vector<48x16xf32> to vector<3x2x8x16xf32>
    %297 = vector.extract_strided_slice %296 {offsets = [0, 0, 0, 0], sizes = [2, 2, 8, 16], strides = [1, 1, 1, 1]} : vector<3x2x8x16xf32> to vector<2x2x8x16xf32>
    %298 = vector.shape_cast %297 : vector<2x2x8x16xf32> to vector<32x16xf32>
    %299 = vector.extract_strided_slice %5 {offsets = [0, 0, 0], sizes = [1, 16, 12], strides = [1, 1, 1]} : vector<2x16x12xf32> to vector<1x16x12xf32>
    %300 = vector.shape_cast %299 : vector<1x16x12xf32> to vector<16x12xf32>
    %cst_84 = arith.constant dense<0.000000e+00> : vector<32x12xf32>
    %301 = tpu.matmul %298, %300, %cst_84 {dimension_numbers = #tpu.dot_dimension_numbers<[1], [0], [0], [1], [0, 0, 1, 1], [], []>} : vector<32x16xf32>, vector<16x12xf32>, vector<32x12xf32> -> vector<32x12xf32>
    %302 = vector.broadcast %6 : vector<1x12xf32> to vector<32x12xf32>
    %303 = arith.addf %302, %301 : vector<32x12xf32>
    %304 = vector.extract_strided_slice %296 {offsets = [1, 0, 0, 0], sizes = [2, 2, 8, 16], strides = [1, 1, 1, 1]} : vector<3x2x8x16xf32> to vector<2x2x8x16xf32>
    %305 = vector.shape_cast %304 : vector<2x2x8x16xf32> to vector<32x16xf32>
    %306 = vector.extract_strided_slice %5 {offsets = [1, 0, 0], sizes = [1, 16, 12], strides = [1, 1, 1]} : vector<2x16x12xf32> to vector<1x16x12xf32>
    %307 = vector.shape_cast %306 : vector<1x16x12xf32> to vector<16x12xf32>
    %cst_85 = arith.constant dense<0.000000e+00> : vector<32x12xf32>
    %308 = tpu.matmul %305, %307, %cst_85 {dimension_numbers = #tpu.dot_dimension_numbers<[1], [0], [0], [1], [0, 0, 1, 1], [], []>} : vector<32x16xf32>, vector<16x12xf32>, vector<32x12xf32> -> vector<32x12xf32>
    %309 = arith.addf %303, %308 : vector<32x12xf32>
    %310 = vector.extract_strided_slice %309 {offsets = [0, 0], sizes = [32, 4], strides = [1, 1]} : vector<32x12xf32> to vector<32x4xf32>
    %311 = vector.extract_strided_slice %309 {offsets = [0, 4], sizes = [32, 4], strides = [1, 1]} : vector<32x12xf32> to vector<32x4xf32>
    %312 = vector.extract_strided_slice %309 {offsets = [0, 8], sizes = [32, 4], strides = [1, 1]} : vector<32x12xf32> to vector<32x4xf32>
    %313 = arith.negf %311 : vector<32x4xf32>
    %314 = math.exp %313 : vector<32x4xf32>
    %cst_86 = arith.constant 1.000000e+00 : f32
    %315 = vector.broadcast %cst_86 : f32 to vector<32x4xf32>
    %316 = arith.addf %315, %314 : vector<32x4xf32>
    %317 = arith.divf %315, %316 : vector<32x4xf32>
    %318 = arith.mulf %310, %317 : vector<32x4xf32>
    %319 = arith.addf %318, %312 : vector<32x4xf32>
    %cst_87 = arith.constant 0.000000e+00 : f32
    %320 = vector.broadcast %cst_87 : f32 to vector<32x4xf32>
    %321 = arith.maximumf %319, %320 : vector<32x4xf32>
    %322 = vector.shape_cast %321 : vector<32x4xf32> to vector<2x2x8x4xf32>
    %323 = vector.shape_cast %322 : vector<2x2x8x4xf32> to vector<4x8x4xf32>
    %cst_88 = arith.constant dense<0.000000e+00> : vector<4x8xf32>
    %324 = vector.multi_reduction <add>, %323, %cst_88 [2] : vector<4x8x4xf32> to vector<4x8xf32>
    %325 = vector.shape_cast %324 : vector<4x8xf32> to vector<4x8x1xf32>
    %cst_89 = arith.constant dense<0.000000e+00> : vector<8x1xf32>
    %326 = vector.multi_reduction <add>, %325, %cst_89 [0] : vector<4x8x1xf32> to vector<8x1xf32>
    %327 = vector.shape_cast %326 : vector<8x1xf32> to vector<1x8x1xf32>
    %328 = arith.mulf %323, %323 : vector<4x8x4xf32>
    %cst_90 = arith.constant dense<0.000000e+00> : vector<4x8xf32>
    %329 = vector.multi_reduction <add>, %328, %cst_90 [2] : vector<4x8x4xf32> to vector<4x8xf32>
    %330 = vector.shape_cast %329 : vector<4x8xf32> to vector<4x8x1xf32>
    %cst_91 = arith.constant dense<0.000000e+00> : vector<8x1xf32>
    %331 = vector.multi_reduction <add>, %330, %cst_91 [0] : vector<4x8x1xf32> to vector<8x1xf32>
    %332 = vector.shape_cast %331 : vector<8x1xf32> to vector<1x8x1xf32>
    %cst_92 = arith.constant 6.250000e-02 : f32
    %333 = vector.broadcast %cst_92 : f32 to vector<1x8x1xf32>
    %334 = arith.mulf %327, %333 : vector<1x8x1xf32>
    %cst_93 = arith.constant 6.250000e-02 : f32
    %335 = vector.broadcast %cst_93 : f32 to vector<1x8x1xf32>
    %336 = arith.mulf %332, %335 : vector<1x8x1xf32>
    %337 = arith.mulf %334, %334 : vector<1x8x1xf32>
    %338 = arith.subf %336, %337 : vector<1x8x1xf32>
    %cst_94 = arith.constant 0.000000e+00 : f32
    %339 = vector.broadcast %cst_94 : f32 to vector<1x8x1xf32>
    %340 = arith.maximumf %338, %339 : vector<1x8x1xf32>
    %341 = vector.broadcast %334 : vector<1x8x1xf32> to vector<4x8x4xf32>
    %342 = arith.subf %323, %341 : vector<4x8x4xf32>
    %cst_95 = arith.constant 9.99999974E-6 : f32
    %343 = vector.broadcast %cst_95 : f32 to vector<1x8x1xf32>
    %344 = arith.addf %340, %343 : vector<1x8x1xf32>
    %345 = math.rsqrt %344 : vector<1x8x1xf32>
    %346 = vector.broadcast %345 : vector<1x8x1xf32> to vector<4x8x4xf32>
    %347 = arith.mulf %342, %346 : vector<4x8x4xf32>
    %348 = vector.broadcast %7 : vector<1x8x1xf32> to vector<4x8x4xf32>
    %349 = arith.mulf %347, %348 : vector<4x8x4xf32>
    %350 = vector.broadcast %8 : vector<1x8x1xf32> to vector<4x8x4xf32>
    %351 = arith.addf %349, %350 : vector<4x8x4xf32>
    %cst_96 = arith.constant 0.000000e+00 : f32
    %352 = vector.broadcast %cst_96 : f32 to vector<4x8x4xf32>
    %353 = arith.maximumf %351, %352 : vector<4x8x4xf32>
    %354 = vector.shape_cast %353 : vector<4x8x4xf32> to vector<2x2x8x4xf32>
    %c0_97 = arith.constant 0 : index
    %c0_98 = arith.constant 0 : index
    %355 = vector.load %arg11[%c0_97, %c0_98] : memref<1x4xf32, #tpu.memory_space<vmem>>, vector<1x4xf32>
    %356 = vector.shape_cast %355 : vector<1x4xf32> to vector<1x1x1x4xf32>
    %357 = vector.broadcast %356 : vector<1x1x1x4xf32> to vector<2x2x8x4xf32>
    %358 = arith.mulf %354, %357 : vector<2x2x8x4xf32>
    %cst_99 = arith.constant dense<0.000000e+00> : vector<2x2x8xf32>
    %359 = vector.multi_reduction <add>, %358, %cst_99 [3] : vector<2x2x8x4xf32> to vector<2x2x8xf32>
    %360 = vector.shape_cast %359 : vector<2x2x8xf32> to vector<4x8xf32>
    %c0_100 = arith.constant 0 : index
    %c0_101 = arith.constant 0 : index
    %361 = vector.load %arg12[%c0_100, %c0_101] : memref<1x1xf32, #tpu.memory_space<vmem>>, vector<1x1xf32>
    %362 = vector.broadcast %361 : vector<1x1xf32> to vector<4x8xf32>
    %363 = arith.addf %360, %362 : vector<4x8xf32>
    %c0_102 = arith.constant 0 : index
    %c0_103 = arith.constant 0 : index
    %364 = vector.load %arg13[%c0_102, %c0_103] : memref<4x8xf32, #tpu.memory_space<vmem>>, vector<4x8xf32>
    tpu.vector_store %arg13[%c0_102, %c0_103], %363 {strides = array<i32>} : memref<4x8xf32, #tpu.memory_space<vmem>>, vector<4x8xf32>,
    return
  }
  func.func @transform_0(%arg0: i32) -> (i32, i32, i32, i32) {
    %c0_i32 = arith.constant 0 : i32
    %c0_i32_0 = arith.constant 0 : i32
    %c0_i32_1 = arith.constant 0 : i32
    %c0_i32_2 = arith.constant 0 : i32
    %c0_i32_3 = arith.constant 0 : i32
    return %c0_i32, %c0_i32_0, %c0_i32_1, %c0_i32_2 : i32, i32, i32, i32
  }
  func.func @transform_1(%arg0: i32) -> (i32, i32, i32) {
    %c0_i32 = arith.constant 0 : i32
    %c0_i32_0 = arith.constant 0 : i32
    %c0_i32_1 = arith.constant 0 : i32
    %c0_i32_2 = arith.constant 0 : i32
    return %c0_i32, %c0_i32_0, %c0_i32_1 : i32, i32, i32
  }
  func.func @transform_2(%arg0: i32) -> (i32, i32) {
    %c0_i32 = arith.constant 0 : i32
    %c0_i32_0 = arith.constant 0 : i32
    %c0_i32_1 = arith.constant 0 : i32
    return %c0_i32, %c0_i32_0 : i32, i32
  }
  func.func @transform_3(%arg0: i32) -> (i32, i32) {
    %c0_i32 = arith.constant 0 : i32
    %c0_i32_0 = arith.constant 0 : i32
    %c0_i32_1 = arith.constant 0 : i32
    return %c0_i32, %c0_i32_0 : i32, i32
  }
  func.func @transform_4(%arg0: i32) -> (i32, i32, i32) {
    %c0_i32 = arith.constant 0 : i32
    %c0_i32_0 = arith.constant 0 : i32
    %c0_i32_1 = arith.constant 0 : i32
    %c0_i32_2 = arith.constant 0 : i32
    return %c0_i32, %c0_i32_0, %c0_i32_1 : i32, i32, i32
  }
  func.func @transform_5(%arg0: i32) -> (i32, i32) {
    %c0_i32 = arith.constant 0 : i32
    %c0_i32_0 = arith.constant 0 : i32
    %c0_i32_1 = arith.constant 0 : i32
    return %c0_i32, %c0_i32_0 : i32, i32
  }
  func.func @transform_6(%arg0: i32) -> (i32, i32, i32) {
    %c0_i32 = arith.constant 0 : i32
    %c0_i32_0 = arith.constant 0 : i32
    %c0_i32_1 = arith.constant 0 : i32
    %c0_i32_2 = arith.constant 0 : i32
    return %c0_i32, %c0_i32_0, %c0_i32_1 : i32, i32, i32
  }
  func.func @transform_7(%arg0: i32) -> (i32, i32) {
    %c0_i32 = arith.constant 0 : i32
    %c0_i32_0 = arith.constant 0 : i32
    %c0_i32_1 = arith.constant 0 : i32
    return %c0_i32, %c0_i32_0 : i32, i32
  }
  func.func @transform_8(%arg0: i32) -> (i32, i32, i32) {
    %c0_i32 = arith.constant 0 : i32
    %c0_i32_0 = arith.constant 0 : i32
    %c0_i32_1 = arith.constant 0 : i32
    %c0_i32_2 = arith.constant 0 : i32
    return %c0_i32, %c0_i32_0, %c0_i32_1 : i32, i32, i32
  }
  func.func @transform_9(%arg0: i32) -> (i32, i32, i32) {
    %c0_i32 = arith.constant 0 : i32
    %c0_i32_0 = arith.constant 0 : i32
    %c0_i32_1 = arith.constant 0 : i32
    %c0_i32_2 = arith.constant 0 : i32
    return %c0_i32, %c0_i32_0, %c0_i32_1 : i32, i32, i32
  }
  func.func @transform_10(%arg0: i32) -> (i32, i32) {
    %c0_i32 = arith.constant 0 : i32
    %c0_i32_0 = arith.constant 0 : i32
    %c0_i32_1 = arith.constant 0 : i32
    return %c0_i32, %c0_i32_0 : i32, i32
  }
  func.func @transform_11(%arg0: i32) -> (i32, i32) {
    %c0_i32 = arith.constant 0 : i32
    %c0_i32_0 = arith.constant 0 : i32
    %c0_i32_1 = arith.constant 0 : i32
    return %c0_i32, %c0_i32_0 : i32, i32
  }
  func.func @transform_12(%arg0: i32) -> (i32, i32) {
    %c0_i32 = arith.constant 0 : i32
    %c0_i32_0 = arith.constant 0 : i32
    %c0_i32_1 = arith.constant 0 : i32
    return %c0_i32, %c0_i32_0 : i32, i32
  }
}

</mosaic_0001>

<bundles_post_ra>
// kernel: stconv_model.1
= control target key start
LH: loop header
LB: loop body
LE: loop exit
PB: predicated region body
PF: predicated region fallthrough
CT: control target
= control target key end

     0   :  { %vm120_vm0 = vcmask 1043456   ;;  %vm77_vm1 = vcmask 31744   ;;  %s10193_s23 = smov 96   ;;  %s10194_s27 = smov 112   ;;  %vm681_vm2 = vcmask 130048   ;;  %vm1432_vm3 = vcmask 261120   ;;  %s11951_s1 = inlined_call_operand.vmem [shape: f32[2,4,48], index: 1, kind: input, shape index: {}]   ;;  %s11952_s0 = inlined_call_operand.vmem [shape: f32[8,2,8,4], index: 0, kind: input, shape index: {}]   ;;  %s11953_s2 = inlined_call_operand.vmem [shape: f32[1,48], index: 2, kind: input, shape index: {}]   ;;  %s11954_s4 = inlined_call_operand.vmem [shape: f32[3,16,16], index: 4, kind: input, shape index: {}]   ;;  %s11955_s3 = inlined_call_operand.vmem [shape: f32[8,8], index: 3, kind: input, shape index: {}]   ;;  %s11956_s6 = inlined_call_operand.vmem [shape: f32[2,16,12], index: 6, kind: input, shape index: {}]   ;;  %s11957_s5 = inlined_call_operand.vmem [shape: f32[1,16], index: 5, kind: input, shape index: {}]   ;;  %s11958_s7 = inlined_call_operand.vmem [shape: f32[1,12], index: 7, kind: input, shape index: {}]   ;;  %s11959_s8 = inlined_call_operand.vmem [shape: f32[1,8,1], index: 8, kind: input, shape index: {}]   ;;  %s11960_s9 = inlined_call_operand.vmem [shape: f32[1,8,1], index: 9, kind: input, shape index: {}]   ;;  %s11961_s11 = inlined_call_operand.<no memory space> [shape: f32[1,1], index: 11, kind: input, shape index: {}]   ;;  %s11962_s10 = inlined_call_operand.vmem [shape: f32[1,4], index: 10, kind: input, shape index: {}]   ;;  %s11963_s12 = inlined_call_operand.vmem [shape: f32[4,8], index: 12, kind: output, shape index: {}]  }
   0x1   :  { %v44_v0 = vld [vmem:[%s11951_s1] sm:$0xf]  ;;  %v62_v2 = vld [vmem:[%s11952_s0 + $0x8] sm:$0xff]  ;;  %v63_v3 = vld [vmem:[%s11952_s0 + $0x10] sm:$0xff]  ;;  %s10198_s28 = smov 32   ;;  %s10199_s29 = smov 16  }
   0x2   :  { %v61_v1 = vld [vmem:[%s11952_s0] sm:$0xff]  ;;  %9306 = vmatprep.subr.msk.mxu0 %vm120_vm0, %v44_v0  ;;  %v64_v4 = vld [vmem:[%s11952_s0 + $0x18] sm:$0xff]  ;;  %v66_v7 = vld [vmem:[%s11952_s0 + $0x28] sm:$0xff]  ;;  %s10200_s30 = smov 48   ;;  %s10201_s13 = smov 64   ;;  %vm1434_vm4 = vcmask 392192  }
   0x3   :  { %9308 = vmatprep.mubr.msk.f32.mxu0 %vm77_vm1, %v61_v1  ;;  %9307 = vmatpush3.msk.msra.mxu0 %vm120_vm0, %v44_v0  ;;  %v65_v5 = vld [vmem:[%s11952_s0 + $0x20] sm:$0xff]  ;;  %v67_v8 = vld [vmem:[%s11952_s0 + $0x30] sm:$0xff]  ;;  %v68_v9 = vld [vmem:[%s11952_s0 + $0x38] sm:$0xff]  ;;  %s10202_s14 = smov 80   ;;  %vm1436_vm5 = vcmask 523264   ;;  %vm1438_vm6 = vcmask 654336  }
   0x4   :  { %9309 = vmatmul.mubr.msk.f32.vlgmr.msra.gmra.mrb[0].mxu0 %vm77_vm1, %v62_v2  ;;  %v45_v6 = vld [vmem:[%s11951_s1 + $0x4] sm:$0xf]  ;;  %v70_v11 = vld [vmem:[%s11952_s0 + $0x48] sm:$0xff]  ;;  %v71_v12 = vld [vmem:[%s11952_s0 + $0x50] sm:$0xff]  ;;  %vm1440_vm7 = vcmask 785408   ;;  %vm1442_vm8 = vcmask 916480  }
   0x5   :  { %9311 = vmatprep.mubr.msk.f32.mxu0 %vm77_vm1, %v63_v3  ;;  %9329 = vmatprep.subr.msk.mxu0 %vm120_vm0, %v45_v6  ;;  %v69_v10 = vld [vmem:[%s11952_s0 + $0x40] sm:$0xff]  ;;  %v72_v13 = vld [vmem:[%s11952_s0 + $0x58] sm:$0xff]  ;;  %v74_v15 = vld [vmem:[%s11952_s0 + $0x68] sm:$0xff]  ;;  %vm1449_vm9 = vcmask 64512   ;;  %s10204_s15 = smov 124   ;;  %vm10206_vm10 = vmmov 0  }
   0x6   :  { %9330 = vmatpush3.msk.msra.mxu0 %vm120_vm0, %v45_v6  ;;  %v73_v14 = vld [vmem:[%s11952_s0 + $0x60] sm:$0xff]  ;;  %v75_v16 = vld [vmem:[%s11952_s0 + $0x70] sm:$0xff]  ;;  %v76_v17 = vld [vmem:[%s11952_s0 + $0x78] sm:$0xff]  ;;  %vm8684_vm11 = vcmask 1041409   ;;  %vm8686_vm12 = vcmask 1042434   ;;  %vm8688_vm13 = vcmask 1043459  }
   0x7   :  { %v10361_v18 = vld [vmem:[%s11953_s2] ss:$0 sm:$0xff]  ;;  %v48_v62 = vld [vmem:[%s11954_s4 + $0x8] sm:$0xff]  ;;  %vm8691_vm14 = vcmask 60416  }
   0x8   :  { %9312 = vmatmul.mubr.msk.f32.gmra.mrb[2].mxu0 %vm77_vm1, %v64_v4  ;;  %v47_v61 = vld [vmem:[%s11954_s4] sm:$0xff] }
   0x9   :  { %9314 = vmatprep.mubr.msk.f32.mxu0 %vm77_vm1, %v65_v5  ;;  %v10438_v1 = vpack.c.bf16 %v48_v62, %v47_v61 }
   0xb   :  { %9686 = vmatprep.subr.bf16.mxu1 %v10438_v1 }
   0xc   :  { %9315 = vmatmul.mubr.msk.f32.gmra.mrb[4].mxu0 %vm77_vm1, %v66_v7  ;;  %9688 = vmatpush3.bf16.msra.mxu1 %v10438_v1 }
   0xd   :  { %9317 = vmatprep.mubr.msk.f32.mxu0 %vm77_vm1, %v67_v8 }
  0x10   :  { %9318 = vmatmul.mubr.msk.f32.gmra.mrb[6].mxu0 %vm77_vm1, %v68_v9 }
  0x11   :  { %9320 = vmatprep.mubr.msk.f32.mxu0 %vm77_vm1, %v69_v10 }
  0x14   :  { %9321 = vmatmul.mubr.msk.f32.gmra.mrb[8].mxu0 %vm77_vm1, %v70_v11 }
  0x15   :  { %9323 = vmatprep.mubr.msk.f32.mxu0 %vm77_vm1, %v71_v12 }
  0x18   :  { %9324 = vmatmul.mubr.msk.f32.gmra.mrb[10].mxu0 %vm77_vm1, %v72_v13 }
  0x19   :  { %9326 = vmatprep.mubr.msk.f32.mxu0 %vm77_vm1, %v73_v14 }
  0x1c   :  { %9327 = vmatmul.mubr.msk.f32.gmra.mrb[12].mxu0 %vm77_vm1, %v74_v15 }
  0x1d   :  { %9331 = vmatprep.mubr.msk.f32.mxu0 %vm77_vm1, %v63_v3 }
  0x20   :  { %9332 = vmatmul.mubr.msk.f32.vlgmr.msra.gmra.mrb[0].mxu0 %vm77_vm1, %v64_v4 }
  0x21   :  { %9334 = vmatprep.mubr.msk.f32.mxu0 %vm77_vm1, %v65_v5 }
  0x24   :  { %9335 = vmatmul.mubr.msk.f32.gmra.mrb[2].mxu0 %vm77_vm1, %v66_v7 }
  0x25   :  { %9337 = vmatprep.mubr.msk.f32.mxu0 %vm77_vm1, %v67_v8 }
  0x28   :  { %9338 = vmatmul.mubr.msk.f32.gmra.mrb[4].mxu0 %vm77_vm1, %v68_v9 }
  0x29   :  { %9340 = vmatprep.mubr.msk.f32.mxu0 %vm77_vm1, %v69_v10 }
  0x2c   :  { %9341 = vmatmul.mubr.msk.f32.gmra.mrb[6].mxu0 %vm77_vm1, %v70_v11 }
  0x2d   :  { %9343 = vmatprep.mubr.msk.f32.mxu0 %vm77_vm1, %v71_v12 }
  0x30   :  { %9344 = vmatmul.mubr.msk.f32.gmra.mrb[8].mxu0 %vm77_vm1, %v72_v13 }
  0x31   :  { %9346 = vmatprep.mubr.msk.f32.mxu0 %vm77_vm1, %v73_v14 }
  0x34   :  { %9347 = vmatmul.mubr.msk.f32.gmra.mrb[10].mxu0 %vm77_vm1, %v74_v15 }
  0x35   :  { %9349 = vmatprep.mubr.msk.f32.mxu0 %vm77_vm1, %v75_v16 }
  0x38   :  { %9350 = vmatmul.mubr.msk.f32.gmra.mrb[12].mxu0 %vm77_vm1, %v76_v17 }
  0xf3   :  { %v9333_v19 = vpop.f32.mrb[0].mxu0 }
  0xf4   :  { %v10364_v20 = vadd.f32 %v9333_v19, %v10361_v18  ;;  %v354_v21 = vpop.f32.mrb[1].mxu0 }
  0xf5   :  { %v10367_v22 = vadd.f32 %v10361_v18, %v354_v21 }
  0xf6   :  { %v8729_v23 = vmul.f32 -1.442695, %v10364_v20  ;;  %607 = vrot.lane.b32.xlu1 %v10364_v20, %s10193_s23 }
  0xf7   :  { %v8728_v24 = vmul.f32 -1.442695, %v10367_v22  ;;  %605 = vrot.lane.b32.xlu0 %v10367_v22, %s10193_s23  ;;  %v9336_v25 = vpop.f32.mrb[2].mxu0 }
  0xf8   :  { %9959 = vpow2.f32 %v8729_v23  ;;  %v10376_v26 = vadd.f32 %v9336_v25, %v10361_v18  ;;  %v364_v27 = vpop.f32.mrb[3].mxu0 }
  0xf9   :  { %9961 = vpow2.f32 %v8728_v24  ;;  %v10379_v28 = vadd.f32 %v10361_v18, %v364_v27 }
  0xfa   :  { %v8731_v29 = vmul.f32 -1.442695, %v10376_v26  ;;  %611 = vrot.lane.b32.xlu1 %v10376_v26, %s10193_s23 }
  0xfb   :  { %v8730_v30 = vmul.f32 -1.442695, %v10379_v28  ;;  %609 = vrot.lane.b32.xlu0 %v10379_v28, %s10193_s23  ;;  %v9339_v31 = vpop.f32.mrb[4].mxu0 }
  0xfc   :  { %9963 = vpow2.f32 %v8731_v29  ;;  %v10388_v32 = vadd.f32 %v9339_v31, %v10361_v18  ;;  %v374_v33 = vpop.f32.mrb[5].mxu0 }
  0xfd   :  { %9965 = vpow2.f32 %v8730_v30  ;;  %v10391_v34 = vadd.f32 %v10361_v18, %v374_v33 }
  0xfe   :  { %v8733_v35 = vmul.f32 -1.442695, %v10388_v32  ;;  %615 = vrot.lane.b32.xlu1 %v10388_v32, %s10193_s23 }
  0xff   :  { %v8732_v36 = vmul.f32 -1.442695, %v10391_v34  ;;  %613 = vrot.lane.b32.xlu0 %v10391_v34, %s10193_s23  ;;  %v9342_v37 = vpop.f32.mrb[6].mxu0 }
 0x100   :  { %9967 = vpow2.f32 %v8733_v35  ;;  %v10400_v38 = vadd.f32 %v9342_v37, %v10361_v18  ;;  %v384_v39 = vpop.f32.mrb[7].mxu0 }
 0x101   :  { %9969 = vpow2.f32 %v8732_v36  ;;  %v10403_v40 = vadd.f32 %v10361_v18, %v384_v39 }
 0x102   :  { %v9960_v41 = vpop.eup %9959  ;;  %v8735_v42 = vmul.f32 -1.442695, %v10400_v38  ;;  %619 = vrot.lane.b32.xlu1 %v10400_v38, %s10193_s23 }
 0x103   :  { %v9962_v43 = vpop.eup %9961  ;;  %v480_v44 = vadd.f32 1.0, %v9960_v41  ;;  %v8734_v45 = vmul.f32 -1.442695, %v10403_v40  ;;  %617 = vrot.lane.b32.xlu0 %v10403_v40, %s10193_s23  ;;  %v9345_v46 = vpop.f32.mrb[8].mxu0 }
 0x104   :  { %v479_v47 = vadd.f32 1.0, %v9962_v43  ;;  %9971 = vpow2.f32 %v8735_v42  ;;  %v10412_v48 = vadd.f32 %v9345_v46, %v10361_v18  ;;  %v394_v49 = vpop.f32.mrb[9].mxu0 }
 0x105   :  { %9973 = vrcp.f32 %v480_v44  ;;  %v10415_v50 = vadd.f32 %v10361_v18, %v394_v49 }
 0x106   :  { %v9964_v51 = vpop.eup %9963  ;;  %9975 = vrcp.f32 %v479_v47  ;;  %v8737_v52 = vmul.f32 -1.442695, %v10412_v48  ;;  %623 = vrot.lane.b32.xlu1 %v10412_v48, %s10193_s23  ;;  %v10195_v47 = vmov 0.0  }
 0x107   :  { %v9966_v53 = vpop.eup %9965  ;;  %v482_v54 = vadd.f32 1.0, %v9964_v51  ;;  %9977 = vpow2.f32 %v8734_v45  ;;  %v8736_v55 = vmul.f32 -1.442695, %v10415_v50  ;;  %621 = vrot.lane.b32.xlu0 %v10415_v50, %s10193_s23  ;;  %v9348_v56 = vpop.f32.mrb[10].mxu0  ;;  %2341 = vmatprep.mubr.f32.mxu0 %v10195_v47 }
 0x108   :  { %9979 = vpow2.f32 %v8737_v52  ;;  %v10424_v57 = vadd.f32 %v9348_v56, %v10361_v18  ;;  %v404_v58 = vpop.f32.mrb[11].mxu0  ;;  %v481_v59 = vadd.f32 1.0, %v9966_v53 }
 0x109   :  { %9981 = vrcp.f32 %v482_v54  ;;  %v10427_v60 = vadd.f32 %v10361_v18, %v404_v58 }
 0x10a   :  { %v9968_v63 = vpop.eup %9967  ;;  %v8739_v0 = vmul.f32 -1.442695, %v10424_v57  ;;  %627 = vrot.lane.b32.xlu1 %v10424_v57, %s10193_s23  ;;  %9983 = vpow2.f32 %v8736_v55 }
 0x10b   :  { %v9970_v2 = vpop.eup %9969  ;;  %v8738_v3 = vmul.f32 -1.442695, %v10427_v60  ;;  %625 = vrot.lane.b32.xlu0 %v10427_v60, %s10193_s23  ;;  %v9351_v4 = vpop.f32.mrb[12].mxu0  ;;  %v484_v8 = vadd.f32 1.0, %v9968_v63 }
 0x10c   :  { %v483_v5 = vadd.f32 1.0, %v9970_v2  ;;  %9985 = vpow2.f32 %v8739_v0  ;;  %v10444_v6 = vadd.f32 %v9351_v4, %v10361_v18  ;;  %v414_v7 = vpop.f32.mrb[13].mxu0 }
 0x10d   :  { %9987 = vrcp.f32 %v481_v59  ;;  %v10448_v9 = vadd.f32 %v10361_v18, %v414_v7  ;;  %v10196_v7 = vmov 1983009808  }
 0x10e   :  { %v9972_v10 = vpop.eup %9971  ;;  %9989 = vrcp.f32 %v483_v5  ;;  %v8741_v11 = vmul.f32 -1.442695, %v10444_v6 }
 0x10f   :  { %v9974_v12 = vpop.eup %9973  ;;  %9991 = vpow2.f32 %v8738_v3  ;;  %v8740_v13 = vmul.f32 -1.442695, %v10448_v9  ;;  %v486_v16 = vadd.f32 1.0, %v9972_v10  ;;  %v864_v10 = vlaneseq }
 0x110   :  { %v9976_v14 = vpop.eup %9975  ;;  %9993 = vpow2.f32 %v8741_v11  ;;  %537 = vrot.lane.b32.xlu0 %v9974_v12, %s10194_s27 }
 0x111   :  { %v9978_v15 = vpop.eup %9977  ;;  %9995 = vrcp.f32 %v484_v8  ;;  %v862_v8 = vunpack.c.l.s4 %v10196_v7 }
 0x112   :  { %v9980_v17 = vpop.eup %9979  ;;  %v485_v18 = vadd.f32 1.0, %v9978_v15  ;;  %9997 = vpow2.f32 %v8740_v13 }
 0x113   :  { %v9982_v19 = vpop.eup %9981  ;;  %v488_v23 = vadd.f32 1.0, %v9980_v17  ;;  %v10486_v17 = vshrl.u32 %v864_v10, 7 }
 0x114   :  { %9999 = vrcp.f32 %v485_v18  ;;  %541 = vrot.lane.b32.xlu1 %v9982_v19, %s10194_s27  ;;  %535 = vrot.lane.b32.xlu0 %v9976_v14, %s10194_s27  ;;  %v9984_v21 = vpop.eup %9983 }
 0x115   :  { %10001 = vrcp.f32 %v486_v16  ;;  %v487_v25 = vadd.f32 1.0, %v9984_v21  ;;  %v863_v16 = vunpack.c.0.s8 %v862_v8 }
 0x116   :  { %v9986_v24 = vpop.eup %9985 }
 0x117   :  { %v9988_v27 = vpop.eup %9987  ;;  %10003 = vrcp.f32 %v487_v25  ;;  %v490_v31 = vadd.f32 1.0, %v9986_v24 }
 0x118   :  { %v9990_v29 = vpop.eup %9989  ;;  %539 = vrot.lane.b32.xlu1 %v9988_v27, %s10194_s27  ;;  %10005 = vrcp.f32 %v488_v23  ;;  %v10197_v23 = vmov 1934713408  }
 0x119   :  { %v9992_v30 = vpop.eup %9991  ;;  %543 = vrot.lane.b32.xlu0 %v9990_v29, %s10194_s27 }
 0x11a   :  { %v9994_v33 = vpop.eup %9993  ;;  %v489_v35 = vadd.f32 1.0, %v9992_v30 }
 0x11b   :  { %v9996_v36 = vpop.eup %9995  ;;  %v492_v39 = vadd.f32 1.0, %v9994_v33 }
 0x11c   :  { %v9998_v37 = vpop.eup %9997  ;;  %10007 = vrcp.f32 %v489_v35  ;;  %545 = vrot.lane.b32.xlu1 %v9996_v36, %s10194_s27 }
 0x11d   :  { %10009 = vrcp.f32 %v490_v31  ;;  %v491_v41 = vadd.f32 1.0, %v9998_v37 }
 0x11e   :  { %v10000_v42 = vpop.eup %9999 }
 0x11f   :  { %v10002_v43 = vpop.eup %10001  ;;  %10011 = vrcp.f32 %v491_v41  ;;  %547 = vrot.lane.b32.xlu0 %v10000_v42, %s10194_s27 }
 0x120   :  { %549 = vrot.lane.b32.xlu1 %v10002_v43, %s10194_s27  ;;  %10013 = vrcp.f32 %v492_v39 }
 0x121   :  { %v10004_v44 = vpop.eup %10003 }
 0x122   :  { %v10006_v45 = vpop.eup %10005 }
 0x123   :  { %551 = vrot.lane.b32.xlu0 %v10004_v44, %s10194_s27 }
 0x124   :  { %553 = vrot.lane.b32.xlu1 %v10006_v45, %s10194_s27 }
 0x126   :  { %v10008_v46 = vpop.eup %10007 }
 0x127   :  { %v10010_v49 = vpop.eup %10009  ;;  %555 = vrot.lane.b32.xlu0 %v10008_v46, %s10194_s27 }
 0x128   :  { %557 = vrot.lane.b32.xlu1 %v10010_v49, %s10194_s27 }
 0x129   :  { %v10012_v51 = vpop.eup %10011 }
 0x12a   :  { %v10014_v52 = vpop.eup %10013 }
 0x12b   :  { %559 = vrot.lane.b32.xlu0 %v10012_v51, %s10194_s27 }
 0x12c   :  { %561 = vrot.lane.b32.xlu1 %v10014_v52, %s10194_s27 }
 0x12f   :  { %629 = vrot.lane.b32.xlu0 %v10448_v9, %s10193_s23 }
 0x130   :  { %631 = vrot.lane.b32.xlu1 %v10444_v6, %s10193_s23 }
 0x168   :  { %v608_v53 = vpop.permute.xlu1 %607 }
 0x169   :  { %v606_v54 = vpop.permute.xlu0 %605 }
 0x16c   :  { %v612_v55 = vpop.permute.xlu1 %611 }
 0x16d   :  { %v610_v56 = vpop.permute.xlu0 %609 }
 0x170   :  { %v616_v58 = vpop.permute.xlu1 %615 }
 0x171   :  { %v614_v59 = vpop.permute.xlu0 %613 }
 0x174   :  { %v10472_v62 = vpop.permute.xlu1 %619 }
 0x175   :  { %v618_v61 = vpop.permute.xlu0 %617 }
 0x178   :  { %v10476_v0 = vpop.permute.xlu1 %623 }
 0x179   :  { %v10474_v63 = vpop.permute.xlu0 %621 }
 0x17c   :  { %v10480_v3 = vpop.permute.xlu1 %627 }
 0x17d   :  { %v10478_v2 = vpop.permute.xlu0 %625 }
 0x182   :  { %v538_v4 = vpop.permute.xlu0 %537 }
 0x183   :  { %v578_v5 = vmul.f32 %v10364_v20, %v538_v4  ;;  %v926_v20 = vunpack.c.l.s4 %v10197_v23 }
 0x185   :  { %v648_v15 = vadd.f32 %v608_v53, %v578_v5  ;;  %v927_v39 = vunpack.c.0.s8 %v926_v20 }
 0x186   :  { %v542_v11 = vpop.permute.xlu1 %541  ;;  %v536_v12 = vpop.permute.xlu0 %535 }
 0x187   :  { %v580_v13 = vmul.f32 %v10376_v26, %v542_v11  ;;  %v577_v14 = vmul.f32 %v10367_v22, %v536_v12  ;;  %v662_v30 = vmax.f32 %v648_v15, 0.0  ;;  %v10491_v22 = vsub.s32 %v863_v16, %v10486_v17 }
 0x188   :  { %v10502_v53 = vsub.s32 %v927_v39, %v10486_v17 }
 0x189   :  { %v650_v18 = vadd.f32 %v612_v55, %v580_v13  ;;  %v647_v19 = vadd.f32 %v606_v54, %v577_v14 }
 0x18a   :  { %v540_v21 = vpop.permute.xlu1 %539 }
 0x18b   :  { %v664_v24 = vmax.f32 %v650_v18, 0.0  ;;  %v579_v25 = vmul.f32 %v10379_v28, %v540_v21  ;;  %v544_v27 = vpop.permute.xlu0 %543  ;;  %v661_v29 = vmax.f32 %v647_v19, 0.0 }
 0x18c   :  { %v581_v26 = vmul.f32 %v10391_v34, %v544_v27 }
 0x18d   :  { %v649_v31 = vadd.f32 %v610_v56, %v579_v25  ;;  %9356 = vmatprep.mubr.msk.f32.mxu1 %vm681_vm2, %v661_v29  ;;  %v875_v33 = vcombine.low %v662_v30, %v664_v24  ;;  %v876_v35 = vcombine.high %v662_v30, %v664_v24 }
 0x18e   :  { %v651_v36 = vadd.f32 %v614_v59, %v581_v26  ;;  %v546_v37 = vpop.permute.xlu1 %545  ;;  %9357 = vmatmul.mubr.msk.f32.vlgmr.msra.gmra.mrb[0].mxu1 %vm681_vm2, %v662_v30 }
 0x18f   :  { %v663_v41 = vmax.f32 %v649_v31, 0.0  ;;  %v582_v28 = vmul.f32 %v10388_v32, %v546_v37  ;;  %v883_v46 = vrot.slane %v875_v33, %v10491_v22  ;;  %v890_v49 = vrot.slane %v876_v35, %v10491_v22 }
 0x190   :  { %v665_v42 = vmax.f32 %v651_v36, 0.0 }
 0x191   :  { %v859_v43 = vcombine.low %v661_v29, %v663_v41  ;;  %v860_v44 = vcombine.high %v661_v29, %v663_v41  ;;  %v652_v34 = vadd.f32 %v616_v58, %v582_v28  ;;  %v548_v45 = vpop.permute.xlu0 %547  ;;  %9359 = vmatprep.mubr.msk.f32.mxu1 %vm681_vm2, %v663_v41 }
 0x192   :  { %v583_v51 = vmul.f32 %v10403_v40, %v548_v45  ;;  %v550_v52 = vpop.permute.xlu1 %549  ;;  %9360 = vmatmul.mubr.msk.f32.gmra.mrb[2].mxu1 %vm681_vm2, %v664_v24 }
 0x193   :  { %v867_v32 = vrot.slane %v859_v43, %v10491_v22  ;;  %v874_v54 = vrot.slane %v860_v44, %v10491_v22  ;;  %v666_v55 = vmax.f32 %v652_v34, 0.0  ;;  %v584_v56 = vmul.f32 %v10400_v38, %v550_v52  ;;  %9362 = vmatprep.mubr.msk.f32.mxu1 %vm681_vm2, %v665_v42 }
 0x194   :  { %v653_v58 = vadd.f32 %v618_v61, %v583_v51 }
 0x195   :  { %v923_v59 = vcombine.low %v867_v32, %v883_v46  ;;  %v924_v4 = vcombine.high %v867_v32, %v883_v46  ;;  %v939_v5 = vcombine.low %v874_v54, %v890_v49  ;;  %v940_v40 = vcombine.high %v874_v54, %v890_v49  ;;  %v552_v7 = vpop.permute.xlu0 %551 }
 0x196   :  { %v667_v8 = vmax.f32 %v653_v58, 0.0  ;;  %v654_v11 = vadd.f32 %v10472_v62, %v584_v56  ;;  %v585_v12 = vmul.f32 %v10415_v50, %v552_v7  ;;  %v554_v13 = vpop.permute.xlu1 %553  ;;  %9363 = vmatmul.mubr.msk.f32.gmra.mrb[4].mxu1 %vm681_vm2, %v666_v55 }
 0x197   :  { %v586_v14 = vmul.f32 %v10412_v48, %v554_v13  ;;  %v931_v38 = vrot.slane %v923_v59, %v10502_v53  ;;  %v938_v15 = vrot.slane %v924_v4, %v10502_v53  ;;  %v947_v61 = vrot.slane %v939_v5, %v10502_v53 }
 0x198   :  { %v891_v16 = vcombine.low %v665_v42, %v667_v8  ;;  %v892_v18 = vcombine.high %v665_v42, %v667_v8  ;;  %v668_v19 = vmax.f32 %v654_v11, 0.0  ;;  %v655_v21 = vadd.f32 %v10474_v63, %v585_v12  ;;  %9365 = vmatprep.mubr.msk.f32.mxu1 %vm681_vm2, %v667_v8 }
 0x199   :  { %v656_v50 = vadd.f32 %v10476_v0, %v586_v14  ;;  %v556_v62 = vpop.permute.xlu0 %555  ;;  %v954_v23 = vrot.slane %v940_v40, %v10502_v53  ;;  %v8757_v20 = vcombine.low %v931_v38, %v938_v15  ;;  %v8759_v48 = vcombine.high %v931_v38, %v938_v15 }
 0x19a   :  { %v10520_v24 = vrot.slane %v891_v16, %v10491_v22  ;;  %v10523_v25 = vrot.slane %v892_v18, %v10491_v22  ;;  %v907_v27 = vcombine.low %v666_v55, %v668_v19  ;;  %v908_v29 = vcombine.high %v666_v55, %v668_v19  ;;  %v558_v30 = vpop.permute.xlu1 %557  ;;  %9366 = vmatmul.mubr.msk.f32.gmra.mrb[6].mxu1 %vm681_vm2, %v668_v19 }
 0x19b   :  { %v669_v63 = vmax.f32 %v655_v21, 0.0  ;;  %v670_v26 = vmax.f32 %v656_v50, 0.0  ;;  %v587_v0 = vmul.f32 %v10427_v60, %v556_v62  ;;  %v588_v31 = vmul.f32 %v10424_v57, %v558_v30 }
 0x19c   :  { %v915_v33 = vrot.slane %v907_v27, %v10491_v22  ;;  %v10530_v35 = vrot.slane %v908_v29, %v10491_v22  ;;  %v1137_v36 = vrot.slane %v8757_v20, %v10491_v22  ;;  %v1153_v37 = vrot.slane %v8759_v48, %v10491_v22 }
 0x19d   :  { %v657_v39 = vadd.f32 %v10478_v2, %v587_v0  ;;  %v658_v41 = vadd.f32 %v10480_v3, %v588_v31  ;;  %9368 = vmatprep.mubr.msk.f32.mxu1 %vm681_vm2, %v669_v63  ;;  %v560_v28 = vpop.permute.xlu0 %559  ;;  %v8761_v42 = vcombine.low %v947_v61, %v954_v23  ;;  %v8763_v60 = vcombine.high %v947_v61, %v954_v23 }
 0x19e   :  { %v955_v57 = vcombine.low %v10520_v24, %v915_v33  ;;  %v956_v43 = vcombine.high %v10520_v24, %v915_v33  ;;  %v971_v44 = vcombine.low %v10523_v25, %v10530_v35  ;;  %9369 = vmatmul.mubr.msk.f32.gmra.mrb[8].mxu1 %vm681_vm2, %v670_v26  ;;  %v562_v34 = vpop.permute.xlu1 %561  ;;  %v972_v2 = vcombine.high %v10523_v25, %v10530_v35 }
 0x19f   :  { %v671_v45 = vmax.f32 %v657_v39, 0.0  ;;  %v672_v3 = vmax.f32 %v658_v41, 0.0  ;;  %v589_v46 = vmul.f32 %v10448_v9, %v560_v28  ;;  %v1169_v49 = vrot.slane %v8761_v42, %v10491_v22 }
 0x1a0   :  { %v1185_v51 = vrot.slane %v8763_v60, %v10491_v22  ;;  %v1194_v52 = vcombine.high %v1137_v36, %v1153_v37  ;;  %v1193_v32 = vcombine.low %v1137_v36, %v1153_v37  ;;  %v590_v4 = vmul.f32 %v10444_v6, %v562_v34 }
 0x1a1   :  { %v995_v54 = vcombine.low %v669_v63, %v671_v45  ;;  %v996_v55 = vcombine.high %v669_v63, %v671_v45  ;;  %v1011_v56 = vcombine.low %v670_v26, %v672_v3  ;;  %v1012_v58 = vcombine.high %v670_v26, %v672_v3  ;;  %9371 = vmatprep.mubr.msk.f32.mxu1 %vm681_vm2, %v671_v45  ;;  %v630_v59 = vpop.permute.xlu0 %629 }
 0x1a2   :  { %v659_v5 = vadd.f32 %v630_v59, %v589_v46  ;;  %9372 = vmatmul.mubr.msk.f32.gmra.mrb[10].mxu1 %vm681_vm2, %v672_v3  ;;  %v632_v40 = vpop.permute.xlu1 %631  ;;  %v1208_v9 = vrot.slane %v1194_v52, %v10502_v53  ;;  %v1226_v7 = vcombine.high %v1169_v49, %v1185_v51  ;;  %v1225_v6 = vcombine.low %v1169_v49, %v1185_v51 }
 0x1a3   :  { %v1003_v8 = vrot.slane %v995_v54, %v10491_v22  ;;  %v1010_v11 = vrot.slane %v996_v55, %v10491_v22  ;;  %v1019_v12 = vrot.slane %v1011_v56, %v10491_v22  ;;  %v1026_v13 = vrot.slane %v1012_v58, %v10491_v22 }
 0x1a4   :  { %v673_v14 = vmax.f32 %v659_v5, 0.0  ;;  %v660_v38 = vadd.f32 %v632_v40, %v590_v4  ;;  %v1240_v15 = vrot.slane %v1226_v7, %v10502_v53  ;;  %v10557_v19 = vrot.slane %v1193_v32, %v10502_v53 }
 0x1a5   :  { %v1057_v61 = vcombine.low %v1003_v8, %v1019_v12  ;;  %v1058_v16 = vcombine.high %v1003_v8, %v1019_v12  ;;  %v1073_v18 = vcombine.low %v1010_v11, %v1026_v13  ;;  %v1074_v21 = vcombine.high %v1010_v11, %v1026_v13 }
 0x1a6   :  { %v1027_v50 = vcombine.high %v673_v14, %v10195_v47  ;;  %v674_v62 = vmax.f32 %v660_v38, 0.0  ;;  %v1259_v23 = vcombine.low %v1208_v9, %v1240_v15  ;;  %9374 = vmatprep.mubr.msk.f32.mxu1 %vm681_vm2, %v673_v14  ;;  %v1034_v20 = vrot.slane %v673_v14, %v10491_v22 }
 0x1a7   :  { %v10563_v48 = vrot.slane %v1225_v6, %v10502_v53  ;;  %v963_v24 = vrot.slane %v955_v57, %v10502_v53  ;;  %v970_v25 = vrot.slane %v956_v43, %v10502_v53  ;;  %v1260_v30 = vcombine.high %v1208_v9, %v1240_v15 }
 0x1a8   :  { %v1042_v27 = vcombine.high %v674_v62, %v10195_v47  ;;  %v1049_v29 = vrot.slane %v674_v62, %v10491_v22  ;;  %1388 = vrot.lane.b32.xlu1 %v1259_v23, %s10198_s28  ;;  %9375 = vmatmul.mubr.msk.f32.gmra.mrb[12].mxu1 %vm681_vm2, %v674_v62  ;;  %v979_v26 = vrot.slane %v971_v44, %v10502_v53 }
 0x1a9   :  { %v1258_v63 = vcombine.high %v10557_v19, %v10563_v48  ;;  %v986_v0 = vrot.slane %v972_v2, %v10502_v53  ;;  %v8758_v31 = vcombine.low %v963_v24, %v970_v25  ;;  %1517 = vmatprep.mubr.f32.mxu1 %v10195_v47  ;;  %v1041_v33 = vrot.slane %v1027_v50, %v10491_v22 }
 0x1aa   :  { %v1056_v35 = vrot.slane %v1042_v27, %v10491_v22  ;;  %v1089_v36 = vcombine.low %v1034_v20, %v1049_v29  ;;  %v8760_v37 = vcombine.high %v963_v24, %v970_v25  ;;  %v1090_v39 = vcombine.high %v1034_v20, %v1049_v29 }
 0x1ab   :  { %1384 = vrot.lane.b32.xlu0 %v1258_v63, %s10199_s29  ;;  %v1144_v41 = vrot.slane %v8758_v31, %v10491_v22  ;;  %v8762_v28 = vcombine.low %v979_v26, %v986_v0  ;;  %v8764_v42 = vcombine.high %v979_v26, %v986_v0  ;;  %v1065_v43 = vrot.slane %v1057_v61, %v10502_v53 }
 0x1ac   :  { %v1105_v60 = vcombine.low %v1041_v33, %v1056_v35  ;;  %v1106_v57 = vcombine.high %v1041_v33, %v1056_v35  ;;  %1392 = vrot.lane.b32.xlu1 %v1260_v30, %s10200_s30  ;;  %v1160_v44 = vrot.slane %v8760_v37, %v10491_v22  ;;  %v1072_v45 = vrot.slane %v1058_v16, %v10502_v53 }
 0x1ad   :  { %v1176_v34 = vrot.slane %v8762_v28, %v10491_v22  ;;  %v1192_v2 = vrot.slane %v8764_v42, %v10491_v22  ;;  %v1097_v3 = vrot.slane %v1089_v36, %v10502_v53  ;;  %v1081_v46 = vrot.slane %v1073_v18, %v10502_v53 }
 0x1ae   :  { %v1088_v49 = vrot.slane %v1074_v21, %v10502_v53  ;;  %v1104_v51 = vrot.slane %v1090_v39, %v10502_v53  ;;  %v1113_v52 = vrot.slane %v1105_v60, %v10502_v53  ;;  %v1209_v32 = vcombine.low %v1144_v41, %v1160_v44 }
 0x1af   :  { %v1241_v54 = vcombine.low %v1176_v34, %v1192_v2  ;;  %v8765_v55 = vcombine.low %v1065_v43, %v1072_v45  ;;  %v8767_v56 = vcombine.high %v1065_v43, %v1072_v45  ;;  %v1120_v4 = vrot.slane %v1106_v57, %v10502_v53 }
 0x1b0   :  { %v8769_v58 = vcombine.low %v1081_v46, %v1088_v49  ;;  %v8771_v59 = vcombine.high %v1081_v46, %v1088_v49  ;;  %v1217_v5 = vrot.slane %v1209_v32, %v10502_v53  ;;  %v1210_v9 = vcombine.high %v1144_v41, %v1160_v44 }
 0x1b1   :  { %v1249_v40 = vrot.slane %v1241_v54, %v10502_v53  ;;  %v1273_v7 = vrot.slane %v8765_v55, %v10491_v22  ;;  %v1289_v8 = vrot.slane %v8767_v56, %v10491_v22  ;;  %v1242_v14 = vcombine.high %v1176_v34, %v1192_v2 }
 0x1b2   :  { %v1305_v11 = vrot.slane %v8769_v58, %v10491_v22  ;;  %v1321_v12 = vrot.slane %v8771_v59, %v10491_v22  ;;  %v1224_v16 = vrot.slane %v1210_v9, %v10502_v53  ;;  %v8770_v18 = vcombine.low %v1113_v52, %v1120_v4 }
 0x1b3   :  { %v1261_v13 = vcombine.low %v1217_v5, %v1249_v40  ;;  %v1329_v38 = vcombine.low %v1273_v7, %v1289_v8  ;;  %v1330_v6 = vcombine.high %v1273_v7, %v1289_v8  ;;  %v8772_v21 = vcombine.high %v1113_v52, %v1120_v4 }
 0x1b4   :  { %v1353_v15 = vcombine.low %v1305_v11, %v1321_v12  ;;  %v1354_v61 = vcombine.high %v1305_v11, %v1321_v12  ;;  %v8766_v23 = vcombine.low %v1097_v3, %v1104_v51  ;;  %v8768_v20 = vcombine.high %v1097_v3, %v1104_v51  ;;  %v43_v12 = vld [vmem:[%s11955_s3] sm:$0xff] }
 0x1b5   :  { %1396 = vrot.lane.b32.xlu1 %v1261_v13, %s10201_s13  ;;  %v1337_v50 = vrot.slane %v1329_v38, %v10502_v53  ;;  %v1262_v24 = vcombine.high %v1217_v5, %v1249_v40  ;;  %v1256_v25 = vrot.slane %v1242_v14, %v10502_v53  ;;  %v1344_v27 = vrot.slane %v1330_v6, %v10502_v53  ;;  %v50_v6 = vld [vmem:[%s11954_s4 + $0x18] sm:$0xff] }
 0x1b6   :  { %v1361_v62 = vrot.slane %v1353_v15, %v10502_v53  ;;  %v1368_v29 = vrot.slane %v1354_v61, %v10502_v53  ;;  %v1312_v63 = vrot.slane %v8770_v18, %v10491_v22  ;;  %v1328_v26 = vrot.slane %v8772_v21, %v10491_v22  ;;  %v49_v15 = vld [vmem:[%s11954_s4 + $0x10] sm:$0xff] }
 0x1b7   :  { %v1257_v0 = vcombine.low %v10557_v19, %v10563_v48  ;;  %v1280_v31 = vrot.slane %v8766_v23, %v10491_v22  ;;  %v1296_v33 = vrot.slane %v8768_v20, %v10491_v22  ;;  %v1263_v36 = vcombine.low %v1224_v16, %v1256_v25 }
 0x1b8   :  { %v1378_v30 = vcombine.high %v1337_v50, %v1361_v62  ;;  %v1377_v35 = vcombine.low %v1337_v50, %v1361_v62  ;;  %v1379_v37 = vcombine.low %v1344_v27, %v1368_v29  ;;  %v1369_v39 = vcombine.low %v1312_v63, %v1328_v26 }
 0x1b9   :  { %1400 = vrot.lane.b32.xlu1 %v1262_v24, %s10202_s14  ;;  %v1345_v41 = vcombine.low %v1280_v31, %v1296_v33  ;;  %v1264_v28 = vcombine.high %v1224_v16, %v1256_v25  ;;  %v1380_v19 = vcombine.high %v1344_v27, %v1368_v29  ;;  %v10662_v61 = vpack.c.bf16 %v50_v6, %v49_v15 }
 0x1ba   :  { %1412 = vrot.lane.b32.xlu0 %v1378_v30, %s10199_s29  ;;  %v1376_v48 = vrot.slane %v1369_v39, %v10502_v53 }
 0x1bb   :  { %v1352_v42 = vrot.slane %v1345_v41, %v10502_v53 }
 0x1bd   :  { %1404 = vrot.lane.b32.xlu1 %v1263_v36, %s10193_s23  ;;  %v1381_v60 = vcombine.low %v1352_v42, %v1376_v48  ;;  %v1382_v57 = vcombine.high %v1352_v42, %v1376_v48 }
 0x1be   :  { %1416 = vrot.lane.b32.xlu0 %v1379_v37, %s10198_s28 }
 0x1c1   :  { %1408 = vrot.lane.b32.xlu1 %v1264_v28, %s10194_s27 }
 0x1c2   :  { %1420 = vrot.lane.b32.xlu0 %v1380_v19, %s10200_s30 }
 0x1c6   :  { %1424 = vrot.lane.b32.xlu0 %v1381_v60, %s10201_s13 }
 0x1ca   :  { %1428 = vrot.lane.b32.xlu0 %v1382_v57, %s10202_s14 }
 0x21a   :  { %v1389_v43 = vpop.permute.xlu1 %1388 }
 0x21d   :  { %v1385_v34 = vpop.permute.xlu0 %1384 }
 0x21e   :  { %v1393_v44 = vpop.permute.xlu1 %1392  ;;  %v1431_v52 = vsel %vm681_vm2, %v1257_v0, %v1385_v34 }
 0x21f   :  { %v1433_v54 = vsel %vm1432_vm3, %v1431_v52, %v1389_v43 }
 0x220   :  { %v1435_v56 = vsel %vm1434_vm4, %v1433_v54, %v1393_v44 }
 0x227   :  { %v1397_v2 = vpop.permute.xlu1 %1396 }
 0x228   :  { %v1437_v59 = vsel %vm1436_vm5, %v1435_v56, %v1397_v2 }
 0x22b   :  { %v1401_v3 = vpop.permute.xlu1 %1400 }
 0x22c   :  { %v1413_v45 = vpop.permute.xlu0 %1412  ;;  %v1439_v40 = vsel %vm1438_vm6, %v1437_v59, %v1401_v3 }
 0x22d   :  { %v1444_v55 = vsel %vm681_vm2, %v1377_v35, %v1413_v45 }
 0x22f   :  { %v1405_v51 = vpop.permute.xlu1 %1404 }
 0x230   :  { %v1417_v46 = vpop.permute.xlu0 %1416  ;;  %v1441_v8 = vsel %vm1440_vm7, %v1439_v40, %v1405_v51 }
 0x231   :  { %v1445_v58 = vsel %vm1432_vm3, %v1444_v55, %v1417_v46 }
 0x233   :  { %v1409_v4 = vpop.permute.xlu1 %1408 }
 0x234   :  { %v1421_v49 = vpop.permute.xlu0 %1420  ;;  %v10638_v13 = vsel %vm1442_vm8, %v1441_v8, %v1409_v4 }
 0x235   :  { %v1446_v5 = vsel %vm1434_vm4, %v1445_v58, %v1421_v49 }
 0x238   :  { %v1425_v32 = vpop.permute.xlu0 %1424 }
 0x239   :  { %v1447_v9 = vsel %vm1436_vm5, %v1446_v5, %v1425_v32 }
 0x23c   :  { %v1429_v7 = vpop.permute.xlu0 %1428 }
 0x23d   :  { %v10632_v11 = vsel %vm1438_vm6, %v1447_v9, %v1429_v7 }
 0x23e   :  { %1453 = vmatprep.subr.mxu1 %v10632_v11 }
 0x23f   :  { %1454 = vmatpush1.msra.mxu1 %v10638_v13 }
 0x240   :  { %8773 = vmatmul.mubr.msk.f32.vlgmr.msra.gmra.mrb[14].mxu1 %vm1449_vm9, %v43_v12  ;;  %9690 = vmatprep.subr.bf16.mxu1 %v10662_v61 }
 0x241   :  { %9692 = vmatpush3.bf16.msra.mxu1 %v10662_v61 }
 0x313   :  { %v1519_v14 = vpop.f32.mrb[14].mxu1 }
 0x314   :  { %1528 = vrot.lane.b32.xlu1 %v1519_v14, %s10193_s23  ;;  %1525 = vrot.lane.b32.xlu0 %v1519_v14, %s10194_s27  ;;  %v10645_v38 = vpop.f32.mrb[15].mxu1 }
 0x315   :  { %2277 = vmatprep.subr.mxu0 %v10645_v38 }
 0x316   :  { %2278 = vmatpush1.msra.mxu0 %v1519_v14 }
 0x317   :  { %8804 = vmatmul.mubr.msk.f32.vlgmr.msra.gmra.mrb[14].mxu0 %vm1449_vm9, %v43_v12 }
 0x318   :  { %1534 = vrot.lane.b32.xlu1 %v1519_v14, %s10201_s13  ;;  %1531 = vrot.lane.b32.xlu0 %v1519_v14, %s10202_s14 }
 0x31c   :  { %1540 = vrot.lane.b32.xlu1 %v1519_v14, %s10198_s28  ;;  %1537 = vrot.lane.b32.xlu0 %v1519_v14, %s10200_s30 }
 0x320   :  { %1543 = vrot.lane.b32.xlu0 %v1519_v14, %s10199_s29  ;;  %1547 = vrot.lane.b32.xlu1 %v10645_v38, %s10194_s27 }
 0x324   :  { %1550 = vrot.lane.b32.xlu0 %v10645_v38, %s10193_s23  ;;  %1553 = vrot.lane.b32.xlu1 %v10645_v38, %s10202_s14 }
 0x328   :  { %1556 = vrot.lane.b32.xlu0 %v10645_v38, %s10201_s13  ;;  %1559 = vrot.lane.b32.xlu1 %v10645_v38, %s10200_s30 }
 0x386   :  { %v1529_v16 = vpop.permute.xlu1 %1528  ;;  %v1526_v18 = vpop.permute.xlu0 %1525 }
 0x387   :  { %v1562_v21 = vcombine.low %v1519_v14, %v1529_v16  ;;  %v1563_v50 = vcombine.high %v1519_v14, %v1529_v16 }
 0x389   :  { %v1570_v25 = vrot.slane %v1562_v21, %v10491_v22  ;;  %v1577_v27 = vrot.slane %v1563_v50, %v10491_v22 }
 0x38a   :  { %v1535_v62 = vpop.permute.xlu1 %1534  ;;  %v1532_v23 = vpop.permute.xlu0 %1531 }
 0x38b   :  { %v1578_v20 = vcombine.low %v1526_v18, %v1532_v23  ;;  %v1579_v24 = vcombine.high %v1526_v18, %v1532_v23 }
 0x38d   :  { %v1586_v29 = vrot.slane %v1578_v20, %v10491_v22  ;;  %v1593_v30 = vrot.slane %v1579_v24, %v10491_v22 }
 0x38e   :  { %v1541_v63 = vpop.permute.xlu1 %1540  ;;  %v1538_v26 = vpop.permute.xlu0 %1537 }
 0x38f   :  { %v1626_v0 = vcombine.low %v1570_v25, %v1586_v29  ;;  %v1627_v31 = vcombine.high %v1570_v25, %v1586_v29  ;;  %v1642_v33 = vcombine.low %v1577_v27, %v1593_v30  ;;  %v1643_v35 = vcombine.high %v1577_v27, %v1593_v30 }
 0x390   :  { %v1594_v39 = vcombine.low %v1535_v62, %v1541_v63  ;;  %v1595_v41 = vcombine.high %v1535_v62, %v1541_v63 }
 0x391   :  { %v1634_v36 = vrot.slane %v1626_v0, %v10502_v53  ;;  %v1641_v37 = vrot.slane %v1627_v31, %v10502_v53  ;;  %v1650_v28 = vrot.slane %v1642_v33, %v10502_v53  ;;  %v1657_v19 = vrot.slane %v1643_v35, %v10502_v53 }
 0x392   :  { %v1544_v48 = vpop.permute.xlu0 %1543  ;;  %v1548_v42 = vpop.permute.xlu1 %1547  ;;  %v1602_v34 = vrot.slane %v1594_v39, %v10491_v22  ;;  %v1609_v2 = vrot.slane %v1595_v41, %v10491_v22 }
 0x393   :  { %v1610_v60 = vcombine.low %v1538_v26, %v1544_v48  ;;  %v1611_v57 = vcombine.high %v1538_v26, %v1544_v48  ;;  %v8774_v43 = vcombine.low %v1634_v36, %v1641_v37  ;;  %v8776_v44 = vcombine.high %v1634_v36, %v1641_v37 }
 0x394   :  { %v8778_v45 = vcombine.low %v1650_v28, %v1657_v19  ;;  %v8780_v3 = vcombine.high %v1650_v28, %v1657_v19 }
 0x395   :  { %v1618_v46 = vrot.slane %v1610_v60, %v10491_v22  ;;  %v1625_v49 = vrot.slane %v1611_v57, %v10491_v22  ;;  %v1840_v50 = vrot.slane %v8774_v43, %v10491_v22  ;;  %v1856_v62 = vrot.slane %v8776_v44, %v10491_v22 }
 0x396   :  { %v1551_v51 = vpop.permute.xlu0 %1550  ;;  %v1554_v52 = vpop.permute.xlu1 %1553  ;;  %v1872_v23 = vrot.slane %v8778_v45, %v10491_v22  ;;  %v1888_v20 = vrot.slane %v8780_v3, %v10491_v22 }
 0x397   :  { %v1698_v32 = vcombine.low %v10645_v38, %v1551_v51  ;;  %v1699_v54 = vcombine.high %v10645_v38, %v1551_v51  ;;  %v1714_v55 = vcombine.low %v1548_v42, %v1554_v52  ;;  %v1715_v56 = vcombine.high %v1548_v42, %v1554_v52 }
 0x398   :  { %v1658_v58 = vcombine.low %v1602_v34, %v1618_v46  ;;  %v1659_v59 = vcombine.high %v1602_v34, %v1618_v46  ;;  %v1674_v4 = vcombine.low %v1609_v2, %v1625_v49  ;;  %v1675_v5 = vcombine.high %v1609_v2, %v1625_v49 }
 0x399   :  { %v1706_v40 = vrot.slane %v1698_v32, %v10491_v22  ;;  %v1713_v9 = vrot.slane %v1699_v54, %v10491_v22  ;;  %v1722_v7 = vrot.slane %v1714_v55, %v10491_v22  ;;  %v1729_v8 = vrot.slane %v1715_v56, %v10491_v22 }
 0x39a   :  { %v1666_v12 = vrot.slane %v1658_v58, %v10502_v53  ;;  %v1673_v14 = vrot.slane %v1659_v59, %v10502_v53  ;;  %v1557_v18 = vpop.permute.xlu0 %1556  ;;  %v1560_v21 = vpop.permute.xlu1 %1559  ;;  %v1682_v24 = vrot.slane %v1674_v4, %v10502_v53  ;;  %v1689_v25 = vrot.slane %v1675_v5, %v10502_v53 }
 0x39b   :  { %v1760_v15 = vcombine.low %v1706_v40, %v1722_v7  ;;  %v1761_v38 = vcombine.high %v1706_v40, %v1722_v7  ;;  %v1776_v6 = vcombine.low %v1713_v9, %v1729_v8  ;;  %v1777_v16 = vcombine.high %v1713_v9, %v1729_v8 }
 0x39c   :  { %v8775_v27 = vcombine.low %v1666_v12, %v1673_v14  ;;  %v8777_v29 = vcombine.high %v1666_v12, %v1673_v14  ;;  %v1730_v30 = vcombine.high %v1557_v18, %v10195_v47  ;;  %v1737_v63 = vrot.slane %v1557_v18, %v10491_v22 }
 0x39d   :  { %v1745_v26 = vcombine.high %v1560_v21, %v10195_v47  ;;  %v1752_v0 = vrot.slane %v1560_v21, %v10491_v22  ;;  %v1768_v31 = vrot.slane %v1760_v15, %v10502_v53  ;;  %v1775_v33 = vrot.slane %v1761_v38, %v10502_v53 }
 0x39e   :  { %v1784_v35 = vrot.slane %v1776_v6, %v10502_v53  ;;  %v1791_v36 = vrot.slane %v1777_v16, %v10502_v53  ;;  %v1744_v37 = vrot.slane %v1730_v30, %v10491_v22  ;;  %v1896_v19 = vcombine.low %v1840_v50, %v1856_v62 }
 0x39f   :  { %v1759_v39 = vrot.slane %v1745_v26, %v10491_v22  ;;  %v1792_v41 = vcombine.low %v1737_v63, %v1752_v0  ;;  %v1793_v28 = vcombine.high %v1737_v63, %v1752_v0  ;;  %v1928_v48 = vcombine.low %v1872_v23, %v1888_v20 }
 0x3a0   :  { %v1897_v42 = vcombine.high %v1840_v50, %v1856_v62  ;;  %v1929_v60 = vcombine.high %v1872_v23, %v1888_v20  ;;  %v8779_v57 = vcombine.low %v1682_v24, %v1689_v25  ;;  %v8781_v43 = vcombine.high %v1682_v24, %v1689_v25 }
 0x3a1   :  { %v1808_v44 = vcombine.low %v1744_v37, %v1759_v39  ;;  %v1809_v34 = vcombine.high %v1744_v37, %v1759_v39  ;;  %v1904_v2 = vrot.slane %v1896_v19, %v10502_v53  ;;  %v1936_v45 = vrot.slane %v1928_v48, %v10502_v53 }
 0x3a2   :  { %v1911_v3 = vrot.slane %v1897_v42, %v10502_v53  ;;  %v1943_v46 = vrot.slane %v1929_v60, %v10502_v53  ;;  %v8782_v49 = vcombine.low %v1768_v31, %v1775_v33  ;;  %v8784_v51 = vcombine.high %v1768_v31, %v1775_v33 }
 0x3a3   :  { %v8786_v52 = vcombine.low %v1784_v35, %v1791_v36  ;;  %v8788_v32 = vcombine.high %v1784_v35, %v1791_v36  ;;  %v1800_v54 = vrot.slane %v1792_v41, %v10502_v53  ;;  %v1807_v55 = vrot.slane %v1793_v28, %v10502_v53 }
 0x3a4   :  { %v1960_v56 = vcombine.low %v1904_v2, %v1936_v45  ;;  %v1961_v58 = vcombine.high %v1904_v2, %v1936_v45  ;;  %v1816_v59 = vrot.slane %v1808_v44, %v10502_v53  ;;  %v1823_v4 = vrot.slane %v1809_v34, %v10502_v53 }
 0x3a5   :  { %v1962_v5 = vcombine.low %v1911_v3, %v1943_v46  ;;  %v1963_v40 = vcombine.high %v1911_v3, %v1943_v46  ;;  %v1847_v9 = vrot.slane %v8775_v27, %v10491_v22  ;;  %v1863_v7 = vrot.slane %v8777_v29, %v10491_v22 }
 0x3a6   :  { %9381 = vmatprep.mubr.msk.f32.mxu1 %vm681_vm2, %v1960_v56  ;;  %v1879_v8 = vrot.slane %v8779_v57, %v10491_v22  ;;  %v1895_v12 = vrot.slane %v8781_v43, %v10491_v22  ;;  %v1976_v14 = vrot.slane %v8782_v49, %v10491_v22  ;;  %v1992_v15 = vrot.slane %v8784_v51, %v10491_v22 }
 0x3a7   :  { %9382 = vmatmul.mubr.msk.f32.vlgmr.msra.gmra.mrb[0].mxu1 %vm681_vm2, %v1961_v58  ;;  %v2008_v38 = vrot.slane %v8786_v52, %v10491_v22  ;;  %v2024_v6 = vrot.slane %v8788_v32, %v10491_v22  ;;  %v1912_v16 = vcombine.low %v1847_v9, %v1863_v7  ;;  %v1913_v21 = vcombine.high %v1847_v9, %v1863_v7 }
 0x3a8   :  { %9384 = vmatprep.mubr.msk.f32.mxu1 %vm681_vm2, %v1962_v5  ;;  %v1944_v18 = vcombine.low %v1879_v8, %v1895_v12  ;;  %v1945_v50 = vcombine.high %v1879_v8, %v1895_v12  ;;  %v8787_v62 = vcombine.low %v1816_v59, %v1823_v4  ;;  %v8789_v23 = vcombine.high %v1816_v59, %v1823_v4  ;;  %v51_v4 = vld [vmem:[%s11954_s4 + $0x20] sm:$0xff] }
 0x3a9   :  { %v2032_v20 = vcombine.low %v1976_v14, %v1992_v15  ;;  %v2056_v24 = vcombine.low %v2008_v38, %v2024_v6  ;;  %v1920_v25 = vrot.slane %v1912_v16, %v10502_v53  ;;  %v1927_v29 = vrot.slane %v1913_v21, %v10502_v53 }
 0x3aa   :  { %v1952_v27 = vrot.slane %v1944_v18, %v10502_v53  ;;  %v1959_v30 = vrot.slane %v1945_v50, %v10502_v53  ;;  %v8783_v63 = vcombine.low %v1800_v54, %v1807_v55  ;;  %v8785_v26 = vcombine.high %v1800_v54, %v1807_v55 }
 0x3ab   :  { %9385 = vmatmul.mubr.msk.f32.gmra.mrb[2].mxu1 %vm681_vm2, %v1963_v40  ;;  %v2040_v33 = vrot.slane %v2032_v20, %v10502_v53  ;;  %v2033_v35 = vcombine.high %v1976_v14, %v1992_v15  ;;  %v2057_v36 = vcombine.high %v2008_v38, %v2024_v6  ;;  %v2064_v39 = vrot.slane %v2056_v24, %v10502_v53 }
 0x3ac   :  { %v1964_v0 = vcombine.low %v1920_v25, %v1952_v27  ;;  %v1965_v31 = vcombine.high %v1920_v25, %v1952_v27  ;;  %v1966_v37 = vcombine.low %v1927_v29, %v1959_v30  ;;  %v2015_v41 = vrot.slane %v8787_v62, %v10491_v22 }
 0x3ad   :  { %v2031_v28 = vrot.slane %v8789_v23, %v10491_v22  ;;  %v1983_v19 = vrot.slane %v8783_v63, %v10491_v22  ;;  %v1999_v48 = vrot.slane %v8785_v26, %v10491_v22  ;;  %v1967_v42 = vcombine.high %v1927_v29, %v1959_v30 }
 0x3ae   :  { %9387 = vmatprep.mubr.msk.f32.mxu1 %vm681_vm2, %v1964_v0  ;;  %v2080_v60 = vcombine.low %v2040_v33, %v2064_v39  ;;  %v2047_v57 = vrot.slane %v2033_v35, %v10502_v53  ;;  %v2071_v43 = vrot.slane %v2057_v36, %v10502_v53  ;;  %v2081_v2 = vcombine.high %v2040_v33, %v2064_v39 }
 0x3af   :  { %9388 = vmatmul.mubr.msk.f32.gmra.mrb[4].mxu1 %vm681_vm2, %v1965_v31  ;;  %v2072_v44 = vcombine.low %v2015_v41, %v2031_v28  ;;  %v2048_v34 = vcombine.low %v1983_v19, %v1999_v48 }
 0x3b0   :  { %9390 = vmatprep.mubr.msk.f32.mxu1 %vm681_vm2, %v1966_v37  ;;  %v2082_v45 = vcombine.low %v2047_v57, %v2071_v43  ;;  %v2083_v49 = vcombine.high %v2047_v57, %v2071_v43 }
 0x3b1   :  { %v2079_v3 = vrot.slane %v2072_v44, %v10502_v53  ;;  %v2055_v46 = vrot.slane %v2048_v34, %v10502_v53 }
 0x3b3   :  { %9391 = vmatmul.mubr.msk.f32.gmra.mrb[6].mxu1 %vm681_vm2, %v1967_v42  ;;  %v2084_v51 = vcombine.low %v2055_v46, %v2079_v3  ;;  %v2085_v52 = vcombine.high %v2055_v46, %v2079_v3 }
 0x3b4   :  { %9393 = vmatprep.mubr.msk.f32.mxu1 %vm681_vm2, %v2080_v60 }
 0x3b7   :  { %9394 = vmatmul.mubr.msk.f32.gmra.mrb[8].mxu1 %vm681_vm2, %v2081_v2 }
 0x3b8   :  { %9396 = vmatprep.mubr.msk.f32.mxu1 %vm681_vm2, %v2082_v45 }
 0x3bb   :  { %9397 = vmatmul.mubr.msk.f32.gmra.mrb[10].mxu1 %vm681_vm2, %v2083_v49 }
 0x3bc   :  { %9399 = vmatprep.mubr.msk.f32.mxu1 %vm681_vm2, %v2084_v51 }
 0x3bf   :  { %9400 = vmatmul.mubr.msk.f32.gmra.mrb[12].mxu1 %vm681_vm2, %v2085_v52 }
 0x3ea   :  { %v2343_v32 = vpop.f32.mrb[14].mxu0 }
 0x3eb   :  { %v2348_v54 = vmul.f32 2.0, %v2343_v32  ;;  %v2345_v55 = vpop.f32.mrb[15].mxu0 }
 0x3ec   :  { %v2349_v58 = vmul.f32 2.0, %v2345_v55 }
 0x3ed   :  { %v2350_v56 = vsub.f32 %v2348_v54, %v10638_v13  ;;  %v52_v13 = vld [vmem:[%s11954_s4 + $0x28] sm:$0xff]  ;;  %s10203_s4 = smov 120  }
 0x3ee   :  { %v2351_v59 = vsub.f32 %v2349_v58, %v10632_v11  ;;  %v10770_v5 = vpack.c.bf16 %v52_v13, %v51_v4  ;;  %v10779_v11 = vld [vmem:[%s11951_s1] sm:$0xf] }
 0x3ef   :  { %2356 = vrot.lane.b32.xlu1 %v2350_v56, %s10193_s23  ;;  %2353 = vrot.lane.b32.xlu0 %v2350_v56, %s10194_s27 }
 0x3f0   :  { %9694 = vmatprep.subr.bf16.mxu1 %v10770_v5 }
 0x3f1   :  { %9696 = vmatpush3.bf16.msra.mxu1 %v10770_v5 }
 0x3f2   :  { %9471 = vmatprep.subr.msk.mxu1 %vm120_vm0, %v10779_v11 }
 0x3f3   :  { %2362 = vrot.lane.b32.xlu1 %v2350_v56, %s10201_s13  ;;  %2359 = vrot.lane.b32.xlu0 %v2350_v56, %s10202_s14 }
 0x3f7   :  { %2368 = vrot.lane.b32.xlu1 %v2350_v56, %s10198_s28  ;;  %2365 = vrot.lane.b32.xlu0 %v2350_v56, %s10200_s30 }
 0x3fb   :  { %2371 = vrot.lane.b32.xlu0 %v2350_v56, %s10199_s29  ;;  %2375 = vrot.lane.b32.xlu1 %v2351_v59, %s10194_s27 }
 0x3ff   :  { %2378 = vrot.lane.b32.xlu0 %v2351_v59, %s10193_s23  ;;  %2381 = vrot.lane.b32.xlu1 %v2351_v59, %s10202_s14 }
 0x403   :  { %2384 = vrot.lane.b32.xlu0 %v2351_v59, %s10201_s13  ;;  %2387 = vrot.lane.b32.xlu1 %v2351_v59, %s10200_s30 }
 0x461   :  { %v2357_v40 = vpop.permute.xlu1 %2356  ;;  %v2354_v9 = vpop.permute.xlu0 %2353 }
 0x462   :  { %v2390_v7 = vcombine.low %v2350_v56, %v2357_v40  ;;  %v2391_v8 = vcombine.high %v2350_v56, %v2357_v40 }
 0x464   :  { %v2398_v6 = vrot.slane %v2390_v7, %v10491_v22  ;;  %v2405_v16 = vrot.slane %v2391_v8, %v10491_v22 }
 0x465   :  { %v2363_v12 = vpop.permute.xlu1 %2362  ;;  %v2360_v14 = vpop.permute.xlu0 %2359 }
 0x466   :  { %v2406_v15 = vcombine.low %v2354_v9, %v2360_v14  ;;  %v2407_v38 = vcombine.high %v2354_v9, %v2360_v14 }
 0x468   :  { %v2414_v18 = vrot.slane %v2406_v15, %v10491_v22  ;;  %v2421_v21 = vrot.slane %v2407_v38, %v10491_v22 }
 0x469   :  { %v2369_v50 = vpop.permute.xlu1 %2368  ;;  %v2366_v62 = vpop.permute.xlu0 %2365 }
 0x46a   :  { %v2454_v23 = vcombine.low %v2398_v6, %v2414_v18  ;;  %v2455_v20 = vcombine.high %v2398_v6, %v2414_v18  ;;  %v2470_v24 = vcombine.low %v2405_v16, %v2421_v21  ;;  %v2471_v25 = vcombine.high %v2405_v16, %v2421_v21 }
 0x46b   :  { %v2422_v30 = vcombine.low %v2363_v12, %v2369_v50  ;;  %v2423_v63 = vcombine.high %v2363_v12, %v2369_v50 }
 0x46c   :  { %v2462_v27 = vrot.slane %v2454_v23, %v10502_v53  ;;  %v2469_v29 = vrot.slane %v2455_v20, %v10502_v53  ;;  %v2478_v26 = vrot.slane %v2470_v24, %v10502_v53  ;;  %v2485_v0 = vrot.slane %v2471_v25, %v10502_v53 }
 0x46d   :  { %v2372_v31 = vpop.permute.xlu0 %2371  ;;  %v2376_v33 = vpop.permute.xlu1 %2375  ;;  %v2430_v41 = vrot.slane %v2422_v30, %v10491_v22  ;;  %v2437_v28 = vrot.slane %v2423_v63, %v10491_v22 }
 0x46e   :  { %v2438_v35 = vcombine.low %v2366_v62, %v2372_v31  ;;  %v2439_v36 = vcombine.high %v2366_v62, %v2372_v31  ;;  %v8805_v37 = vcombine.low %v2462_v27, %v2469_v29  ;;  %v8807_v39 = vcombine.high %v2462_v27, %v2469_v29 }
 0x46f   :  { %v8809_v19 = vcombine.low %v2478_v26, %v2485_v0  ;;  %v8811_v48 = vcombine.high %v2478_v26, %v2485_v0 }
 0x470   :  { %v2446_v42 = vrot.slane %v2438_v35, %v10491_v22  ;;  %v2453_v60 = vrot.slane %v2439_v36, %v10491_v22  ;;  %v2668_v8 = vrot.slane %v8805_v37, %v10491_v22  ;;  %v2684_v12 = vrot.slane %v8807_v39, %v10491_v22 }
 0x471   :  { %v2379_v57 = vpop.permute.xlu0 %2378  ;;  %v2382_v43 = vpop.permute.xlu1 %2381  ;;  %v2700_v14 = vrot.slane %v8809_v19, %v10491_v22  ;;  %v2716_v15 = vrot.slane %v8811_v48, %v10491_v22 }
 0x472   :  { %v2526_v44 = vcombine.low %v2351_v59, %v2379_v57  ;;  %v2527_v34 = vcombine.high %v2351_v59, %v2379_v57  ;;  %v2542_v2 = vcombine.low %v2376_v33, %v2382_v43  ;;  %v2543_v45 = vcombine.high %v2376_v33, %v2382_v43 }
 0x473   :  { %v2486_v3 = vcombine.low %v2430_v41, %v2446_v42  ;;  %v2487_v46 = vcombine.high %v2430_v41, %v2446_v42  ;;  %v2502_v49 = vcombine.low %v2437_v28, %v2453_v60  ;;  %v2503_v51 = vcombine.high %v2437_v28, %v2453_v60 }
 0x474   :  { %v2534_v52 = vrot.slane %v2526_v44, %v10491_v22  ;;  %v2541_v32 = vrot.slane %v2527_v34, %v10491_v22  ;;  %v2550_v54 = vrot.slane %v2542_v2, %v10491_v22  ;;  %v2557_v55 = vrot.slane %v2543_v45, %v10491_v22 }
 0x475   :  { %v2494_v56 = vrot.slane %v2486_v3, %v10502_v53  ;;  %v2501_v58 = vrot.slane %v2487_v46, %v10502_v53  ;;  %v2385_v9 = vpop.permute.xlu0 %2384  ;;  %v2388_v7 = vpop.permute.xlu1 %2387  ;;  %v2510_v38 = vrot.slane %v2502_v49, %v10502_v53  ;;  %v2517_v6 = vrot.slane %v2503_v51, %v10502_v53 }
 0x476   :  { %v2588_v4 = vcombine.low %v2534_v52, %v2550_v54  ;;  %v2589_v59 = vcombine.high %v2534_v52, %v2550_v54  ;;  %v2604_v13 = vcombine.low %v2541_v32, %v2557_v55  ;;  %v2605_v40 = vcombine.high %v2541_v32, %v2557_v55 }
 0x477   :  { %v8806_v16 = vcombine.low %v2494_v56, %v2501_v58  ;;  %v8808_v18 = vcombine.high %v2494_v56, %v2501_v58  ;;  %v2558_v21 = vcombine.high %v2385_v9, %v10195_v47  ;;  %v2565_v50 = vrot.slane %v2385_v9, %v10491_v22 }
 0x478   :  { %v2573_v62 = vcombine.high %v2388_v7, %v10195_v47  ;;  %v2580_v23 = vrot.slane %v2388_v7, %v10491_v22  ;;  %v2596_v20 = vrot.slane %v2588_v4, %v10502_v53  ;;  %v2603_v24 = vrot.slane %v2589_v59, %v10502_v53 }
 0x479   :  { %v2612_v25 = vrot.slane %v2604_v13, %v10502_v53  ;;  %v2619_v27 = vrot.slane %v2605_v40, %v10502_v53  ;;  %v2572_v29 = vrot.slane %v2558_v21, %v10491_v22  ;;  %v2724_v0 = vcombine.low %v2668_v8, %v2684_v12 }
 0x47a   :  { %v2587_v30 = vrot.slane %v2573_v62, %v10491_v22  ;;  %v2620_v63 = vcombine.low %v2565_v50, %v2580_v23  ;;  %v2621_v26 = vcombine.high %v2565_v50, %v2580_v23  ;;  %v2756_v31 = vcombine.low %v2700_v14, %v2716_v15  ;;  %v10847_v50 = vld [vmem:[%s11951_s1 + $0x4] sm:$0xf] }
 0x47b   :  { %v2725_v33 = vcombine.high %v2668_v8, %v2684_v12  ;;  %v2757_v35 = vcombine.high %v2700_v14, %v2716_v15  ;;  %v8810_v36 = vcombine.low %v2510_v38, %v2517_v6  ;;  %v8812_v37 = vcombine.high %v2510_v38, %v2517_v6 }
 0x47c   :  { %v2636_v39 = vcombine.low %v2572_v29, %v2587_v30  ;;  %v2637_v41 = vcombine.high %v2572_v29, %v2587_v30  ;;  %v2732_v28 = vrot.slane %v2724_v0, %v10502_v53  ;;  %v2764_v19 = vrot.slane %v2756_v31, %v10502_v53 }
 0x47d   :  { %v2739_v48 = vrot.slane %v2725_v33, %v10502_v53  ;;  %v2771_v42 = vrot.slane %v2757_v35, %v10502_v53  ;;  %v8813_v60 = vcombine.low %v2596_v20, %v2603_v24  ;;  %v8815_v57 = vcombine.high %v2596_v20, %v2603_v24 }
 0x47e   :  { %v8817_v43 = vcombine.low %v2612_v25, %v2619_v27  ;;  %v8819_v44 = vcombine.high %v2612_v25, %v2619_v27  ;;  %v2628_v34 = vrot.slane %v2620_v63, %v10502_v53  ;;  %v2635_v2 = vrot.slane %v2621_v26, %v10502_v53 }
 0x47f   :  { %v2788_v45 = vcombine.low %v2732_v28, %v2764_v19  ;;  %v2789_v3 = vcombine.high %v2732_v28, %v2764_v19  ;;  %v2644_v46 = vrot.slane %v2636_v39, %v10502_v53  ;;  %v2651_v49 = vrot.slane %v2637_v41, %v10502_v53 }
 0x480   :  { %v2790_v51 = vcombine.low %v2739_v48, %v2771_v42  ;;  %v2791_v52 = vcombine.high %v2739_v48, %v2771_v42  ;;  %v2675_v32 = vrot.slane %v8806_v16, %v10491_v22  ;;  %v2691_v54 = vrot.slane %v8808_v18, %v10491_v22 }
 0x481   :  { %9406 = vmatprep.mubr.msk.f32.mxu1 %vm681_vm2, %v2788_v45  ;;  %v2707_v55 = vrot.slane %v8810_v36, %v10491_v22  ;;  %v2723_v56 = vrot.slane %v8812_v37, %v10491_v22  ;;  %v2804_v58 = vrot.slane %v8813_v60, %v10491_v22  ;;  %v2820_v4 = vrot.slane %v8815_v57, %v10491_v22  ;;  %v56_v45 = vld [vmem:[%s11956_s6 + $0x10] sm:$0xff] }
 0x482   :  { %9407 = vmatmul.mubr.msk.f32.vlgmr.msra.gmra.mrb[0].mxu1 %vm681_vm2, %v2789_v3  ;;  %v2836_v59 = vrot.slane %v8817_v43, %v10491_v22  ;;  %v2852_v13 = vrot.slane %v8819_v44, %v10491_v22  ;;  %v2740_v40 = vcombine.low %v2675_v32, %v2691_v54  ;;  %v2741_v7 = vcombine.high %v2675_v32, %v2691_v54  ;;  %v54_v44 = vld [vmem:[%s11956_s6] sm:$0xff]  ;;  %v57_v3 = vld [vmem:[%s11956_s6 + $0x18] sm:$0xff] }
 0x483   :  { %9409 = vmatprep.mubr.msk.f32.mxu1 %vm681_vm2, %v2790_v51  ;;  %v2772_v9 = vcombine.low %v2707_v55, %v2723_v56  ;;  %v2773_v8 = vcombine.high %v2707_v55, %v2723_v56  ;;  %v8818_v12 = vcombine.low %v2644_v46, %v2651_v49  ;;  %v8820_v14 = vcombine.high %v2644_v46, %v2651_v49  ;;  %v10894_v49 = vld [vmem:[%s11957_s5] ss:$0 sm:$0xff] }
 0x484   :  { %v2860_v15 = vcombine.low %v2804_v58, %v2820_v4  ;;  %v2884_v38 = vcombine.low %v2836_v59, %v2852_v13  ;;  %9472 = vmatpush3.msk.msra.mxu1 %vm120_vm0, %v10779_v11  ;;  %v2748_v6 = vrot.slane %v2740_v40, %v10502_v53  ;;  %v2755_v18 = vrot.slane %v2741_v7, %v10502_v53 }
 0x485   :  { %v2780_v16 = vrot.slane %v2772_v9, %v10502_v53  ;;  %v2787_v21 = vrot.slane %v2773_v8, %v10502_v53  ;;  %9488 = vmatprep.subr.msk.mxu1 %vm120_vm0, %v10847_v50  ;;  %v8814_v62 = vcombine.low %v2628_v34, %v2635_v2  ;;  %v8816_v11 = vcombine.high %v2628_v34, %v2635_v2  ;;  %v55_v34 = vld [vmem:[%s11956_s6 + $0x8] sm:$0xff] }
 0x486   :  { %9410 = vmatmul.mubr.msk.f32.gmra.mrb[2].mxu1 %vm681_vm2, %v2791_v52  ;;  %v2868_v24 = vrot.slane %v2860_v15, %v10502_v53  ;;  %v2861_v25 = vcombine.high %v2804_v58, %v2820_v4  ;;  %v2885_v27 = vcombine.high %v2836_v59, %v2852_v13  ;;  %v2892_v30 = vrot.slane %v2884_v38, %v10502_v53 }
 0x487   :  { %v2792_v23 = vcombine.low %v2748_v6, %v2780_v16  ;;  %v2793_v20 = vcombine.high %v2748_v6, %v2780_v16  ;;  %v2794_v29 = vcombine.low %v2755_v18, %v2787_v21  ;;  %v2843_v63 = vrot.slane %v8818_v12, %v10491_v22 }
 0x488   :  { %v2859_v26 = vrot.slane %v8820_v14, %v10491_v22  ;;  %v2811_v0 = vrot.slane %v8814_v62, %v10491_v22  ;;  %v2827_v31 = vrot.slane %v8816_v11, %v10491_v22  ;;  %v2795_v33 = vcombine.high %v2755_v18, %v2787_v21 }
 0x489   :  { %9412 = vmatprep.mubr.msk.f32.mxu1 %vm681_vm2, %v2792_v23  ;;  %v2908_v35 = vcombine.low %v2868_v24, %v2892_v30  ;;  %v2875_v36 = vrot.slane %v2861_v25, %v10502_v53  ;;  %v2899_v37 = vrot.slane %v2885_v27, %v10502_v53  ;;  %v2909_v28 = vcombine.high %v2868_v24, %v2892_v30 }
 0x48a   :  { %9413 = vmatmul.mubr.msk.f32.gmra.mrb[4].mxu1 %vm681_vm2, %v2793_v20  ;;  %v2900_v39 = vcombine.low %v2843_v63, %v2859_v26  ;;  %v2876_v41 = vcombine.low %v2811_v0, %v2827_v31  ;;  %v10878_v2 = vpack.c.bf16 %v55_v34, %v54_v44  ;;  %v10888_v46 = vpack.c.bf16 %v57_v3, %v56_v45 }
 0x48b   :  { %9415 = vmatprep.mubr.msk.f32.mxu1 %vm681_vm2, %v2794_v29  ;;  %v2910_v19 = vcombine.low %v2875_v36, %v2899_v37  ;;  %v2911_v60 = vcombine.high %v2875_v36, %v2899_v37 }
 0x48c   :  { %v2907_v48 = vrot.slane %v2900_v39, %v10502_v53  ;;  %v2883_v42 = vrot.slane %v2876_v41, %v10502_v53  ;;  %9698 = vmatprep.subr.bf16.mxu0 %v10878_v2 }
 0x48d   :  { %9700 = vmatpush3.bf16.msra.mxu0 %v10878_v2 }
 0x48e   :  { %9416 = vmatmul.mubr.msk.f32.gmra.mrb[6].mxu1 %vm681_vm2, %v2795_v33  ;;  %v2912_v57 = vcombine.low %v2883_v42, %v2907_v48  ;;  %v2913_v43 = vcombine.high %v2883_v42, %v2907_v48  ;;  %9702 = vmatprep.subr.bf16.mxu0 %v10888_v46 }
 0x48f   :  { %9418 = vmatprep.mubr.msk.f32.mxu1 %vm681_vm2, %v2908_v35 }
 0x492   :  { %9419 = vmatmul.mubr.msk.f32.gmra.mrb[8].mxu1 %vm681_vm2, %v2909_v28 }
 0x493   :  { %9421 = vmatprep.mubr.msk.f32.mxu1 %vm681_vm2, %v2910_v19  ;;  %v10940_v19 = vld [vmem:[%s11958_s7] ss:$0 sm:$0xff] }
 0x496   :  { %9422 = vmatmul.mubr.msk.f32.gmra.mrb[10].mxu1 %vm681_vm2, %v2911_v60 }
 0x497   :  { %9424 = vmatprep.mubr.msk.f32.mxu1 %vm681_vm2, %v2912_v57 }
 0x49a   :  { %9425 = vmatmul.mubr.msk.f32.gmra.mrb[12].mxu1 %vm681_vm2, %v2913_v43 }
 0x555   :  { %v9408_v51 = vpop.f32.mrb[0].mxu1 }
 0x556   :  { %v9759_v52 = vadd.f32 %v9408_v51, %v10894_v49  ;;  %v3022_v32 = vpop.f32.mrb[1].mxu1 }
 0x557   :  { %v9760_v54 = vadd.f32 %v10894_v49, %v3022_v32 }
 0x558   :  { %v3106_v58 = vmax.f32 %v9759_v52, 0.0 }
 0x559   :  { %v3105_v55 = vmax.f32 %v9760_v54, 0.0  ;;  %v9411_v56 = vpop.f32.mrb[2].mxu1 }
 0x55a   :  { %v9761_v4 = vadd.f32 %v9411_v56, %v10894_v49  ;;  %v3032_v59 = vpop.f32.mrb[3].mxu1 }
 0x55b   :  { %v9762_v13 = vadd.f32 %v10894_v49, %v3032_v59  ;;  %9431 = vmatprep.mubr.msk.f32.mxu0 %vm681_vm2, %v3105_v55 }
 0x55c   :  { %9432 = vmatmul.mubr.msk.f32.vlgmr.msra.gmra.mrb[16].mxu0 %vm681_vm2, %v3106_v58  ;;  %v3108_v7 = vmax.f32 %v9761_v4, 0.0 }
 0x55d   :  { %v3107_v40 = vmax.f32 %v9762_v13, 0.0  ;;  %v9414_v9 = vpop.f32.mrb[4].mxu1  ;;  %9704 = vmatpush3.bf16.msra.mxu0 %v10888_v46 }
 0x55e   :  { %v9763_v8 = vadd.f32 %v9414_v9, %v10894_v49  ;;  %v3042_v12 = vpop.f32.mrb[5].mxu1  ;;  %9706 = vmatprep.subr.bf16.mxu0 %v10438_v1 }
 0x55f   :  { %v9764_v14 = vadd.f32 %v10894_v49, %v3042_v12  ;;  %9434 = vmatprep.mubr.msk.f32.mxu0 %vm681_vm2, %v3107_v40 }
 0x560   :  { %9435 = vmatmul.mubr.msk.f32.gmra.mrb[18].mxu0 %vm681_vm2, %v3108_v7  ;;  %v3110_v6 = vmax.f32 %v9763_v8, 0.0 }
 0x561   :  { %v3109_v15 = vmax.f32 %v9764_v14, 0.0  ;;  %v9417_v38 = vpop.f32.mrb[6].mxu1 }
 0x562   :  { %v9765_v16 = vadd.f32 %v9417_v38, %v10894_v49  ;;  %v3052_v18 = vpop.f32.mrb[7].mxu1 }
 0x563   :  { %v9766_v21 = vadd.f32 %v10894_v49, %v3052_v18  ;;  %9437 = vmatprep.mubr.msk.f32.mxu0 %vm681_vm2, %v3109_v15 }
 0x564   :  { %9438 = vmatmul.mubr.msk.f32.gmra.mrb[20].mxu0 %vm681_vm2, %v3110_v6  ;;  %v3112_v23 = vmax.f32 %v9765_v16, 0.0 }
 0x565   :  { %v3111_v62 = vmax.f32 %v9766_v21, 0.0  ;;  %v9420_v11 = vpop.f32.mrb[8].mxu1 }
 0x566   :  { %v9767_v20 = vadd.f32 %v9420_v11, %v10894_v49  ;;  %v3062_v24 = vpop.f32.mrb[9].mxu1 }
 0x567   :  { %v9768_v25 = vadd.f32 %v10894_v49, %v3062_v24  ;;  %9440 = vmatprep.mubr.msk.f32.mxu0 %vm681_vm2, %v3111_v62 }
 0x568   :  { %9441 = vmatmul.mubr.msk.f32.gmra.mrb[22].mxu0 %vm681_vm2, %v3112_v23  ;;  %v3114_v30 = vmax.f32 %v9767_v20, 0.0 }
 0x569   :  { %v3113_v27 = vmax.f32 %v9768_v25, 0.0  ;;  %v9423_v29 = vpop.f32.mrb[10].mxu1 }
 0x56a   :  { %v9769_v63 = vadd.f32 %v9423_v29, %v10894_v49  ;;  %v3072_v26 = vpop.f32.mrb[11].mxu1 }
 0x56b   :  { %v9770_v0 = vadd.f32 %v10894_v49, %v3072_v26  ;;  %9443 = vmatprep.mubr.msk.f32.mxu0 %vm681_vm2, %v3113_v27 }
 0x56c   :  { %9444 = vmatmul.mubr.msk.f32.gmra.mrb[24].mxu0 %vm681_vm2, %v3114_v30  ;;  %v3116_v35 = vmax.f32 %v9769_v63, 0.0 }
 0x56d   :  { %v3115_v31 = vmax.f32 %v9770_v0, 0.0  ;;  %v9426_v33 = vpop.f32.mrb[12].mxu1 }
 0x56e   :  { %v3082_v36 = vpop.f32.mrb[13].mxu1  ;;  %v9771_v39 = vadd.f32 %v9426_v33, %v10894_v49 }
 0x56f   :  { %9446 = vmatprep.mubr.msk.f32.mxu0 %vm681_vm2, %v3115_v31  ;;  %v9772_v37 = vadd.f32 %v10894_v49, %v3082_v36 }
 0x570   :  { %9447 = vmatmul.mubr.msk.f32.gmra.mrb[26].mxu0 %vm681_vm2, %v3116_v35  ;;  %v3118_v28 = vmax.f32 %v9771_v39, 0.0 }
 0x571   :  { %9453 = vmatprep.mubr.msk.f32.mxu0 %vm681_vm2, %v3107_v40  ;;  %v3117_v41 = vmax.f32 %v9772_v37, 0.0 }
 0x574   :  { %9454 = vmatmul.mubr.msk.f32.vlgmr.msra.gmra.mrb[16].mxu0 %vm681_vm2, %v3108_v7 }
 0x575   :  { %9456 = vmatprep.mubr.msk.f32.mxu0 %vm681_vm2, %v3109_v15  ;;  %9708 = vmatpush3.bf16.msra.mxu0 %v10438_v1 }
 0x578   :  { %9457 = vmatmul.mubr.msk.f32.gmra.mrb[18].mxu0 %vm681_vm2, %v3110_v6 }
 0x579   :  { %9459 = vmatprep.mubr.msk.f32.mxu0 %vm681_vm2, %v3111_v62 }
 0x57c   :  { %9460 = vmatmul.mubr.msk.f32.gmra.mrb[20].mxu0 %vm681_vm2, %v3112_v23 }
 0x57d   :  { %9462 = vmatprep.mubr.msk.f32.mxu0 %vm681_vm2, %v3113_v27 }
 0x580   :  { %9463 = vmatmul.mubr.msk.f32.gmra.mrb[22].mxu0 %vm681_vm2, %v3114_v30 }
 0x581   :  { %9465 = vmatprep.mubr.msk.f32.mxu0 %vm681_vm2, %v3115_v31 }
 0x584   :  { %9466 = vmatmul.mubr.msk.f32.gmra.mrb[24].mxu0 %vm681_vm2, %v3116_v35 }
 0x585   :  { %9468 = vmatprep.mubr.msk.f32.mxu0 %vm681_vm2, %v3117_v41 }
 0x588   :  { %9469 = vmatmul.mubr.msk.f32.gmra.mrb[26].mxu0 %vm681_vm2, %v3118_v28 }
 0x647   :  { %v9455_v48 = vpop.f32.mrb[16].mxu0 }
 0x648   :  { %v10943_v42 = vadd.f32 %v9455_v48, %v10940_v19  ;;  %v3370_v60 = vpop.f32.mrb[17].mxu0 }
 0x649   :  { %v10946_v57 = vadd.f32 %v10940_v19, %v3370_v60 }
 0x64a   :  { %v8861_v43 = vmul.f32 -1.442695, %v10943_v42  ;;  %3587 = vrot.lane.b32.xlu0 %v10943_v42, %s10203_s4 }
 0x64b   :  { %v8860_v44 = vmul.f32 -1.442695, %v10946_v57  ;;  %3585 = vrot.lane.b32.xlu1 %v10946_v57, %s10203_s4  ;;  %v9458_v34 = vpop.f32.mrb[18].mxu0 }
 0x64c   :  { %10015 = vpow2.f32 %v8861_v43  ;;  %v10955_v45 = vadd.f32 %v9458_v34, %v10940_v19  ;;  %v3380_v3 = vpop.f32.mrb[19].mxu0 }
 0x64d   :  { %10017 = vpow2.f32 %v8860_v44  ;;  %v10958_v49 = vadd.f32 %v10940_v19, %v3380_v3 }
 0x64e   :  { %v8863_v51 = vmul.f32 -1.442695, %v10955_v45  ;;  %3591 = vrot.lane.b32.xlu0 %v10955_v45, %s10203_s4 }
 0x64f   :  { %v8862_v52 = vmul.f32 -1.442695, %v10958_v49  ;;  %v9461_v32 = vpop.f32.mrb[20].mxu0 }
 0x650   :  { %10019 = vpow2.f32 %v8863_v51  ;;  %v10965_v54 = vadd.f32 %v9461_v32, %v10940_v19  ;;  %v3390_v55 = vpop.f32.mrb[21].mxu0 }
 0x651   :  { %10021 = vpow2.f32 %v8862_v52  ;;  %v10968_v56 = vadd.f32 %v10940_v19, %v3390_v55 }
 0x652   :  { %v8865_v58 = vmul.f32 -1.442695, %v10965_v54  ;;  %3589 = vrot.lane.b32.xlu0 %v10958_v49, %s10203_s4 }
 0x653   :  { %v8864_v4 = vmul.f32 -1.442695, %v10968_v56  ;;  %v9464_v59 = vpop.f32.mrb[22].mxu0 }
 0x654   :  { %10023 = vpow2.f32 %v8865_v58  ;;  %v10975_v13 = vadd.f32 %v9464_v59, %v10940_v19  ;;  %v3400_v40 = vpop.f32.mrb[23].mxu0 }
 0x655   :  { %10025 = vpow2.f32 %v8864_v4  ;;  %v10978_v9 = vadd.f32 %v10940_v19, %v3400_v40 }
 0x656   :  { %v10016_v7 = vpop.eup %10015  ;;  %v8867_v8 = vmul.f32 -1.442695, %v10975_v13  ;;  %3595 = vrot.lane.b32.xlu0 %v10965_v54, %s10203_s4 }
 0x657   :  { %v10018_v12 = vpop.eup %10017  ;;  %v3478_v14 = vadd.f32 1.0, %v10016_v7  ;;  %v9467_v15 = vpop.f32.mrb[24].mxu0  ;;  %v8866_v6 = vmul.f32 -1.442695, %v10978_v9 }
 0x658   :  { %v3477_v38 = vadd.f32 1.0, %v10018_v12  ;;  %10027 = vpow2.f32 %v8867_v8  ;;  %v10985_v16 = vadd.f32 %v9467_v15, %v10940_v19  ;;  %v3410_v18 = vpop.f32.mrb[25].mxu0 }
 0x659   :  { %10029 = vrcp.f32 %v3478_v14  ;;  %v10991_v25 = vadd.f32 %v10940_v19, %v3410_v18 }
 0x65a   :  { %v10020_v21 = vpop.eup %10019  ;;  %10031 = vrcp.f32 %v3477_v38  ;;  %3593 = vrot.lane.b32.xlu0 %v10968_v56, %s10203_s4  ;;  %v8869_v24 = vmul.f32 -1.442695, %v10985_v16  ;;  %v10205_v38 = vmov 0  }
 0x65b   :  { %v10022_v62 = vpop.eup %10021  ;;  %v3480_v11 = vadd.f32 1.0, %v10020_v21  ;;  %v9470_v23 = vpop.f32.mrb[26].mxu0  ;;  %10033 = vpow2.f32 %v8866_v6  ;;  %v8868_v26 = vmul.f32 -1.442695, %v10991_v25  ;;  %9957 = vset.pattern.permute.xlu1 %v10205_v38  ;;  %9958 = vset.pattern.permute.xlu0 %v10205_v38 }
 0x65c   :  { %v3479_v20 = vadd.f32 1.0, %v10022_v62  ;;  %v3420_v27 = vpop.f32.mrb[27].mxu0  ;;  %v10997_v0 = vadd.f32 %v9470_v23, %v10940_v19 }
 0x65d   :  { %10035 = vrcp.f32 %v3480_v11  ;;  %v11001_v39 = vadd.f32 %v10940_v19, %v3420_v27 }
 0x65e   :  { %v10024_v29 = vpop.eup %10023  ;;  %10037 = vrcp.f32 %v3479_v20  ;;  %3597 = vrot.lane.b32.xlu0 %v10978_v9, %s10203_s4  ;;  %v8871_v37 = vmul.f32 -1.442695, %v10997_v0 }
 0x65f   :  { %v10026_v30 = vpop.eup %10025  ;;  %v3482_v63 = vadd.f32 1.0, %v10024_v29  ;;  %10039 = vpow2.f32 %v8869_v24  ;;  %v8870_v43 = vmul.f32 -1.442695, %v11001_v39 }
 0x660   :  { %v3481_v31 = vadd.f32 1.0, %v10026_v30 }
 0x661   :  { %10041 = vrcp.f32 %v3482_v63 }
 0x662   :  { %v10028_v33 = vpop.eup %10027  ;;  %10043 = vpow2.f32 %v8868_v26 }
 0x663   :  { %v10030_v35 = vpop.eup %10029  ;;  %10045 = vrcp.f32 %v3481_v31  ;;  %v3484_v41 = vadd.f32 1.0, %v10028_v33 }
 0x664   :  { %v10032_v36 = vpop.eup %10031  ;;  %3527 = vrot.lane.b32.xlu1 %v10030_v35, %s10204_s15  ;;  %10047 = vpow2.f32 %v8871_v37 }
 0x665   :  { %3525 = vrot.lane.b32.xlu0 %v10032_v36, %s10204_s15  ;;  %v10034_v28 = vpop.eup %10033  ;;  %10049 = vrcp.f32 %v3484_v41 }
 0x666   :  { %v3483_v44 = vadd.f32 1.0, %v10034_v28  ;;  %10051 = vpow2.f32 %v8870_v43 }
 0x667   :  { %v10036_v48 = vpop.eup %10035 }
 0x668   :  { %v10038_v60 = vpop.eup %10037  ;;  %3531 = vrot.lane.b32.xlu1 %v10036_v48, %s10204_s15  ;;  %10053 = vrcp.f32 %v3483_v44 }
 0x669   :  { %3529 = vrot.lane.b32.xlu0 %v10038_v60, %s10204_s15  ;;  %v10040_v19 = vpop.eup %10039 }
 0x66a   :  { %v3486_v3 = vadd.f32 1.0, %v10040_v19 }
 0x66b   :  { %v10042_v34 = vpop.eup %10041 }
 0x66c   :  { %3535 = vrot.lane.b32.xlu1 %v10042_v34, %s10204_s15  ;;  %v10044_v51 = vpop.eup %10043  ;;  %10055 = vrcp.f32 %v3486_v3 }
 0x66d   :  { %3599 = vrot.lane.b32.xlu0 %v10975_v13, %s10203_s4  ;;  %v10046_v52 = vpop.eup %10045  ;;  %v3485_v32 = vadd.f32 1.0, %v10044_v51 }
 0x66e   :  { %v10048_v55 = vpop.eup %10047 }
 0x66f   :  { %v10050_v58 = vpop.eup %10049  ;;  %10057 = vrcp.f32 %v3485_v32  ;;  %v3488_v4 = vadd.f32 1.0, %v10048_v55 }
 0x670   :  { %3533 = vrot.lane.b32.xlu1 %v10046_v52, %s10204_s15  ;;  %v10052_v59 = vpop.eup %10051 }
 0x671   :  { %3601 = vrot.lane.b32.xlu0 %v10991_v25, %s10203_s4  ;;  %10059 = vrcp.f32 %v3488_v4  ;;  %v3487_v7 = vadd.f32 1.0, %v10052_v59 }
 0x672   :  { %v10054_v40 = vpop.eup %10053 }
 0x673   :  { %10061 = vrcp.f32 %v3487_v7 }
 0x674   :  { %3539 = vrot.lane.b32.xlu1 %v10050_v58, %s10204_s15 }
 0x675   :  { %3603 = vrot.lane.b32.xlu0 %v10985_v16, %s10203_s4 }
 0x676   :  { %v10056_v8 = vpop.eup %10055 }
 0x678   :  { %3537 = vrot.lane.b32.xlu1 %v10054_v40, %s10204_s15 }
 0x679   :  { %3605 = vrot.lane.b32.xlu0 %v11001_v39, %s10203_s4  ;;  %v10058_v12 = vpop.eup %10057 }
 0x67b   :  { %v10060_v14 = vpop.eup %10059 }
 0x67c   :  { %3543 = vrot.lane.b32.xlu1 %v10056_v8, %s10204_s15 }
 0x67d   :  { %v10062_v15 = vpop.eup %10061 }
 0x680   :  { %3541 = vrot.lane.b32.xlu1 %v10058_v12, %s10204_s15 }
 0x684   :  { %3547 = vrot.lane.b32.xlu1 %v10060_v14, %s10204_s15 }
 0x688   :  { %3545 = vrot.lane.b32.xlu1 %v10062_v15, %s10204_s15 }
 0x68c   :  { %3607 = vrot.lane.b32.xlu1 %v10997_v0, %s10203_s4 }
 0x6bc   :  { %v3588_v6 = vpop.permute.xlu0 %3587 }
 0x6bd   :  { %v3586_v23 = vpop.permute.xlu1 %3585 }
 0x6c0   :  { %v3592_v18 = vpop.permute.xlu0 %3591 }
 0x6c4   :  { %v3590_v21 = vpop.permute.xlu0 %3589 }
 0x6c8   :  { %v3596_v62 = vpop.permute.xlu0 %3595 }
 0x6cc   :  { %v3594_v11 = vpop.permute.xlu0 %3593 }
 0x6d0   :  { %v3598_v20 = vpop.permute.xlu0 %3597 }
 0x6d6   :  { %v3528_v24 = vpop.permute.xlu1 %3527 }
 0x6d7   :  { %v3562_v27 = vmul.f32 %v10943_v42, %v3528_v24  ;;  %v3526_v29 = vpop.permute.xlu0 %3525 }
 0x6d8   :  { %v3561_v30 = vmul.f32 %v10946_v57, %v3526_v29 }
 0x6d9   :  { %v3622_v63 = vadd.f32 %v3588_v6, %v3562_v27 }
 0x6da   :  { %v3621_v26 = vadd.f32 %v3586_v23, %v3561_v30  ;;  %v3532_v31 = vpop.permute.xlu1 %3531 }
 0x6db   :  { %v11028_v33 = vmax.f32 %v3622_v63, 0.0  ;;  %v3564_v35 = vmul.f32 %v10955_v45, %v3532_v31  ;;  %v3530_v36 = vpop.permute.xlu0 %3529 }
 0x6dc   :  { %v11031_v37 = vmax.f32 %v3621_v26, 0.0  ;;  %v3563_v41 = vmul.f32 %v10958_v49, %v3530_v36 }
 0x6dd   :  { %v3624_v28 = vadd.f32 %v3592_v18, %v3564_v35  ;;  %v3648_v48 = vsel %vm77_vm1, %v11028_v33, 0.0  ;;  %v3693_v42 = vmul.f32 %v11028_v33, %v11028_v33 }
 0x6de   :  { %v3623_v57 = vadd.f32 %v3590_v21, %v3563_v41  ;;  %3649 = vadd.xlane.f32.xlu1 %v3648_v48  ;;  %v3536_v60 = vpop.permute.xlu1 %3535  ;;  %v3645_v43 = vsel %vm77_vm1, %v11031_v37, 0.0  ;;  %v3692_v45 = vmul.f32 %v11031_v37, %v11031_v37 }
 0x6df   :  { %v11042_v44 = vmax.f32 %v3624_v28, 0.0  ;;  %v3566_v49 = vmul.f32 %v10965_v54, %v3536_v60  ;;  %3646 = vadd.xlane.f32.xlu0 %v3645_v43  ;;  %v3707_v3 = vsel %vm77_vm1, %v3693_v42, 0.0  ;;  %v3600_v58 = vpop.permute.xlu0 %3599 }
 0x6e0   :  { %v11045_v19 = vmax.f32 %v3623_v57, 0.0  ;;  %v3704_v32 = vsel %vm77_vm1, %v3692_v45, 0.0 }
 0x6e1   :  { %v3626_v34 = vadd.f32 %v3596_v62, %v3566_v49  ;;  %v3695_v51 = vmul.f32 %v11042_v44, %v11042_v44  ;;  %v3654_v8 = vsel %vm77_vm1, %v11042_v44, 0.0 }
 0x6e2   :  { %3708 = vadd.xlane.f32.xlu1 %v3707_v3  ;;  %v3534_v52 = vpop.permute.xlu1 %3533  ;;  %v3694_v40 = vmul.f32 %v11045_v19, %v11045_v19  ;;  %v3651_v21 = vsel %vm77_vm1, %v11045_v19, 0.0 }
 0x6e3   :  { %v3565_v55 = vmul.f32 %v10968_v56, %v3534_v52  ;;  %3705 = vadd.xlane.f32.xlu0 %v3704_v32  ;;  %v11052_v4 = vmax.f32 %v3626_v34, 0.0  ;;  %v3713_v59 = vsel %vm77_vm1, %v3695_v51, 0.0  ;;  %v3602_v6 = vpop.permute.xlu0 %3601 }
 0x6e4   :  { %v3710_v15 = vsel %vm77_vm1, %v3694_v40, 0.0 }
 0x6e5   :  { %v3625_v54 = vadd.f32 %v3594_v11, %v3565_v55  ;;  %v3697_v38 = vmul.f32 %v11052_v4, %v11052_v4  ;;  %v3660_v29 = vsel %vm77_vm1, %v11052_v4, 0.0 }
 0x6e6   :  { %3714 = vadd.xlane.f32.xlu1 %v3713_v59  ;;  %v3540_v7 = vpop.permute.xlu1 %3539 }
 0x6e7   :  { %v3568_v12 = vmul.f32 %v10975_v13, %v3540_v7  ;;  %3655 = vadd.xlane.f32.xlu0 %v3654_v8  ;;  %v11060_v14 = vmax.f32 %v3625_v54, 0.0  ;;  %v3719_v23 = vsel %vm77_vm1, %v3697_v38, 0.0  ;;  %v3604_v63 = vpop.permute.xlu0 %3603 }
 0x6e9   :  { %v3628_v56 = vadd.f32 %v3600_v58, %v3568_v12  ;;  %v3696_v24 = vmul.f32 %v11060_v14, %v11060_v14  ;;  %v3657_v36 = vsel %vm77_vm1, %v11060_v14, 0.0 }
 0x6ea   :  { %3711 = vadd.xlane.f32.xlu1 %v3710_v15  ;;  %v3538_v18 = vpop.permute.xlu1 %3537 }
 0x6eb   :  { %v3567_v62 = vmul.f32 %v10978_v9, %v3538_v18  ;;  %3652 = vadd.xlane.f32.xlu0 %v3651_v21  ;;  %v11068_v11 = vmax.f32 %v3628_v56, 0.0  ;;  %v3716_v31 = vsel %vm77_vm1, %v3696_v24, 0.0  ;;  %v3606_v51 = vpop.permute.xlu0 %3605  ;;  %v59_v21 = vld [vmem:[%s11959_s8] sm:$0xff] }
 0x6ed   :  { %v3627_v13 = vadd.f32 %v3598_v20, %v3567_v62  ;;  %v3699_v20 = vmul.f32 %v11068_v11, %v11068_v11  ;;  %v3666_v60 = vsel %vm77_vm1, %v11068_v11, 0.0  ;;  %v60_v62 = vld [vmem:[%s11960_s9] sm:$0xff] }
 0x6ee   :  { %3720 = vadd.xlane.f32.xlu1 %v3719_v23  ;;  %v3544_v27 = vpop.permute.xlu1 %3543 }
 0x6ef   :  { %v3570_v30 = vmul.f32 %v10985_v16, %v3544_v27  ;;  %3661 = vadd.xlane.f32.xlu0 %v3660_v29  ;;  %v11076_v26 = vmax.f32 %v3627_v13, 0.0  ;;  %v3725_v48 = vsel %vm77_vm1, %v3699_v20, 0.0 }
 0x6f1   :  { %v3630_v9 = vadd.f32 %v3604_v63, %v3570_v30  ;;  %v3698_v42 = vmul.f32 %v11076_v26, %v11076_v26  ;;  %v3663_v34 = vsel %vm77_vm1, %v11076_v26, 0.0 }
 0x6f2   :  { %3717 = vadd.xlane.f32.xlu1 %v3716_v31  ;;  %v3542_v35 = vpop.permute.xlu1 %3541 }
 0x6f3   :  { %v3569_v41 = vmul.f32 %v10991_v25, %v3542_v35  ;;  %3658 = vadd.xlane.f32.xlu0 %v3657_v36  ;;  %v11084_v28 = vmax.f32 %v3630_v9, 0.0  ;;  %v3722_v45 = vsel %vm77_vm1, %v3698_v42, 0.0 }
 0x6f5   :  { %v3629_v16 = vadd.f32 %v3602_v6, %v3569_v41  ;;  %v3701_v25 = vmul.f32 %v11084_v28, %v11084_v28  ;;  %v3672_v59 = vsel %vm77_vm1, %v11084_v28, 0.0 }
 0x6f6   :  { %3726 = vadd.xlane.f32.xlu1 %v3725_v48  ;;  %v3548_v57 = vpop.permute.xlu1 %3547 }
 0x6f7   :  { %3667 = vadd.xlane.f32.xlu0 %v3666_v60  ;;  %v11091_v43 = vmax.f32 %v3629_v16, 0.0  ;;  %v3572_v52 = vmul.f32 %v10997_v0, %v3548_v57  ;;  %v3731_v55 = vsel %vm77_vm1, %v3701_v25, 0.0 }
 0x6f9   :  { %v3700_v58 = vmul.f32 %v11091_v43, %v11091_v43  ;;  %v3669_v12 = vsel %vm77_vm1, %v11091_v43, 0.0 }
 0x6fa   :  { %3723 = vadd.xlane.f32.xlu1 %v3722_v45  ;;  %v3546_v49 = vpop.permute.xlu1 %3545 }
 0x6fb   :  { %v3571_v3 = vmul.f32 %v11001_v39, %v3546_v49  ;;  %3664 = vadd.xlane.f32.xlu0 %v3663_v34  ;;  %v3728_v39 = vsel %vm77_vm1, %v3700_v58, 0.0 }
 0x6fd   :  { %v3631_v32 = vadd.f32 %v3606_v51, %v3571_v3 }
 0x6fe   :  { %3732 = vadd.xlane.f32.xlu1 %v3731_v55  ;;  %v3608_v54 = vpop.permute.xlu1 %3607 }
 0x6ff   :  { %v11105_v40 = vmax.f32 %v3631_v32, 0.0  ;;  %v3632_v7 = vadd.f32 %v3608_v54, %v3572_v52  ;;  %3673 = vadd.xlane.f32.xlu0 %v3672_v59 }
 0x701   :  { %v3702_v0 = vmul.f32 %v11105_v40, %v11105_v40  ;;  %v11110_v8 = vmax.f32 %v3632_v7, 0.0  ;;  %v3675_v38 = vsel %vm77_vm1, %v11105_v40, 0.0 }
 0x702   :  { %3729 = vadd.xlane.f32.xlu1 %v3728_v39 }
 0x703   :  { %3670 = vadd.xlane.f32.xlu0 %v3669_v12  ;;  %v3734_v56 = vsel %vm77_vm1, %v3702_v0, 0.0  ;;  %v3678_v15 = vsel %vm77_vm1, %v11110_v8, 0.0  ;;  %v3703_v6 = vmul.f32 %v11110_v8, %v11110_v8 }
 0x705   :  { %v3737_v18 = vsel %vm77_vm1, %v3703_v6, 0.0 }
 0x706   :  { %3735 = vadd.xlane.f32.xlu1 %v3734_v56 }
 0x707   :  { %3679 = vadd.xlane.f32.xlu0 %v3678_v15 }
 0x70b   :  { %3676 = vadd.xlane.f32.xlu0 %v3675_v38 }
 0x70f   :  { %3738 = vadd.xlane.f32.xlu0 %v3737_v18 }
 0x717   :  { %3784 = vperm.xlu1 %9957, %v59_v21  }
 0x725   :  { %3801 = vperm.xlu0 %9958, %v60_v62  }
 0x76b   :  { %v3650_v13 = vpop.xlane.xlu1 %3649 }
 0x76c   :  { %v3647_v23 = vpop.xlane.xlu0 %3646 }
 0x76d   :  { %v3681_v35 = vadd.f32 %v3650_v13, %v3647_v23 }
 0x76f   :  { %v3709_v24 = vpop.xlane.xlu1 %3708 }
 0x770   :  { %v3706_v27 = vpop.xlane.xlu0 %3705 }
 0x771   :  { %v3740_v36 = vadd.f32 %v3709_v24, %v3706_v27 }
 0x773   :  { %v3715_v29 = vpop.xlane.xlu1 %3714 }
 0x774   :  { %v3656_v30 = vpop.xlane.xlu0 %3655 }
 0x777   :  { %v3712_v63 = vpop.xlane.xlu1 %3711 }
 0x778   :  { %v3653_v9 = vpop.xlane.xlu0 %3652  ;;  %v3741_v48 = vadd.f32 %v3740_v36, %v3712_v63 }
 0x779   :  { %v3682_v42 = vadd.f32 %v3681_v35, %v3653_v9 }
 0x77a   :  { %v3742_v45 = vadd.f32 %v3741_v48, %v3715_v29 }
 0x77b   :  { %v3721_v31 = vpop.xlane.xlu1 %3720  ;;  %v3683_v25 = vadd.f32 %v3682_v42, %v3656_v30 }
 0x77c   :  { %v3662_v20 = vpop.xlane.xlu0 %3661 }
 0x77f   :  { %v3718_v41 = vpop.xlane.xlu1 %3717 }
 0x780   :  { %v3659_v16 = vpop.xlane.xlu0 %3658  ;;  %v3743_v49 = vadd.f32 %v3742_v45, %v3718_v41 }
 0x781   :  { %v3684_v34 = vadd.f32 %v3683_v25, %v3659_v16 }
 0x782   :  { %v3744_v52 = vadd.f32 %v3743_v49, %v3721_v31 }
 0x783   :  { %v3727_v57 = vpop.xlane.xlu1 %3726  ;;  %v3685_v32 = vadd.f32 %v3684_v34, %v3662_v20 }
 0x784   :  { %v3668_v60 = vpop.xlane.xlu0 %3667 }
 0x787   :  { %v3724_v3 = vpop.xlane.xlu1 %3723 }
 0x788   :  { %v3665_v51 = vpop.xlane.xlu0 %3664  ;;  %v3745_v54 = vadd.f32 %v3744_v52, %v3724_v3 }
 0x789   :  { %v3686_v59 = vadd.f32 %v3685_v32, %v3665_v51 }
 0x78a   :  { %v3746_v0 = vadd.f32 %v3745_v54, %v3727_v57 }
 0x78b   :  { %v3733_v55 = vpop.xlane.xlu1 %3732  ;;  %v3687_v12 = vadd.f32 %v3686_v59, %v3668_v60 }
 0x78c   :  { %v3674_v58 = vpop.xlane.xlu0 %3673 }
 0x78f   :  { %v3730_v7 = vpop.xlane.xlu1 %3729 }
 0x790   :  { %v3671_v39 = vpop.xlane.xlu0 %3670  ;;  %v3747_v56 = vadd.f32 %v3746_v0, %v3730_v7 }
 0x791   :  { %v3688_v15 = vadd.f32 %v3687_v12, %v3671_v39 }
 0x792   :  { %v3748_v6 = vadd.f32 %v3747_v56, %v3733_v55 }
 0x793   :  { %v3689_v18 = vadd.f32 %v3688_v15, %v3674_v58  ;;  %v3736_v21 = vpop.xlane.xlu1 %3735 }
 0x794   :  { %v3680_v38 = vpop.xlane.xlu0 %3679  ;;  %v3749_v23 = vadd.f32 %v3748_v6, %v3736_v21 }
 0x797   :  { %v11142_v57 = vpop.permute.xlu1 %3784 }
 0x798   :  { %v3677_v62 = vpop.xlane.xlu0 %3676 }
 0x799   :  { %v3690_v13 = vadd.f32 %v3689_v18, %v3677_v62 }
 0x79b   :  { %v3691_v24 = vadd.f32 %v3690_v13, %v3680_v38 }
 0x79c   :  { %v3739_v27 = vpop.xlane.xlu0 %3738 }
 0x79d   :  { %v11128_v29 = vmul.f32 0.020833334, %v3691_v24  ;;  %v3750_v30 = vadd.f32 %v3749_v23, %v3739_v27 }
 0x79f   :  { %v3752_v63 = vmul.f32 0.020833334, %v3750_v30  ;;  %v3753_v9 = vmul.f32 %v11128_v29, %v11128_v29  ;;  %v3756_v36 = vsub.f32 %v11031_v37, %v11128_v29  ;;  %v3757_v41 = vsub.f32 %v11028_v33, %v11128_v29 }
 0x7a0   :  { %v3758_v16 = vsub.f32 %v11045_v19, %v11128_v29  ;;  %v3759_v48 = vsub.f32 %v11042_v44, %v11128_v29  ;;  %v3760_v60 = vsub.f32 %v11060_v14, %v11128_v29  ;;  %v3761_v44 = vsub.f32 %v11052_v4, %v11128_v29 }
 0x7a1   :  { %v3754_v31 = vsub.f32 %v3752_v63, %v3753_v9  ;;  %v3762_v34 = vsub.f32 %v11076_v26, %v11128_v29  ;;  %v3763_v59 = vsub.f32 %v11068_v11, %v11128_v29  ;;  %v3764_v0 = vsub.f32 %v11091_v43, %v11128_v29 }
 0x7a2   :  { %v3765_v43 = vsub.f32 %v11084_v28, %v11128_v29 }
 0x7a3   :  { %v3755_v20 = vmax.f32 %v3754_v31, 0.0 }
 0x7a4   :  { %v11150_v49 = vpop.permute.xlu0 %3801 }
 0x7a5   :  { %v3768_v35 = vadd.f32 1e-05, %v3755_v20 }
 0x7a7   :  { %10063 = vrsqrt.f32 %v3768_v35 }
 0x7b1   :  { %v11140_v42 = vpop.eup %10063 }
 0x7b2   :  { %v3770_v45 = vmul.f32 %v11140_v42, %v3756_v36  ;;  %v3771_v37 = vmul.f32 %v11140_v42, %v3757_v41  ;;  %v3772_v25 = vmul.f32 %v11140_v42, %v3758_v16  ;;  %v3773_v33 = vmul.f32 %v11140_v42, %v3759_v48 }
 0x7b3   :  { %v3774_v19 = vmul.f32 %v11140_v42, %v3760_v60  ;;  %v3775_v32 = vmul.f32 %v11140_v42, %v3761_v44  ;;  %v3776_v55 = vmul.f32 %v11140_v42, %v3762_v34  ;;  %v3777_v15 = vmul.f32 %v11140_v42, %v3763_v59 }
 0x7b4   :  { %v3787_v14 = vmul.f32 %v11142_v57, %v3770_v45  ;;  %v3788_v3 = vmul.f32 %v11142_v57, %v3771_v37  ;;  %v3789_v51 = vmul.f32 %v11142_v57, %v3772_v25  ;;  %v3790_v52 = vmul.f32 %v11142_v57, %v3773_v33 }
 0x7b5   :  { %v3791_v26 = vmul.f32 %v11142_v57, %v3774_v19  ;;  %v3792_v56 = vmul.f32 %v11142_v57, %v3775_v32  ;;  %v3793_v18 = vmul.f32 %v11142_v57, %v3776_v55  ;;  %v3778_v11 = vmul.f32 %v11140_v42, %v3764_v0  ;;  %v10183_v19 = vld [vmem:[%s11953_s2] ss:$0 sm:$0xff] }
 0x7b6   :  { %v3804_v58 = vadd.f32 %v11150_v49, %v3787_v14  ;;  %v3805_v54 = vadd.f32 %v11150_v49, %v3788_v3  ;;  %v3806_v4 = vadd.f32 %v11150_v49, %v3789_v51  ;;  %v3807_v12 = vadd.f32 %v11150_v49, %v3790_v52 }
 0x7b7   :  { %v3808_v6 = vadd.f32 %v11150_v49, %v3791_v26  ;;  %v3809_v62 = vadd.f32 %v11150_v49, %v3792_v56  ;;  %v3794_v13 = vmul.f32 %v11142_v57, %v3777_v15  ;;  %v3779_v23 = vmul.f32 %v11140_v42, %v3765_v43 }
 0x7b8   :  { %v3816_v7 = vmax.f32 %v3804_v58, 0.0  ;;  %v3817_v39 = vmax.f32 %v3805_v54, 0.0  ;;  %v3818_v38 = vmax.f32 %v3806_v4, 0.0  ;;  %v3819_v21 = vmax.f32 %v3807_v12, 0.0 }
 0x7b9   :  { %v3820_v24 = vmax.f32 %v3808_v6, 0.0  ;;  %v3810_v27 = vadd.f32 %v11150_v49, %v3793_v18  ;;  %v3795_v30 = vmul.f32 %v11142_v57, %v3778_v11  ;;  %v3821_v28 = vmax.f32 %v3809_v62, 0.0 }
 0x7ba   :  { %9473 = vmatprep.mubr.msk.f32.mxu1 %vm77_vm1, %v3816_v7  ;;  %v3811_v63 = vadd.f32 %v11150_v49, %v3794_v13  ;;  %v3766_v16 = vsub.f32 %v11105_v40, %v11128_v29  ;;  %v3767_v60 = vsub.f32 %v11110_v8, %v11128_v29 }
 0x7bb   :  { %9474 = vmatmul.mubr.msk.f32.vlgmr.msra.gmra.mrb[16].mxu1 %vm77_vm1, %v3817_v39  ;;  %v3822_v9 = vmax.f32 %v3810_v27, 0.0  ;;  %v3812_v31 = vadd.f32 %v11150_v49, %v3795_v30 }
 0x7bc   :  { %9476 = vmatprep.mubr.msk.f32.mxu1 %vm77_vm1, %v3818_v38  ;;  %9489 = vmatpush3.msk.msra.mxu1 %vm120_vm0, %v10847_v50  ;;  %v3796_v50 = vmul.f32 %v11142_v57, %v3779_v23  ;;  %v3823_v20 = vmax.f32 %v3811_v63, 0.0  ;;  %v3780_v48 = vmul.f32 %v11140_v42, %v3766_v16  ;;  %v3781_v45 = vmul.f32 %v11140_v42, %v3767_v60 }
 0x7bd   :  { %v3824_v36 = vmax.f32 %v3812_v31, 0.0 }
 0x7be   :  { %v3813_v35 = vadd.f32 %v11150_v49, %v3796_v50  ;;  %v3797_v37 = vmul.f32 %v11142_v57, %v3780_v48  ;;  %v3798_v25 = vmul.f32 %v11142_v57, %v3781_v45 }
 0x7bf   :  { %9477 = vmatmul.mubr.msk.f32.gmra.mrb[18].mxu1 %vm77_vm1, %v3819_v21 }
 0x7c0   :  { %9479 = vmatprep.mubr.msk.f32.mxu1 %vm77_vm1, %v3820_v24  ;;  %v3825_v41 = vmax.f32 %v3813_v35, 0.0  ;;  %v3814_v40 = vadd.f32 %v11150_v49, %v3797_v37  ;;  %v3815_v8 = vadd.f32 %v11150_v49, %v3798_v25 }
 0x7c2   :  { %v3826_v29 = vmax.f32 %v3814_v40, 0.0  ;;  %v3827_v42 = vmax.f32 %v3815_v8, 0.0 }
 0x7c3   :  { %9480 = vmatmul.mubr.msk.f32.gmra.mrb[20].mxu1 %vm77_vm1, %v3821_v28 }
 0x7c4   :  { %9482 = vmatprep.mubr.msk.f32.mxu1 %vm77_vm1, %v3822_v9 }
 0x7c7   :  { %9483 = vmatmul.mubr.msk.f32.gmra.mrb[22].mxu1 %vm77_vm1, %v3823_v20 }
 0x7c8   :  { %9485 = vmatprep.mubr.msk.f32.mxu1 %vm77_vm1, %v3824_v36 }
 0x7cb   :  { %9486 = vmatmul.mubr.msk.f32.gmra.mrb[24].mxu1 %vm77_vm1, %v3825_v41 }
 0x7cc   :  { %9490 = vmatprep.mubr.msk.f32.mxu1 %vm77_vm1, %v3818_v38 }
 0x7cf   :  { %9491 = vmatmul.mubr.msk.f32.vlgmr.msra.gmra.mrb[16].mxu1 %vm77_vm1, %v3819_v21 }
 0x7d0   :  { %9493 = vmatprep.mubr.msk.f32.mxu1 %vm77_vm1, %v3820_v24 }
 0x7d3   :  { %9494 = vmatmul.mubr.msk.f32.gmra.mrb[18].mxu1 %vm77_vm1, %v3821_v28 }
 0x7d4   :  { %9496 = vmatprep.mubr.msk.f32.mxu1 %vm77_vm1, %v3822_v9 }
 0x7d7   :  { %9497 = vmatmul.mubr.msk.f32.gmra.mrb[20].mxu1 %vm77_vm1, %v3823_v20 }
 0x7d8   :  { %9499 = vmatprep.mubr.msk.f32.mxu1 %vm77_vm1, %v3824_v36 }
 0x7db   :  { %9500 = vmatmul.mubr.msk.f32.gmra.mrb[22].mxu1 %vm77_vm1, %v3825_v41 }
 0x7dc   :  { %9502 = vmatprep.mubr.msk.f32.mxu1 %vm77_vm1, %v3826_v29 }
 0x7df   :  { %9503 = vmatmul.mubr.msk.f32.gmra.mrb[24].mxu1 %vm77_vm1, %v3827_v42 }
 0x7e0   :  { %5561 = vmatprep.mubr.f32.mxu1 %v10195_v47 }
 0x8a2   :  { %v9492_v33 = vpop.f32.mrb[16].mxu1 }
 0x8a3   :  { %v11224_v44 = vadd.f32 %v10183_v19, %v9492_v33  ;;  %v4055_v34 = vpop.f32.mrb[17].mxu1 }
 0x8a4   :  { %v11226_v14 = vadd.f32 %v10183_v19, %v4055_v34 }
 0x8a5   :  { %v8895_v3 = vmul.f32 -1.442695, %v11224_v44  ;;  %4236 = vrot.lane.b32.xlu1 %v11224_v44, %s10193_s23 }
 0x8a6   :  { %v8894_v51 = vmul.f32 -1.442695, %v11226_v14  ;;  %v9495_v52 = vpop.f32.mrb[18].mxu1 }
 0x8a7   :  { %10065 = vpow2.f32 %v8895_v3  ;;  %v11232_v32 = vadd.f32 %v10183_v19, %v9495_v52  ;;  %v4065_v55 = vpop.f32.mrb[19].mxu1 }
 0x8a8   :  { %10067 = vpow2.f32 %v8894_v51  ;;  %v11234_v58 = vadd.f32 %v10183_v19, %v4065_v55 }
 0x8a9   :  { %v8897_v54 = vmul.f32 -1.442695, %v11232_v32  ;;  %4234 = vrot.lane.b32.xlu1 %v11226_v14, %s10193_s23 }
 0x8aa   :  { %v9498_v4 = vpop.f32.mrb[20].mxu1  ;;  %v8896_v26 = vmul.f32 -1.442695, %v11234_v58 }
 0x8ab   :  { %10069 = vpow2.f32 %v8897_v54  ;;  %v11240_v59 = vadd.f32 %v10183_v19, %v9498_v4  ;;  %v4075_v7 = vpop.f32.mrb[21].mxu1 }
 0x8ac   :  { %v11242_v39 = vadd.f32 %v10183_v19, %v4075_v7  ;;  %10071 = vpow2.f32 %v8896_v26 }
 0x8ad   :  { %4240 = vrot.lane.b32.xlu1 %v11232_v32, %s10193_s23  ;;  %v8899_v56 = vmul.f32 -1.442695, %v11240_v59 }
 0x8ae   :  { %v8898_v0 = vmul.f32 -1.442695, %v11242_v39  ;;  %4242 = vrot.lane.b32.xlu0 %v11242_v39, %s10193_s23  ;;  %v9501_v12 = vpop.f32.mrb[22].mxu1 }
 0x8af   :  { %v11250_v15 = vadd.f32 %v10183_v19, %v9501_v12  ;;  %v4085_v38 = vpop.f32.mrb[23].mxu1 }
 0x8b0   :  { %10073 = vpow2.f32 %v8898_v0  ;;  %v11252_v6 = vadd.f32 %v10183_v19, %v4085_v38 }
 0x8b1   :  { %v10066_v18 = vpop.eup %10065  ;;  %4238 = vrot.lane.b32.xlu1 %v11234_v58, %s10193_s23  ;;  %10075 = vpow2.f32 %v8899_v56  ;;  %v8901_v13 = vmul.f32 -1.442695, %v11250_v15 }
 0x8b2   :  { %v10068_v11 = vpop.eup %10067  ;;  %v4145_v43 = vadd.f32 1.0, %v10066_v18  ;;  %v8900_v21 = vmul.f32 -1.442695, %v11252_v6  ;;  %4246 = vrot.lane.b32.xlu0 %v11252_v6, %s10193_s23  ;;  %v9504_v62 = vpop.f32.mrb[24].mxu1 }
 0x8b3   :  { %v11260_v23 = vadd.f32 %v10183_v19, %v9504_v62  ;;  %v4095_v24 = vpop.f32.mrb[25].mxu1  ;;  %v4144_v27 = vadd.f32 1.0, %v10068_v11 }
 0x8b4   :  { %10077 = vrcp.f32 %v4145_v43  ;;  %v11262_v30 = vadd.f32 %v10183_v19, %v4095_v24 }
 0x8b5   :  { %v10070_v28 = vpop.eup %10069  ;;  %4244 = vrot.lane.b32.xlu1 %v11240_v59, %s10193_s23  ;;  %10079 = vpow2.f32 %v8900_v21  ;;  %v8903_v50 = vmul.f32 -1.442695, %v11260_v23 }
 0x8b6   :  { %v8902_v63 = vmul.f32 -1.442695, %v11262_v30  ;;  %10081 = vpow2.f32 %v8901_v13  ;;  %v4147_v9 = vadd.f32 1.0, %v10070_v28  ;;  %v10072_v31 = vpop.eup %10071 }
 0x8b7   :  { %10083 = vrcp.f32 %v4144_v27  ;;  %v4146_v36 = vadd.f32 1.0, %v10072_v31 }
 0x8b8   :  { %10085 = vpow2.f32 %v8902_v63 }
 0x8b9   :  { %4248 = vrot.lane.b32.xlu1 %v11250_v15, %s10193_s23  ;;  %10087 = vpow2.f32 %v8903_v50 }
 0x8ba   :  { %v10074_v20 = vpop.eup %10073  ;;  %10089 = vrcp.f32 %v4147_v9 }
 0x8bb   :  { %v4148_v35 = vadd.f32 1.0, %v10074_v20  ;;  %v10076_v41 = vpop.eup %10075 }
 0x8bc   :  { %v4149_v60 = vadd.f32 1.0, %v10076_v41 }
 0x8bd   :  { %10091 = vrcp.f32 %v4148_v35 }
 0x8be   :  { %v10078_v16 = vpop.eup %10077  ;;  %10093 = vrcp.f32 %v4146_v36 }
 0x8bf   :  { %4186 = vrot.lane.b32.xlu1 %v10078_v16, %s10194_s27  ;;  %v10080_v48 = vpop.eup %10079 }
 0x8c0   :  { %v10082_v45 = vpop.eup %10081  ;;  %v4150_v37 = vadd.f32 1.0, %v10080_v48 }
 0x8c1   :  { %v10084_v25 = vpop.eup %10083  ;;  %v4151_v8 = vadd.f32 1.0, %v10082_v45 }
 0x8c2   :  { %10095 = vrcp.f32 %v4150_v37  ;;  %v10086_v40 = vpop.eup %10085 }
 0x8c3   :  { %4184 = vrot.lane.b32.xlu1 %v10084_v25, %s10194_s27  ;;  %10097 = vrcp.f32 %v4149_v60  ;;  %v10088_v29 = vpop.eup %10087  ;;  %v4152_v42 = vadd.f32 1.0, %v10086_v40 }
 0x8c4   :  { %v10090_v33 = vpop.eup %10089  ;;  %v4153_v34 = vadd.f32 1.0, %v10088_v29 }
 0x8c5   :  { %10099 = vrcp.f32 %v4152_v42 }
 0x8c6   :  { %10101 = vrcp.f32 %v4151_v8 }
 0x8c7   :  { %v10092_v19 = vpop.eup %10091  ;;  %4190 = vrot.lane.b32.xlu1 %v10090_v33, %s10194_s27  ;;  %10103 = vrcp.f32 %v4153_v34 }
 0x8c8   :  { %4192 = vrot.lane.b32.xlu0 %v10092_v19, %s10194_s27  ;;  %v10094_v3 = vpop.eup %10093 }
 0x8cb   :  { %4188 = vrot.lane.b32.xlu1 %v10094_v3, %s10194_s27 }
 0x8cc   :  { %v10096_v51 = vpop.eup %10095 }
 0x8cd   :  { %v10098_v52 = vpop.eup %10097  ;;  %4196 = vrot.lane.b32.xlu0 %v10096_v51, %s10194_s27 }
 0x8cf   :  { %4194 = vrot.lane.b32.xlu1 %v10098_v52, %s10194_s27  ;;  %v10100_v55 = vpop.eup %10099 }
 0x8d0   :  { %v10102_v54 = vpop.eup %10101 }
 0x8d1   :  { %4200 = vrot.lane.b32.xlu0 %v10100_v55, %s10194_s27  ;;  %v10104_v4 = vpop.eup %10103 }
 0x8d3   :  { %4198 = vrot.lane.b32.xlu1 %v10102_v54, %s10194_s27 }
 0x8d5   :  { %4250 = vrot.lane.b32.xlu0 %v11262_v30, %s10193_s23 }
 0x8d7   :  { %4202 = vrot.lane.b32.xlu1 %v10104_v4, %s10194_s27 }
 0x8db   :  { %4252 = vrot.lane.b32.xlu1 %v11260_v23, %s10193_s23 }
 0x917   :  { %v4237_v26 = vpop.permute.xlu1 %4236 }
 0x91b   :  { %v4235_v7 = vpop.permute.xlu1 %4234 }
 0x91f   :  { %v4241_v0 = vpop.permute.xlu1 %4240 }
 0x920   :  { %v4243_v18 = vpop.permute.xlu0 %4242 }
 0x923   :  { %v4239_v12 = vpop.permute.xlu1 %4238 }
 0x924   :  { %v4247_v62 = vpop.permute.xlu0 %4246 }
 0x927   :  { %v4245_v56 = vpop.permute.xlu1 %4244 }
 0x92b   :  { %v4249_v38 = vpop.permute.xlu1 %4248 }
 0x931   :  { %v4187_v11 = vpop.permute.xlu1 %4186 }
 0x932   :  { %v4215_v43 = vmul.f32 %v11224_v44, %v4187_v11 }
 0x934   :  { %v4265_v24 = vadd.f32 %v4237_v26, %v4215_v43 }
 0x935   :  { %v4185_v21 = vpop.permute.xlu1 %4184 }
 0x936   :  { %v4214_v13 = vmul.f32 %v11226_v14, %v4185_v21  ;;  %v4275_v31 = vmax.f32 %v4265_v24, 0.0 }
 0x938   :  { %v4264_v27 = vadd.f32 %v4235_v7, %v4214_v13 }
 0x939   :  { %v4191_v28 = vpop.permute.xlu1 %4190 }
 0x93a   :  { %v4274_v63 = vmax.f32 %v4264_v27, 0.0  ;;  %v4217_v50 = vmul.f32 %v11232_v32, %v4191_v28  ;;  %v4193_v9 = vpop.permute.xlu0 %4192 }
 0x93b   :  { %v4218_v35 = vmul.f32 %v11242_v39, %v4193_v9 }
 0x93c   :  { %v4267_v20 = vadd.f32 %v4241_v0, %v4217_v50  ;;  %9509 = vmatprep.mubr.msk.f32.mxu0 %vm681_vm2, %v4274_v63 }
 0x93d   :  { %9510 = vmatmul.mubr.msk.f32.vlgmr.msra.gmra.mrb[28].mxu0 %vm681_vm2, %v4275_v31  ;;  %v4189_v44 = vpop.permute.xlu1 %4188  ;;  %v4268_v14 = vadd.f32 %v4243_v18, %v4218_v35 }
 0x93e   :  { %v4277_v36 = vmax.f32 %v4267_v20, 0.0  ;;  %v4216_v41 = vmul.f32 %v11234_v58, %v4189_v44 }
 0x93f   :  { %v4197_v48 = vpop.permute.xlu0 %4196  ;;  %v4278_v8 = vmax.f32 %v4268_v14, 0.0 }
 0x940   :  { %v4266_v16 = vadd.f32 %v4239_v12, %v4216_v41  ;;  %v4445_v60 = vcombine.low %v4275_v31, %v4277_v36  ;;  %v4446_v45 = vcombine.high %v4275_v31, %v4277_v36  ;;  %v4220_v32 = vmul.f32 %v11252_v6, %v4197_v48 }
 0x941   :  { %v4195_v37 = vpop.permute.xlu1 %4194 }
 0x942   :  { %v4276_v25 = vmax.f32 %v4266_v16, 0.0  ;;  %v4219_v40 = vmul.f32 %v11240_v59, %v4195_v37  ;;  %v4270_v39 = vadd.f32 %v4247_v62, %v4220_v32  ;;  %v4453_v58 = vrot.slane %v4445_v60, %v10491_v22 }
 0x943   :  { %v4201_v19 = vpop.permute.xlu0 %4200  ;;  %v4460_v34 = vrot.slane %v4446_v45, %v10491_v22 }
 0x944   :  { %v4429_v29 = vcombine.low %v4274_v63, %v4276_v25  ;;  %v4430_v42 = vcombine.high %v4274_v63, %v4276_v25  ;;  %v4269_v33 = vadd.f32 %v4245_v56, %v4219_v40  ;;  %9512 = vmatprep.mubr.msk.f32.mxu0 %vm681_vm2, %v4276_v25  ;;  %v4280_v3 = vmax.f32 %v4270_v39, 0.0 }
 0x945   :  { %9513 = vmatmul.mubr.msk.f32.gmra.mrb[30].mxu0 %vm681_vm2, %v4277_v36  ;;  %v4199_v6 = vpop.permute.xlu1 %4198  ;;  %v4222_v4 = vmul.f32 %v11262_v30, %v4201_v19 }
 0x946   :  { %v4437_v51 = vrot.slane %v4429_v29, %v10491_v22  ;;  %v4444_v59 = vrot.slane %v4430_v42, %v10491_v22  ;;  %v4279_v52 = vmax.f32 %v4269_v33, 0.0  ;;  %v4221_v55 = vmul.f32 %v11250_v15, %v4199_v6  ;;  %9515 = vmatprep.mubr.msk.f32.mxu0 %vm681_vm2, %v4278_v8 }
 0x947   :  { %v4461_v54 = vcombine.low %v4278_v8, %v4280_v3  ;;  %v4251_v56 = vpop.permute.xlu0 %4250  ;;  %v4462_v18 = vcombine.high %v4278_v8, %v4280_v3 }
 0x948   :  { %v4493_v26 = vcombine.low %v4437_v51, %v4453_v58  ;;  %v4494_v7 = vcombine.high %v4437_v51, %v4453_v58  ;;  %v4509_v0 = vcombine.low %v4444_v59, %v4460_v34  ;;  %v4510_v12 = vcombine.high %v4444_v59, %v4460_v34 }
 0x949   :  { %v4271_v11 = vadd.f32 %v4249_v38, %v4221_v55  ;;  %v4272_v43 = vadd.f32 %v4251_v56, %v4222_v4  ;;  %9516 = vmatmul.mubr.msk.f32.gmra.mrb[32].mxu0 %vm681_vm2, %v4279_v52  ;;  %v4203_v21 = vpop.permute.xlu1 %4202  ;;  %v4469_v30 = vrot.slane %v4461_v54, %v10491_v22  ;;  %v4476_v20 = vrot.slane %v4462_v18, %v10491_v22 }
 0x94a   :  { %v4501_v62 = vrot.slane %v4493_v26, %v10502_v53  ;;  %v4508_v15 = vrot.slane %v4494_v7, %v10502_v53  ;;  %v4517_v13 = vrot.slane %v4509_v0, %v10502_v53  ;;  %v4524_v24 = vrot.slane %v4510_v12, %v10502_v53  ;;  %9518 = vmatprep.mubr.msk.f32.mxu0 %vm681_vm2, %v4280_v3 }
 0x94b   :  { %v4281_v27 = vmax.f32 %v4271_v11, 0.0  ;;  %v4282_v28 = vmax.f32 %v4272_v43, 0.0  ;;  %v4223_v38 = vmul.f32 %v11260_v23, %v4203_v21 }
 0x94c   :  { %v8914_v63 = vcombine.low %v4501_v62, %v4508_v15  ;;  %v8916_v50 = vcombine.high %v4501_v62, %v4508_v15  ;;  %v8918_v9 = vcombine.low %v4517_v13, %v4524_v24  ;;  %v8920_v31 = vcombine.high %v4517_v13, %v4524_v24 }
 0x94d   :  { %v4477_v35 = vcombine.low %v4279_v52, %v4281_v27  ;;  %v4478_v44 = vcombine.high %v4279_v52, %v4281_v27  ;;  %v4565_v36 = vcombine.high %v4282_v28, %v10195_v47  ;;  %9519 = vmatmul.mubr.msk.f32.gmra.mrb[34].mxu0 %vm681_vm2, %v4281_v27  ;;  %v4253_v41 = vpop.permute.xlu1 %4252  ;;  %v4572_v32 = vrot.slane %v4282_v28, %v10491_v22 }
 0x94e   :  { %v4273_v14 = vadd.f32 %v4253_v41, %v4223_v38  ;;  %9521 = vmatprep.mubr.msk.f32.mxu0 %vm681_vm2, %v4282_v28  ;;  %v4639_v16 = vrot.slane %v8914_v63, %v10491_v22  ;;  %v4655_v23 = vrot.slane %v8916_v50, %v10491_v22  ;;  %v4671_v48 = vrot.slane %v8918_v9, %v10491_v22 }
 0x94f   :  { %v4485_v60 = vrot.slane %v4477_v35, %v10491_v22  ;;  %v4492_v45 = vrot.slane %v4478_v44, %v10491_v22  ;;  %v4687_v37 = vrot.slane %v8920_v31, %v10491_v22  ;;  %v4579_v25 = vrot.slane %v4565_v36, %v10491_v22 }
 0x950   :  { %v4283_v40 = vmax.f32 %v4273_v14, 0.0  ;;  %v4696_v39 = vcombine.high %v4639_v16, %v4655_v23  ;;  %v4695_v8 = vcombine.low %v4639_v16, %v4655_v23 }
 0x951   :  { %v4525_v29 = vcombine.low %v4469_v30, %v4485_v60  ;;  %v4526_v42 = vcombine.high %v4469_v30, %v4485_v60  ;;  %v4541_v33 = vcombine.low %v4476_v20, %v4492_v45  ;;  %v4542_v19 = vcombine.high %v4476_v20, %v4492_v45 }
 0x952   :  { %v4580_v58 = vcombine.high %v4283_v40, %v10195_v47  ;;  %v4587_v34 = vrot.slane %v4283_v40, %v10491_v22  ;;  %9522 = vmatmul.mubr.msk.f32.gmra.mrb[36].mxu0 %vm681_vm2, %v4283_v40  ;;  %v4710_v3 = vrot.slane %v4696_v39, %v10502_v53  ;;  %v4728_v6 = vcombine.high %v4671_v48, %v4687_v37 }
 0x953   :  { %v4533_v51 = vrot.slane %v4525_v29, %v10502_v53  ;;  %v4540_v59 = vrot.slane %v4526_v42, %v10502_v53  ;;  %v4549_v52 = vrot.slane %v4541_v33, %v10502_v53  ;;  %v4556_v55 = vrot.slane %v4542_v19, %v10502_v53  ;;  %4921 = vmatprep.mubr.f32.mxu0 %v10195_v47 }
 0x954   :  { %v4594_v54 = vrot.slane %v4580_v58, %v10491_v22  ;;  %v4595_v4 = vcombine.low %v4572_v32, %v4587_v34  ;;  %v4596_v26 = vcombine.high %v4572_v32, %v4587_v34  ;;  %v4742_v7 = vrot.slane %v4728_v6, %v10502_v53 }
 0x955   :  { %v4703_v0 = vrot.slane %v4695_v8, %v10502_v53  ;;  %v4727_v12 = vcombine.low %v4671_v48, %v4687_v37  ;;  %v8915_v56 = vcombine.low %v4533_v51, %v4540_v59  ;;  %v8917_v18 = vcombine.high %v4533_v51, %v4540_v59 }
 0x956   :  { %v4603_v11 = vrot.slane %v4595_v4, %v10502_v53  ;;  %v4610_v43 = vrot.slane %v4596_v26, %v10502_v53  ;;  %v4611_v21 = vcombine.low %v4579_v25, %v4594_v54  ;;  %v4612_v62 = vcombine.high %v4579_v25, %v4594_v54 }
 0x957   :  { %v4761_v15 = vcombine.low %v4710_v3, %v4742_v7  ;;  %v4735_v13 = vrot.slane %v4727_v12, %v10502_v53  ;;  %v4646_v24 = vrot.slane %v8915_v56, %v10491_v22  ;;  %v4662_v50 = vrot.slane %v8917_v18, %v10491_v22 }
 0x958   :  { %v4619_v30 = vrot.slane %v4611_v21, %v10502_v53  ;;  %v4626_v27 = vrot.slane %v4612_v62, %v10502_v53  ;;  %v4767_v28 = vcombine.low %v4603_v11, %v4610_v43  ;;  %v8922_v38 = vcombine.high %v4603_v11, %v4610_v43 }
 0x959   :  { %4822 = vrot.lane.b32.xlu1 %v4761_v15, %s10198_s28  ;;  %v4760_v63 = vcombine.high %v4703_v0, %v4735_v13  ;;  %v8919_v9 = vcombine.low %v4549_v52, %v4556_v55  ;;  %v8921_v31 = vcombine.high %v4549_v52, %v4556_v55  ;;  %v4762_v41 = vcombine.high %v4710_v3, %v4742_v7 }
 0x95a   :  { %v4783_v20 = vcombine.low %v4619_v30, %v4626_v27  ;;  %v8923_v35 = vcombine.high %v4619_v30, %v4626_v27  ;;  %v4774_v44 = vrot.slane %v4767_v28, %v10491_v22  ;;  %v4782_v36 = vrot.slane %v8922_v38, %v10491_v22  ;;  %v10184_v30 = vld [vmem:[%s11955_s3] sm:$0xff] }
 0x95b   :  { %4818 = vrot.lane.b32.xlu0 %v4760_v63, %s10199_s29  ;;  %v4678_v14 = vrot.slane %v8919_v9, %v10491_v22  ;;  %v4694_v16 = vrot.slane %v8921_v31, %v10491_v22  ;;  %v4711_v23 = vcombine.low %v4646_v24, %v4662_v50  ;;  %v4759_v32 = vcombine.low %v4703_v0, %v4735_v13 }
 0x95c   :  { %v4790_v48 = vrot.slane %v4783_v20, %v10491_v22  ;;  %v4798_v60 = vrot.slane %v8923_v35, %v10491_v22  ;;  %v4799_v45 = vcombine.low %v4774_v44, %v4782_v36  ;;  %v4712_v40 = vcombine.high %v4646_v24, %v4662_v50 }
 0x95d   :  { %v4719_v37 = vrot.slane %v4711_v23, %v10502_v53  ;;  %v4743_v25 = vcombine.low %v4678_v14, %v4694_v16  ;;  %v4744_v39 = vcombine.high %v4678_v14, %v4694_v16 }
 0x95e   :  { %v4807_v8 = vcombine.low %v4790_v48, %v4798_v60  ;;  %v4806_v42 = vrot.slane %v4799_v45, %v10502_v53  ;;  %v4726_v34 = vrot.slane %v4712_v40, %v10502_v53 }
 0x95f   :  { %4826 = vrot.lane.b32.xlu0 %v4762_v41, %s10200_s30  ;;  %v4751_v29 = vrot.slane %v4743_v25, %v10502_v53  ;;  %v4758_v3 = vrot.slane %v4744_v39, %v10502_v53 }
 0x960   :  { %v4814_v33 = vrot.slane %v4807_v8, %v10502_v53 }
 0x961   :  { %v4763_v19 = vcombine.low %v4719_v37, %v4751_v29  ;;  %v4764_v58 = vcombine.high %v4719_v37, %v4751_v29  ;;  %v4765_v59 = vcombine.low %v4726_v34, %v4758_v3  ;;  %v4766_v52 = vcombine.high %v4726_v34, %v4758_v3 }
 0x962   :  { %v4815_v6 = vcombine.low %v4806_v42, %v4814_v33  ;;  %v4816_v51 = vcombine.high %v4806_v42, %v4814_v33 }
 0x963   :  { %4830 = vrot.lane.b32.xlu1 %v4763_v19, %s10201_s13  ;;  %4834 = vrot.lane.b32.xlu0 %v4764_v58, %s10202_s14 }
 0x967   :  { %4838 = vrot.lane.b32.xlu1 %v4765_v59, %s10193_s23  ;;  %4846 = vrot.lane.b32.xlu0 %v4816_v51, %s10199_s29 }
 0x96b   :  { %4842 = vrot.lane.b32.xlu1 %v4766_v52, %s10194_s27 }
 0x9cb   :  { %v4823_v54 = vpop.permute.xlu1 %4822 }
 0x9cd   :  { %v4819_v55 = vpop.permute.xlu0 %4818 }
 0x9ce   :  { %v4849_v26 = vsel %vm681_vm2, %v4759_v32, %v4819_v55 }
 0x9cf   :  { %v4850_v12 = vsel %vm1432_vm3, %v4849_v26, %v4823_v54 }
 0x9d1   :  { %v4827_v4 = vpop.permute.xlu0 %4826 }
 0x9d2   :  { %v4851_v56 = vsel %vm1434_vm4, %v4850_v12, %v4827_v4 }
 0x9d5   :  { %v4831_v7 = vpop.permute.xlu1 %4830  ;;  %v4835_v0 = vpop.permute.xlu0 %4834 }
 0x9d6   :  { %v4852_v18 = vsel %vm1436_vm5, %v4851_v56, %v4831_v7 }
 0x9d7   :  { %v4853_v62 = vsel %vm1438_vm6, %v4852_v18, %v4835_v0 }
 0x9d9   :  { %v4839_v11 = vpop.permute.xlu1 %4838  ;;  %v4847_v43 = vpop.permute.xlu0 %4846 }
 0x9da   :  { %v11366_v21 = vsel %vm681_vm2, %v4815_v6, %v4847_v43  ;;  %v4854_v15 = vsel %vm1440_vm7, %v4853_v62, %v4839_v11 }
 0x9db   :  { %4857 = vmatprep.subr.mxu0 %v11366_v21 }
 0x9dd   :  { %v4843_v13 = vpop.permute.xlu1 %4842 }
 0x9de   :  { %v11372_v24 = vsel %vm1442_vm8, %v4854_v15, %v4843_v13 }
 0x9df   :  { %4858 = vmatpush1.msra.mxu0 %v11372_v24 }
 0x9e0   :  { %8924 = vmatmul.mubr.msk.f32.vlgmr.msra.gmra.mrb[38].mxu0 %vm1449_vm9, %v10184_v30  ;;  %9710 = vmatprep.subr.bf16.mxu0 %v10662_v61 }
 0x9e1   :  { %9712 = vmatpush3.bf16.msra.mxu0 %v10662_v61 }
 0x9e2   :  { %9714 = vmatprep.subr.bf16.mxu0 %v10770_v5 }
 0xab3   :  { %v4923_v27 = vpop.f32.mrb[38].mxu0 }
 0xab4   :  { %4932 = vrot.lane.b32.xlu1 %v4923_v27, %s10193_s23  ;;  %4929 = vrot.lane.b32.xlu0 %v4923_v27, %s10194_s27  ;;  %v4925_v28 = vpop.f32.mrb[39].mxu0 }
 0xab5   :  { %5497 = vmatprep.subr.mxu1 %v4925_v28  ;;  %v5090_v42 = vcombine.high %v4925_v28, %v10195_v47  ;;  %v5097_v0 = vrot.slane %v4925_v28, %v10491_v22 }
 0xab6   :  { %5498 = vmatpush1.msra.mxu1 %v4923_v27 }
 0xab7   :  { %8945 = vmatmul.mubr.msk.f32.vlgmr.msra.gmra.mrb[26].mxu1 %vm1449_vm9, %v10184_v30  ;;  %9718 = vmatprep.subr.bf16.mxu1 %v10878_v2  ;;  %v5104_v15 = vrot.slane %v5090_v42, %v10491_v22 }
 0xab8   :  { %4938 = vrot.lane.b32.xlu1 %v4923_v27, %s10201_s13  ;;  %4935 = vrot.lane.b32.xlu0 %v4923_v27, %s10202_s14 }
 0xab9   :  { %9720 = vmatpush3.bf16.msra.mxu1 %v10878_v2 }
 0xaba   :  { %9722 = vmatprep.subr.bf16.mxu1 %v10888_v46 }
 0xabc   :  { %4944 = vrot.lane.b32.xlu1 %v4923_v27, %s10198_s28  ;;  %4941 = vrot.lane.b32.xlu0 %v4923_v27, %s10200_s30 }
 0xac0   :  { %4947 = vrot.lane.b32.xlu0 %v4923_v27, %s10199_s29  ;;  %4951 = vrot.lane.b32.xlu1 %v4925_v28, %s10194_s27 }
 0xb26   :  { %v4933_v38 = vpop.permute.xlu1 %4932  ;;  %v4930_v63 = vpop.permute.xlu0 %4929 }
 0xb27   :  { %v4954_v50 = vcombine.low %v4923_v27, %v4933_v38  ;;  %v4955_v9 = vcombine.high %v4923_v27, %v4933_v38 }
 0xb29   :  { %v4962_v36 = vrot.slane %v4954_v50, %v10491_v22  ;;  %v4969_v41 = vrot.slane %v4955_v9, %v10491_v22 }
 0xb2a   :  { %v4939_v31 = vpop.permute.xlu1 %4938  ;;  %v4936_v20 = vpop.permute.xlu0 %4935 }
 0xb2b   :  { %v4970_v35 = vcombine.low %v4930_v63, %v4936_v20  ;;  %v4971_v44 = vcombine.high %v4930_v63, %v4936_v20 }
 0xb2d   :  { %v4978_v14 = vrot.slane %v4970_v35, %v10491_v22  ;;  %v4985_v16 = vrot.slane %v4971_v44, %v10491_v22 }
 0xb2e   :  { %v4945_v23 = vpop.permute.xlu1 %4944  ;;  %v4942_v48 = vpop.permute.xlu0 %4941 }
 0xb2f   :  { %v5018_v60 = vcombine.low %v4962_v36, %v4978_v14  ;;  %v5019_v45 = vcombine.high %v4962_v36, %v4978_v14  ;;  %v5034_v32 = vcombine.low %v4969_v41, %v4985_v16  ;;  %v5035_v37 = vcombine.high %v4969_v41, %v4985_v16 }
 0xb30   :  { %v4986_v25 = vcombine.low %v4939_v31, %v4945_v23  ;;  %v4987_v33 = vcombine.high %v4939_v31, %v4945_v23 }
 0xb31   :  { %v5026_v40 = vrot.slane %v5018_v60, %v10502_v53  ;;  %v5033_v39 = vrot.slane %v5019_v45, %v10502_v53  ;;  %v5042_v8 = vrot.slane %v5034_v32, %v10502_v53  ;;  %v5049_v29 = vrot.slane %v5035_v37, %v10502_v53 }
 0xb32   :  { %v4948_v19 = vpop.permute.xlu0 %4947  ;;  %v4952_v58 = vpop.permute.xlu1 %4951  ;;  %v4994_v7 = vrot.slane %v4986_v25, %v10491_v22  ;;  %v5001_v12 = vrot.slane %v4987_v33, %v10491_v22 }
 0xb33   :  { %v8925_v34 = vcombine.low %v5026_v40, %v5033_v39  ;;  %v8927_v3 = vcombine.high %v5026_v40, %v5033_v39  ;;  %v8929_v6 = vcombine.low %v5042_v8, %v5049_v29  ;;  %v8931_v51 = vcombine.high %v5042_v8, %v5049_v29 }
 0xb34   :  { %v5002_v59 = vcombine.low %v4942_v48, %v4948_v19  ;;  %v5003_v52 = vcombine.high %v4942_v48, %v4948_v19  ;;  %v5105_v55 = vcombine.high %v4952_v58, %v10195_v47  ;;  %v5112_v54 = vrot.slane %v4952_v58, %v10491_v22 }
 0xb35   :  { %v5164_v4 = vrot.slane %v8925_v34, %v10491_v22  ;;  %v5180_v26 = vrot.slane %v8927_v3, %v10491_v22  ;;  %v5196_v43 = vrot.slane %v8929_v6, %v10491_v22  ;;  %v5212_v62 = vrot.slane %v8931_v51, %v10491_v22 }
 0xb36   :  { %v5010_v56 = vrot.slane %v5002_v59, %v10491_v22  ;;  %v5017_v18 = vrot.slane %v5003_v52, %v10491_v22  ;;  %v5119_v11 = vrot.slane %v5105_v55, %v10491_v22  ;;  %v5120_v13 = vcombine.low %v5097_v0, %v5112_v54 }
 0xb37   :  { %v5121_v28 = vcombine.high %v5097_v0, %v5112_v54  ;;  %v5220_v31 = vcombine.low %v5164_v4, %v5180_v26  ;;  %v5252_v16 = vcombine.low %v5196_v43, %v5212_v62  ;;  %v5221_v23 = vcombine.high %v5164_v4, %v5180_v26 }
 0xb38   :  { %v5050_v30 = vcombine.low %v4994_v7, %v5010_v56  ;;  %v5051_v27 = vcombine.high %v4994_v7, %v5010_v56  ;;  %v5066_v38 = vcombine.low %v5001_v12, %v5017_v18  ;;  %v5067_v63 = vcombine.high %v5001_v12, %v5017_v18 }
 0xb39   :  { %v5136_v50 = vcombine.low %v5104_v15, %v5119_v11  ;;  %v5137_v9 = vcombine.high %v5104_v15, %v5119_v11  ;;  %v5128_v37 = vrot.slane %v5120_v13, %v10502_v53  ;;  %v5135_v25 = vrot.slane %v5121_v28, %v10502_v53 }
 0xb3a   :  { %v5058_v20 = vrot.slane %v5050_v30, %v10502_v53  ;;  %v5065_v35 = vrot.slane %v5051_v27, %v10502_v53  ;;  %v5074_v44 = vrot.slane %v5066_v38, %v10502_v53  ;;  %v5081_v36 = vrot.slane %v5067_v63, %v10502_v53 }
 0xb3b   :  { %v5144_v41 = vrot.slane %v5136_v50, %v10502_v53  ;;  %v5151_v14 = vrot.slane %v5137_v9, %v10502_v53  ;;  %v5228_v19 = vrot.slane %v5220_v31, %v10502_v53  ;;  %v5260_v58 = vrot.slane %v5252_v16, %v10502_v53 }
 0xb3c   :  { %v8926_v48 = vcombine.low %v5058_v20, %v5065_v35  ;;  %v8928_v60 = vcombine.high %v5058_v20, %v5065_v35  ;;  %v8930_v45 = vcombine.low %v5074_v44, %v5081_v36  ;;  %v8932_v32 = vcombine.high %v5074_v44, %v5081_v36 }
 0xb3d   :  { %v5308_v42 = vcombine.low %v5144_v41, %v5151_v14  ;;  %v8934_v33 = vcombine.high %v5144_v41, %v5151_v14  ;;  %v5235_v34 = vrot.slane %v5221_v23, %v10502_v53  ;;  %v5253_v3 = vcombine.high %v5196_v43, %v5212_v62 }
 0xb3e   :  { %v5171_v40 = vrot.slane %v8926_v48, %v10491_v22  ;;  %v5187_v39 = vrot.slane %v8928_v60, %v10491_v22  ;;  %v5203_v8 = vrot.slane %v8930_v45, %v10491_v22  ;;  %v5219_v29 = vrot.slane %v8932_v32, %v10491_v22 }
 0xb3f   :  { %v5292_v59 = vcombine.low %v5128_v37, %v5135_v25  ;;  %v8933_v52 = vcombine.high %v5128_v37, %v5135_v25  ;;  %v5284_v55 = vcombine.low %v5228_v19, %v5260_v58  ;;  %v5285_v54 = vcombine.high %v5228_v19, %v5260_v58 }
 0xb40   :  { %v5236_v6 = vcombine.low %v5171_v40, %v5187_v39  ;;  %v5268_v51 = vcombine.low %v5203_v8, %v5219_v29  ;;  %v5267_v4 = vrot.slane %v5253_v3, %v10502_v53  ;;  %v5315_v0 = vrot.slane %v5308_v42, %v10491_v22 }
 0xb41   :  { %v5323_v12 = vrot.slane %v8934_v33, %v10491_v22  ;;  %9528 = vmatprep.mubr.msk.f32.mxu0 %vm681_vm2, %v5284_v55  ;;  %v5237_v56 = vcombine.high %v5171_v40, %v5187_v39  ;;  %v5269_v18 = vcombine.high %v5203_v8, %v5219_v29  ;;  %v5299_v43 = vrot.slane %v5292_v59, %v10491_v22 }
 0xb42   :  { %v5244_v26 = vrot.slane %v5236_v6, %v10502_v53  ;;  %v5276_v7 = vrot.slane %v5268_v51, %v10502_v53  ;;  %9529 = vmatmul.mubr.msk.f32.vlgmr.msra.gmra.mrb[28].mxu0 %vm681_vm2, %v5285_v54  ;;  %v5286_v11 = vcombine.low %v5235_v34, %v5267_v4  ;;  %v5307_v62 = vrot.slane %v8933_v52, %v10491_v22 }
 0xb43   :  { %9716 = vmatpush3.bf16.msra.mxu0 %v10770_v5  ;;  %v5287_v13 = vcombine.high %v5235_v34, %v5267_v4  ;;  %v5251_v30 = vrot.slane %v5237_v56, %v10502_v53  ;;  %v5283_v27 = vrot.slane %v5269_v18, %v10502_v53  ;;  %v5332_v38 = vcombine.low %v5315_v0, %v5323_v12 }
 0xb44   :  { %v5288_v15 = vcombine.low %v5244_v26, %v5276_v7  ;;  %9531 = vmatprep.mubr.msk.f32.mxu0 %vm681_vm2, %v5286_v11  ;;  %9726 = vmatprep.subr.bf16.mxu0 %v10438_v1  ;;  %v5289_v63 = vcombine.high %v5244_v26, %v5276_v7  ;;  %v5324_v28 = vcombine.low %v5299_v43, %v5307_v62 }
 0xb45   :  { %v5290_v50 = vcombine.low %v5251_v30, %v5283_v27  ;;  %v5339_v9 = vrot.slane %v5332_v38, %v10502_v53  ;;  %v5291_v20 = vcombine.high %v5251_v30, %v5283_v27 }
 0xb46   :  { %9532 = vmatmul.mubr.msk.f32.gmra.mrb[30].mxu0 %vm681_vm2, %v5287_v13  ;;  %v5331_v31 = vrot.slane %v5324_v28, %v10502_v53 }
 0xb47   :  { %9534 = vmatprep.mubr.msk.f32.mxu0 %vm681_vm2, %v5288_v15 }
 0xb48   :  { %v5340_v35 = vcombine.low %v5331_v31, %v5339_v9  ;;  %v5341_v44 = vcombine.high %v5331_v31, %v5339_v9 }
 0xb4a   :  { %9535 = vmatmul.mubr.msk.f32.gmra.mrb[32].mxu0 %vm681_vm2, %v5289_v63 }
 0xb4b   :  { %9537 = vmatprep.mubr.msk.f32.mxu0 %vm681_vm2, %v5290_v50 }
 0xb4e   :  { %9538 = vmatmul.mubr.msk.f32.gmra.mrb[34].mxu0 %vm681_vm2, %v5291_v20 }
 0xb4f   :  { %9540 = vmatprep.mubr.msk.f32.mxu0 %vm681_vm2, %v5340_v35 }
 0xb52   :  { %9541 = vmatmul.mubr.msk.f32.gmra.mrb[36].mxu0 %vm681_vm2, %v5341_v44 }
 0xb8a   :  { %v5563_v36 = vpop.f32.mrb[26].mxu1 }
 0xb8b   :  { %v5568_v41 = vmul.f32 2.0, %v5563_v36  ;;  %v5565_v14 = vpop.f32.mrb[27].mxu1 }
 0xb8c   :  { %v5569_v23 = vmul.f32 2.0, %v5565_v14 }
 0xb8d   :  { %v5570_v16 = vsub.f32 %v5568_v41, %v11372_v24 }
 0xb8e   :  { %v5571_v48 = vsub.f32 %v5569_v23, %v11366_v21 }
 0xb8f   :  { %5576 = vrot.lane.b32.xlu1 %v5570_v16, %s10193_s23  ;;  %5573 = vrot.lane.b32.xlu0 %v5570_v16, %s10194_s27 }
 0xb90   :  { %v5734_v4 = vcombine.high %v5571_v48, %v10195_v47  ;;  %v5741_v63 = vrot.slane %v5571_v48, %v10491_v22 }
 0xb92   :  { %v5748_v44 = vrot.slane %v5734_v4, %v10491_v22 }
 0xb93   :  { %5582 = vrot.lane.b32.xlu1 %v5570_v16, %s10201_s13  ;;  %5579 = vrot.lane.b32.xlu0 %v5570_v16, %s10202_s14 }
 0xb97   :  { %5588 = vrot.lane.b32.xlu1 %v5570_v16, %s10198_s28  ;;  %5585 = vrot.lane.b32.xlu0 %v5570_v16, %s10200_s30 }
 0xb9b   :  { %5591 = vrot.lane.b32.xlu0 %v5570_v16, %s10199_s29  ;;  %5595 = vrot.lane.b32.xlu1 %v5571_v48, %s10194_s27 }
 0xc01   :  { %v5577_v24 = vpop.permute.xlu1 %5576  ;;  %v5574_v60 = vpop.permute.xlu0 %5573 }
 0xc02   :  { %v5598_v45 = vcombine.low %v5570_v16, %v5577_v24  ;;  %v5599_v32 = vcombine.high %v5570_v16, %v5577_v24 }
 0xc04   :  { %v5606_v8 = vrot.slane %v5598_v45, %v10491_v22  ;;  %v5613_v29 = vrot.slane %v5599_v32, %v10491_v22 }
 0xc05   :  { %v5583_v37 = vpop.permute.xlu1 %5582  ;;  %v5580_v25 = vpop.permute.xlu0 %5579 }
 0xc06   :  { %v5614_v40 = vcombine.low %v5574_v60, %v5580_v25  ;;  %v5615_v39 = vcombine.high %v5574_v60, %v5580_v25 }
 0xc08   :  { %v5622_v42 = vrot.slane %v5614_v40, %v10491_v22  ;;  %v5629_v21 = vrot.slane %v5615_v39, %v10491_v22 }
 0xc09   :  { %v5589_v33 = vpop.permute.xlu1 %5588  ;;  %v5586_v19 = vpop.permute.xlu0 %5585 }
 0xc0a   :  { %v5662_v58 = vcombine.low %v5606_v8, %v5622_v42  ;;  %v5663_v34 = vcombine.high %v5606_v8, %v5622_v42  ;;  %v5678_v3 = vcombine.low %v5613_v29, %v5629_v21  ;;  %v5679_v6 = vcombine.high %v5613_v29, %v5629_v21 }
 0xc0b   :  { %v5630_v51 = vcombine.low %v5583_v37, %v5589_v33  ;;  %v5631_v26 = vcombine.high %v5583_v37, %v5589_v33 }
 0xc0c   :  { %v5670_v59 = vrot.slane %v5662_v58, %v10502_v53  ;;  %v5677_v52 = vrot.slane %v5663_v34, %v10502_v53  ;;  %v5686_v55 = vrot.slane %v5678_v3, %v10502_v53  ;;  %v5693_v54 = vrot.slane %v5679_v6, %v10502_v53 }
 0xc0d   :  { %v5592_v7 = vpop.permute.xlu0 %5591  ;;  %v5596_v0 = vpop.permute.xlu1 %5595  ;;  %v5638_v38 = vrot.slane %v5630_v51, %v10491_v22  ;;  %v5645_v28 = vrot.slane %v5631_v26, %v10491_v22 }
 0xc0e   :  { %v8946_v12 = vcombine.low %v5670_v59, %v5677_v52  ;;  %v8948_v56 = vcombine.high %v5670_v59, %v5677_v52  ;;  %v8950_v18 = vcombine.low %v5686_v55, %v5693_v54  ;;  %v8952_v11 = vcombine.high %v5686_v55, %v5693_v54 }
 0xc0f   :  { %v5646_v43 = vcombine.low %v5586_v19, %v5592_v7  ;;  %v5647_v62 = vcombine.high %v5586_v19, %v5592_v7  ;;  %v5749_v15 = vcombine.high %v5596_v0, %v10195_v47  ;;  %v5756_v13 = vrot.slane %v5596_v0, %v10491_v22 }
 0xc10   :  { %v5808_v30 = vrot.slane %v8946_v12, %v10491_v22  ;;  %v5824_v27 = vrot.slane %v8948_v56, %v10491_v22  ;;  %v5840_v20 = vrot.slane %v8950_v18, %v10491_v22  ;;  %v5856_v35 = vrot.slane %v8952_v11, %v10491_v22 }
 0xc11   :  { %v5654_v50 = vrot.slane %v5646_v43, %v10491_v22  ;;  %v5661_v9 = vrot.slane %v5647_v62, %v10491_v22  ;;  %v5763_v31 = vrot.slane %v5749_v15, %v10491_v22  ;;  %v5764_v36 = vcombine.low %v5741_v63, %v5756_v13 }
 0xc12   :  { %v5765_v48 = vcombine.high %v5741_v63, %v5756_v13  ;;  %v5864_v45 = vcombine.low %v5808_v30, %v5824_v27  ;;  %v5896_v29 = vcombine.low %v5840_v20, %v5856_v35  ;;  %v5865_v42 = vcombine.high %v5808_v30, %v5824_v27 }
 0xc13   :  { %v5694_v41 = vcombine.low %v5638_v38, %v5654_v50  ;;  %v5695_v14 = vcombine.high %v5638_v38, %v5654_v50  ;;  %v5710_v16 = vcombine.low %v5645_v28, %v5661_v9  ;;  %v5711_v23 = vcombine.high %v5645_v28, %v5661_v9 }
 0xc14   :  { %v5780_v24 = vcombine.low %v5748_v44, %v5763_v31  ;;  %v5781_v60 = vcombine.high %v5748_v44, %v5763_v31  ;;  %v5772_v34 = vrot.slane %v5764_v36, %v10502_v53  ;;  %v5779_v3 = vrot.slane %v5765_v48, %v10502_v53 }
 0xc15   :  { %v5702_v32 = vrot.slane %v5694_v41, %v10502_v53  ;;  %v5709_v37 = vrot.slane %v5695_v14, %v10502_v53  ;;  %v5718_v25 = vrot.slane %v5710_v16, %v10502_v53  ;;  %v5725_v40 = vrot.slane %v5711_v23, %v10502_v53 }
 0xc16   :  { %v5788_v39 = vrot.slane %v5780_v24, %v10502_v53  ;;  %v5795_v8 = vrot.slane %v5781_v60, %v10502_v53  ;;  %v5872_v4 = vrot.slane %v5864_v45, %v10502_v53  ;;  %v5904_v26 = vrot.slane %v5896_v29, %v10502_v53 }
 0xc17   :  { %v8947_v21 = vcombine.low %v5702_v32, %v5709_v37  ;;  %v8949_v33 = vcombine.high %v5702_v32, %v5709_v37  ;;  %v8951_v19 = vcombine.low %v5718_v25, %v5725_v40  ;;  %v8953_v58 = vcombine.high %v5718_v25, %v5725_v40  ;;  %v10185_v37 = vld [vmem:[%s11957_s5] ss:$0 sm:$0xff] }
 0xc18   :  { %v5952_v55 = vcombine.low %v5788_v39, %v5795_v8  ;;  %v8955_v54 = vcombine.high %v5788_v39, %v5795_v8  ;;  %v5879_v7 = vrot.slane %v5865_v42, %v10502_v53  ;;  %v5897_v0 = vcombine.high %v5840_v20, %v5856_v35 }
 0xc19   :  { %v5815_v6 = vrot.slane %v8947_v21, %v10491_v22  ;;  %v5831_v51 = vrot.slane %v8949_v33, %v10491_v22  ;;  %v5847_v59 = vrot.slane %v8951_v19, %v10491_v22  ;;  %v5863_v52 = vrot.slane %v8953_v58, %v10491_v22 }
 0xc1a   :  { %v5936_v18 = vcombine.low %v5772_v34, %v5779_v3  ;;  %v8954_v11 = vcombine.high %v5772_v34, %v5779_v3  ;;  %v5928_v43 = vcombine.low %v5872_v4, %v5904_v26  ;;  %v5929_v62 = vcombine.high %v5872_v4, %v5904_v26 }
 0xc1b   :  { %v5880_v12 = vcombine.low %v5815_v6, %v5831_v51  ;;  %v5912_v56 = vcombine.low %v5847_v59, %v5863_v52  ;;  %v5911_v15 = vrot.slane %v5897_v0, %v10502_v53  ;;  %v5959_v27 = vrot.slane %v5952_v55, %v10491_v22 }
 0xc1c   :  { %v5967_v38 = vrot.slane %v8955_v54, %v10491_v22  ;;  %9547 = vmatprep.mubr.msk.f32.mxu0 %vm681_vm2, %v5928_v43  ;;  %v5881_v63 = vcombine.high %v5815_v6, %v5831_v51  ;;  %v5913_v28 = vcombine.high %v5847_v59, %v5863_v52  ;;  %v5943_v9 = vrot.slane %v5936_v18, %v10491_v22  ;;  %v10186_v59 = vld [vmem:[%s11951_s1] sm:$0xf]  ;;  %v11547_v43 = vld [vmem:[%s11951_s1 + $0x4] sm:$0xf] }
 0xc1d   :  { %v5888_v13 = vrot.slane %v5880_v12, %v10502_v53  ;;  %v5920_v30 = vrot.slane %v5912_v56, %v10502_v53  ;;  %9548 = vmatmul.mubr.msk.f32.vlgmr.msra.gmra.mrb[28].mxu0 %vm681_vm2, %v5929_v62  ;;  %v5930_v50 = vcombine.low %v5879_v7, %v5911_v15  ;;  %v5951_v31 = vrot.slane %v8954_v11, %v10491_v22 }
 0xc1e   :  { %9728 = vmatpush3.bf16.msra.mxu0 %v10438_v1  ;;  %v5931_v35 = vcombine.high %v5879_v7, %v5911_v15  ;;  %v5895_v44 = vrot.slane %v5881_v63, %v10502_v53  ;;  %v5927_v36 = vrot.slane %v5913_v28, %v10502_v53  ;;  %v5976_v41 = vcombine.low %v5959_v27, %v5967_v38  ;;  %v10188_v38 = vld [vmem:[%s11958_s7] ss:$0 sm:$0xff] }
 0xc1f   :  { %v5932_v20 = vcombine.low %v5888_v13, %v5920_v30  ;;  %9550 = vmatprep.mubr.msk.f32.mxu0 %vm681_vm2, %v5930_v50  ;;  %9629 = vmatprep.subr.mxu0 %v10195_v47  ;;  %v5933_v14 = vcombine.high %v5888_v13, %v5920_v30  ;;  %v5968_v16 = vcombine.low %v5943_v9, %v5951_v31 }
 0xc20   :  { %v5934_v23 = vcombine.low %v5895_v44, %v5927_v36  ;;  %v5983_v48 = vrot.slane %v5976_v41, %v10502_v53  ;;  %v5935_v24 = vcombine.high %v5895_v44, %v5927_v36 }
 0xc21   :  { %9551 = vmatmul.mubr.msk.f32.gmra.mrb[30].mxu0 %vm681_vm2, %v5931_v35  ;;  %v5975_v1 = vrot.slane %v5968_v16, %v10502_v53 }
 0xc22   :  { %9553 = vmatprep.mubr.msk.f32.mxu0 %vm681_vm2, %v5932_v20 }
 0xc23   :  { %v5984_v60 = vcombine.low %v5975_v1, %v5983_v48  ;;  %v5985_v45 = vcombine.high %v5975_v1, %v5983_v48 }
 0xc25   :  { %9554 = vmatmul.mubr.msk.f32.gmra.mrb[32].mxu0 %vm681_vm2, %v5933_v14 }
 0xc26   :  { %9556 = vmatprep.mubr.msk.f32.mxu0 %vm681_vm2, %v5934_v23 }
 0xc29   :  { %9557 = vmatmul.mubr.msk.f32.gmra.mrb[34].mxu0 %vm681_vm2, %v5935_v24 }
 0xc2a   :  { %9559 = vmatprep.mubr.msk.f32.mxu0 %vm681_vm2, %v5984_v60 }
 0xc2d   :  { %9560 = vmatmul.mubr.msk.f32.gmra.mrb[36].mxu0 %vm681_vm2, %v5985_v45 }
 0xcf0   :  { %v9549_v32 = vpop.f32.mrb[28].mxu0 }
 0xcf1   :  { %v9795_v25 = vadd.f32 %v10185_v37, %v9549_v32  ;;  %v6082_v40 = vpop.f32.mrb[29].mxu0 }
 0xcf2   :  { %v9796_v39 = vadd.f32 %v10185_v37, %v6082_v40 }
 0xcf3   :  { %v6142_v42 = vmax.f32 %v9795_v25, 0.0 }
 0xcf4   :  { %v6141_v8 = vmax.f32 %v9796_v39, 0.0  ;;  %v9552_v29 = vpop.f32.mrb[30].mxu0 }
 0xcf5   :  { %v9797_v21 = vadd.f32 %v10185_v37, %v9552_v29  ;;  %v6092_v33 = vpop.f32.mrb[31].mxu0 }
 0xcf6   :  { %v9798_v19 = vadd.f32 %v10185_v37, %v6092_v33  ;;  %9566 = vmatprep.mubr.msk.f32.mxu1 %vm681_vm2, %v6141_v8 }
 0xcf7   :  { %9567 = vmatmul.mubr.msk.f32.vlgmr.msra.gmra.mrb[28].mxu1 %vm681_vm2, %v6142_v42  ;;  %v6144_v3 = vmax.f32 %v9797_v21, 0.0 }
 0xcf8   :  { %v6143_v58 = vmax.f32 %v9798_v19, 0.0  ;;  %v9555_v34 = vpop.f32.mrb[32].mxu0  ;;  %9724 = vmatpush3.bf16.msra.mxu1 %v10888_v46 }
 0xcf9   :  { %v9799_v6 = vadd.f32 %v10185_v37, %v9555_v34  ;;  %v6102_v51 = vpop.f32.mrb[33].mxu0  ;;  %9594 = vmatprep.subr.msk.mxu1 %vm120_vm0, %v10186_v59 }
 0xcfa   :  { %v9800_v52 = vadd.f32 %v10185_v37, %v6102_v51  ;;  %9569 = vmatprep.mubr.msk.f32.mxu1 %vm681_vm2, %v6143_v58 }
 0xcfb   :  { %9570 = vmatmul.mubr.msk.f32.gmra.mrb[30].mxu1 %vm681_vm2, %v6144_v3  ;;  %v6146_v4 = vmax.f32 %v9799_v6, 0.0 }
 0xcfc   :  { %v6145_v55 = vmax.f32 %v9800_v52, 0.0  ;;  %v9558_v54 = vpop.f32.mrb[34].mxu0 }
 0xcfd   :  { %v9801_v26 = vadd.f32 %v10185_v37, %v9558_v54  ;;  %v6112_v7 = vpop.f32.mrb[35].mxu0 }
 0xcfe   :  { %v9802_v0 = vadd.f32 %v10185_v37, %v6112_v7  ;;  %9572 = vmatprep.mubr.msk.f32.mxu1 %vm681_vm2, %v6145_v55 }
 0xcff   :  { %9573 = vmatmul.mubr.msk.f32.gmra.mrb[32].mxu1 %vm681_vm2, %v6146_v4  ;;  %v6148_v18 = vmax.f32 %v9801_v26, 0.0 }
 0xd00   :  { %v6147_v12 = vmax.f32 %v9802_v0, 0.0  ;;  %v9561_v56 = vpop.f32.mrb[36].mxu0 }
 0xd01   :  { %v6122_v11 = vpop.f32.mrb[37].mxu0  ;;  %v9803_v15 = vadd.f32 %v10185_v37, %v9561_v56 }
 0xd02   :  { %9575 = vmatprep.mubr.msk.f32.mxu1 %vm681_vm2, %v6147_v12  ;;  %v9804_v62 = vadd.f32 %v10185_v37, %v6122_v11 }
 0xd03   :  { %9576 = vmatmul.mubr.msk.f32.gmra.mrb[34].mxu1 %vm681_vm2, %v6148_v18  ;;  %v6150_v30 = vmax.f32 %v9803_v15, 0.0 }
 0xd04   :  { %9582 = vmatprep.mubr.msk.f32.mxu1 %vm681_vm2, %v6143_v58  ;;  %v6149_v13 = vmax.f32 %v9804_v62, 0.0 }
 0xd07   :  { %9583 = vmatmul.mubr.msk.f32.vlgmr.msra.gmra.mrb[28].mxu1 %vm681_vm2, %v6144_v3 }
 0xd08   :  { %9585 = vmatprep.mubr.msk.f32.mxu1 %vm681_vm2, %v6145_v55  ;;  %9595 = vmatpush3.msk.msra.mxu1 %vm120_vm0, %v10186_v59 }
 0xd09   :  { %9605 = vmatprep.subr.msk.mxu1 %vm120_vm0, %v11547_v43 }
 0xd0b   :  { %9586 = vmatmul.mubr.msk.f32.gmra.mrb[30].mxu1 %vm681_vm2, %v6146_v4 }
 0xd0c   :  { %9588 = vmatprep.mubr.msk.f32.mxu1 %vm681_vm2, %v6147_v12 }
 0xd0f   :  { %9589 = vmatmul.mubr.msk.f32.gmra.mrb[32].mxu1 %vm681_vm2, %v6148_v18 }
 0xd10   :  { %9591 = vmatprep.mubr.msk.f32.mxu1 %vm681_vm2, %v6149_v13 }
 0xd13   :  { %9592 = vmatmul.mubr.msk.f32.gmra.mrb[34].mxu1 %vm681_vm2, %v6150_v30 }
 0xdda   :  { %v9584_v27 = vpop.f32.mrb[28].mxu1 }
 0xddb   :  { %v11559_v63 = vadd.f32 %v10188_v38, %v9584_v27  ;;  %v6360_v28 = vpop.f32.mrb[29].mxu1 }
 0xddc   :  { %v11561_v50 = vadd.f32 %v10188_v38, %v6360_v28 }
 0xddd   :  { %v8983_v9 = vmul.f32 -1.442695, %v11559_v63  ;;  %6505 = vrot.lane.b32.xlu0 %v11559_v63, %s10203_s4 }
 0xdde   :  { %v8982_v31 = vmul.f32 -1.442695, %v11561_v50  ;;  %6503 = vrot.lane.b32.xlu1 %v11561_v50, %s10203_s4  ;;  %v9587_v20 = vpop.f32.mrb[30].mxu1 }
 0xddf   :  { %10105 = vpow2.f32 %v8983_v9  ;;  %v11569_v35 = vadd.f32 %v10188_v38, %v9587_v20  ;;  %v6370_v44 = vpop.f32.mrb[31].mxu1 }
 0xde0   :  { %10107 = vpow2.f32 %v8982_v31  ;;  %v11571_v36 = vadd.f32 %v10188_v38, %v6370_v44 }
 0xde1   :  { %v8985_v41 = vmul.f32 -1.442695, %v11569_v35  ;;  %6509 = vrot.lane.b32.xlu0 %v11569_v35, %s10203_s4 }
 0xde2   :  { %v8984_v14 = vmul.f32 -1.442695, %v11571_v36  ;;  %v9590_v16 = vpop.f32.mrb[32].mxu1 }
 0xde3   :  { %10109 = vpow2.f32 %v8985_v41  ;;  %v11577_v23 = vadd.f32 %v10188_v38, %v9590_v16  ;;  %v6380_v48 = vpop.f32.mrb[33].mxu1 }
 0xde4   :  { %10111 = vpow2.f32 %v8984_v14  ;;  %v11579_v1 = vadd.f32 %v10188_v38, %v6380_v48 }
 0xde5   :  { %v8987_v24 = vmul.f32 -1.442695, %v11577_v23  ;;  %6507 = vrot.lane.b32.xlu0 %v11571_v36, %s10203_s4 }
 0xde6   :  { %v8986_v60 = vmul.f32 -1.442695, %v11579_v1  ;;  %v9593_v45 = vpop.f32.mrb[34].mxu1 }
 0xde7   :  { %10113 = vpow2.f32 %v8987_v24  ;;  %v11585_v32 = vadd.f32 %v10188_v38, %v9593_v45  ;;  %v6390_v37 = vpop.f32.mrb[35].mxu1 }
 0xde8   :  { %10115 = vpow2.f32 %v8986_v60  ;;  %v11587_v25 = vadd.f32 %v10188_v38, %v6390_v37 }
 0xde9   :  { %v10106_v40 = vpop.eup %10105  ;;  %v8989_v39 = vmul.f32 -1.442695, %v11585_v32 }
 0xdea   :  { %v10108_v8 = vpop.eup %10107  ;;  %v6432_v29 = vadd.f32 1.0, %v10106_v40  ;;  %v8988_v21 = vmul.f32 -1.442695, %v11587_v25 }
 0xdeb   :  { %v6431_v42 = vadd.f32 1.0, %v10108_v8  ;;  %10117 = vpow2.f32 %v8989_v39 }
 0xdec   :  { %10119 = vrcp.f32 %v6432_v29 }
 0xded   :  { %v10110_v33 = vpop.eup %10109  ;;  %10121 = vrcp.f32 %v6431_v42 }
 0xdee   :  { %v10112_v19 = vpop.eup %10111  ;;  %v6434_v58 = vadd.f32 1.0, %v10110_v33  ;;  %10123 = vpow2.f32 %v8988_v21 }
 0xdef   :  { %v6433_v34 = vadd.f32 1.0, %v10112_v19 }
 0xdf0   :  { %10125 = vrcp.f32 %v6434_v58 }
 0xdf1   :  { %v10114_v3 = vpop.eup %10113  ;;  %10127 = vrcp.f32 %v6433_v34 }
 0xdf2   :  { %v10116_v6 = vpop.eup %10115  ;;  %v6436_v51 = vadd.f32 1.0, %v10114_v3 }
 0xdf3   :  { %v6435_v59 = vadd.f32 1.0, %v10116_v6 }
 0xdf4   :  { %10129 = vrcp.f32 %v6436_v51 }
 0xdf5   :  { %v10118_v52 = vpop.eup %10117  ;;  %10131 = vrcp.f32 %v6435_v59 }
 0xdf6   :  { %v10120_v55 = vpop.eup %10119  ;;  %v6438_v4 = vadd.f32 1.0, %v10118_v52 }
 0xdf7   :  { %v10122_v54 = vpop.eup %10121  ;;  %6465 = vrot.lane.b32.xlu1 %v10120_v55, %s10204_s15 }
 0xdf8   :  { %6463 = vrot.lane.b32.xlu0 %v10122_v54, %s10204_s15  ;;  %v10124_v26 = vpop.eup %10123  ;;  %10133 = vrcp.f32 %v6438_v4 }
 0xdf9   :  { %v6437_v12 = vadd.f32 1.0, %v10124_v26 }
 0xdfa   :  { %v10126_v7 = vpop.eup %10125 }
 0xdfb   :  { %v10128_v0 = vpop.eup %10127  ;;  %6469 = vrot.lane.b32.xlu1 %v10126_v7, %s10204_s15  ;;  %10135 = vrcp.f32 %v6437_v12 }
 0xdfc   :  { %6467 = vrot.lane.b32.xlu0 %v10128_v0, %s10204_s15 }
 0xdfe   :  { %v10130_v56 = vpop.eup %10129 }
 0xdff   :  { %6473 = vrot.lane.b32.xlu1 %v10130_v56, %s10204_s15  ;;  %v10132_v18 = vpop.eup %10131 }
 0xe00   :  { %6511 = vrot.lane.b32.xlu0 %v11579_v1, %s10203_s4 }
 0xe02   :  { %v10134_v11 = vpop.eup %10133 }
 0xe03   :  { %6471 = vrot.lane.b32.xlu1 %v10132_v18, %s10204_s15 }
 0xe04   :  { %6513 = vrot.lane.b32.xlu0 %v11577_v23, %s10203_s4 }
 0xe05   :  { %v10136_v62 = vpop.eup %10135 }
 0xe07   :  { %6477 = vrot.lane.b32.xlu1 %v10134_v11, %s10204_s15 }
 0xe08   :  { %6515 = vrot.lane.b32.xlu0 %v11587_v25, %s10203_s4 }
 0xe0b   :  { %6475 = vrot.lane.b32.xlu1 %v10136_v62, %s10204_s15 }
 0xe0f   :  { %6517 = vrot.lane.b32.xlu1 %v11585_v32, %s10203_s4 }
 0xe4f   :  { %v6506_v15 = vpop.permute.xlu0 %6505 }
 0xe50   :  { %v6504_v30 = vpop.permute.xlu1 %6503 }
 0xe53   :  { %v6510_v13 = vpop.permute.xlu0 %6509 }
 0xe57   :  { %v6508_v27 = vpop.permute.xlu0 %6507 }
 0xe69   :  { %v6466_v38 = vpop.permute.xlu1 %6465 }
 0xe6a   :  { %v6488_v28 = vmul.f32 %v11559_v63, %v6466_v38  ;;  %v6464_v9 = vpop.permute.xlu0 %6463 }
 0xe6b   :  { %v6487_v31 = vmul.f32 %v11561_v50, %v6464_v9 }
 0xe6c   :  { %v6528_v20 = vadd.f32 %v6506_v15, %v6488_v28 }
 0xe6d   :  { %v6527_v44 = vadd.f32 %v6504_v30, %v6487_v31  ;;  %v6470_v41 = vpop.permute.xlu1 %6469 }
 0xe6e   :  { %v11609_v14 = vmax.f32 %v6528_v20, 0.0  ;;  %v6490_v16 = vmul.f32 %v11569_v35, %v6470_v41  ;;  %v6468_v48 = vpop.permute.xlu0 %6467 }
 0xe6f   :  { %v11612_v24 = vmax.f32 %v6527_v44, 0.0  ;;  %v6489_v60 = vmul.f32 %v11571_v36, %v6468_v48 }
 0xe70   :  { %v6530_v45 = vadd.f32 %v6510_v13, %v6490_v16  ;;  %v6546_v37 = vsel %vm77_vm1, %v11609_v14, 0.0  ;;  %v6575_v63 = vmul.f32 %v11609_v14, %v11609_v14 }
 0xe71   :  { %v6529_v50 = vadd.f32 %v6508_v27, %v6489_v60  ;;  %v6474_v40 = vpop.permute.xlu1 %6473  ;;  %6547 = vadd.xlane.f32.xlu1 %v6546_v37  ;;  %v6543_v39 = vsel %vm77_vm1, %v11612_v24, 0.0  ;;  %v6574_v35 = vmul.f32 %v11612_v24, %v11612_v24 }
 0xe72   :  { %v11623_v8 = vmax.f32 %v6530_v45, 0.0  ;;  %v6512_v29 = vpop.permute.xlu0 %6511  ;;  %6544 = vadd.xlane.f32.xlu0 %v6543_v39  ;;  %v6585_v42 = vsel %vm77_vm1, %v6575_v63, 0.0  ;;  %v6492_v33 = vmul.f32 %v11577_v23, %v6474_v40 }
 0xe73   :  { %v11625_v36 = vmax.f32 %v6529_v50, 0.0  ;;  %v6582_v58 = vsel %vm77_vm1, %v6574_v35, 0.0 }
 0xe74   :  { %v6577_v21 = vmul.f32 %v11623_v8, %v11623_v8  ;;  %v6552_v23 = vsel %vm77_vm1, %v11623_v8, 0.0 }
 0xe75   :  { %v6472_v19 = vpop.permute.xlu1 %6471  ;;  %6586 = vadd.xlane.f32.xlu1 %v6585_v42  ;;  %v6576_v52 = vmul.f32 %v11625_v36, %v11625_v36  ;;  %v6549_v0 = vsel %vm77_vm1, %v11625_v36, 0.0 }
 0xe76   :  { %v6491_v34 = vmul.f32 %v11579_v1, %v6472_v19  ;;  %v6514_v3 = vpop.permute.xlu0 %6513  ;;  %6583 = vadd.xlane.f32.xlu0 %v6582_v58  ;;  %v6591_v59 = vsel %vm77_vm1, %v6577_v21, 0.0 }
 0xe77   :  { %v6532_v6 = vadd.f32 %v6514_v3, %v6492_v33  ;;  %v6588_v1 = vsel %vm77_vm1, %v6576_v52, 0.0 }
 0xe78   :  { %v6531_v51 = vadd.f32 %v6512_v29, %v6491_v34 }
 0xe79   :  { %v11636_v55 = vmax.f32 %v6532_v6, 0.0  ;;  %v6478_v54 = vpop.permute.xlu1 %6477  ;;  %6592 = vadd.xlane.f32.xlu1 %v6591_v59 }
 0xe7a   :  { %6553 = vadd.xlane.f32.xlu0 %v6552_v23  ;;  %v11640_v4 = vmax.f32 %v6531_v51, 0.0  ;;  %v6516_v56 = vpop.permute.xlu0 %6515  ;;  %v6494_v18 = vmul.f32 %v11585_v32, %v6478_v54 }
 0xe7b   :  { %v6579_v26 = vmul.f32 %v11636_v55, %v11636_v55  ;;  %v6558_v30 = vsel %vm77_vm1, %v11636_v55, 0.0 }
 0xe7c   :  { %v6578_v15 = vmul.f32 %v11640_v4, %v11640_v4  ;;  %v6555_v9 = vsel %vm77_vm1, %v11640_v4, 0.0 }
 0xe7d   :  { %6589 = vadd.xlane.f32.xlu1 %v6588_v1  ;;  %v6476_v7 = vpop.permute.xlu1 %6475  ;;  %v6597_v62 = vsel %vm77_vm1, %v6579_v26, 0.0 }
 0xe7e   :  { %v6493_v12 = vmul.f32 %v11587_v25, %v6476_v7  ;;  %6550 = vadd.xlane.f32.xlu0 %v6549_v0  ;;  %v6594_v25 = vsel %vm77_vm1, %v6578_v15, 0.0 }
 0xe80   :  { %v6533_v11 = vadd.f32 %v6516_v56, %v6493_v12 }
 0xe81   :  { %6598 = vadd.xlane.f32.xlu1 %v6597_v62  ;;  %v6518_v13 = vpop.permute.xlu1 %6517 }
 0xe82   :  { %v11654_v27 = vmax.f32 %v6533_v11, 0.0  ;;  %v6534_v38 = vadd.f32 %v6518_v13, %v6494_v18  ;;  %6559 = vadd.xlane.f32.xlu0 %v6558_v30 }
 0xe84   :  { %v6580_v32 = vmul.f32 %v11654_v27, %v11654_v27  ;;  %v11659_v28 = vmax.f32 %v6534_v38, 0.0  ;;  %v6561_v44 = vsel %vm77_vm1, %v11654_v27, 0.0 }
 0xe85   :  { %6595 = vadd.xlane.f32.xlu1 %v6594_v25 }
 0xe86   :  { %6556 = vadd.xlane.f32.xlu0 %v6555_v9  ;;  %v6600_v31 = vsel %vm77_vm1, %v6580_v32, 0.0  ;;  %v6564_v20 = vsel %vm77_vm1, %v11659_v28, 0.0  ;;  %v6581_v41 = vmul.f32 %v11659_v28, %v11659_v28 }
 0xe88   :  { %v6603_v16 = vsel %vm77_vm1, %v6581_v41, 0.0 }
 0xe89   :  { %6601 = vadd.xlane.f32.xlu1 %v6600_v31 }
 0xe8a   :  { %6565 = vadd.xlane.f32.xlu0 %v6564_v20 }
 0xe8e   :  { %6562 = vadd.xlane.f32.xlu0 %v6561_v44 }
 0xe92   :  { %6604 = vadd.xlane.f32.xlu0 %v6603_v16 }
 0xefe   :  { %v6548_v48 = vpop.xlane.xlu1 %6547 }
 0xeff   :  { %v6545_v60 = vpop.xlane.xlu0 %6544 }
 0xf00   :  { %v6567_v35 = vadd.f32 %v6548_v48, %v6545_v60 }
 0xf02   :  { %v6587_v45 = vpop.xlane.xlu1 %6586 }
 0xf03   :  { %v6584_v37 = vpop.xlane.xlu0 %6583 }
 0xf04   :  { %v6606_v29 = vadd.f32 %v6587_v45, %v6584_v37 }
 0xf06   :  { %v6593_v63 = vpop.xlane.xlu1 %6592 }
 0xf07   :  { %v6554_v50 = vpop.xlane.xlu0 %6553 }
 0xf0a   :  { %v6590_v40 = vpop.xlane.xlu1 %6589 }
 0xf0b   :  { %v6551_v39 = vpop.xlane.xlu0 %6550  ;;  %v6607_v33 = vadd.f32 %v6606_v29, %v6590_v40 }
 0xf0c   :  { %v6568_v19 = vadd.f32 %v6567_v35, %v6551_v39 }
 0xf0d   :  { %v6608_v3 = vadd.f32 %v6607_v33, %v6593_v63 }
 0xf0e   :  { %v6599_v42 = vpop.xlane.xlu1 %6598  ;;  %v6569_v6 = vadd.f32 %v6568_v19, %v6554_v50 }
 0xf0f   :  { %v6560_v21 = vpop.xlane.xlu0 %6559 }
 0xf12   :  { %v6596_v58 = vpop.xlane.xlu1 %6595 }
 0xf13   :  { %v6557_v34 = vpop.xlane.xlu0 %6556  ;;  %v6609_v51 = vadd.f32 %v6608_v3, %v6596_v58 }
 0xf14   :  { %v6570_v59 = vadd.f32 %v6569_v6, %v6557_v34 }
 0xf15   :  { %v6610_v54 = vadd.f32 %v6609_v51, %v6599_v42 }
 0xf16   :  { %v6571_v23 = vadd.f32 %v6570_v59, %v6560_v21  ;;  %v6602_v1 = vpop.xlane.xlu1 %6601 }
 0xf17   :  { %v6566_v52 = vpop.xlane.xlu0 %6565  ;;  %v6611_v0 = vadd.f32 %v6610_v54, %v6602_v1 }
 0xf1b   :  { %v6563_v26 = vpop.xlane.xlu0 %6562 }
 0xf1c   :  { %v6572_v7 = vadd.f32 %v6571_v23, %v6563_v26 }
 0xf1e   :  { %v6573_v12 = vadd.f32 %v6572_v7, %v6566_v52  ;;  %v10189_v7 = vld [vmem:[%s11953_s2] ss:$0 sm:$0xff] }
 0xf1f   :  { %v6605_v56 = vpop.xlane.xlu0 %6604 }
 0xf20   :  { %v6613_v18 = vmul.f32 0.03125, %v6573_v12  ;;  %v6612_v11 = vadd.f32 %v6611_v0, %v6605_v56 }
 0xf22   :  { %v6614_v62 = vmul.f32 0.03125, %v6612_v11  ;;  %v6615_v15 = vmul.f32 %v6613_v18, %v6613_v18  ;;  %v6618_v25 = vsub.f32 %v11612_v24, %v6613_v18  ;;  %v6619_v32 = vsub.f32 %v11609_v14, %v6613_v18 }
 0xf23   :  { %v6620_v9 = vsub.f32 %v11625_v36, %v6613_v18  ;;  %v6621_v31 = vsub.f32 %v11623_v8, %v6613_v18  ;;  %v6622_v44 = vsub.f32 %v11640_v4, %v6613_v18  ;;  %v6623_v37 = vsub.f32 %v11636_v55, %v6613_v18 }
 0xf24   :  { %v6616_v13 = vsub.f32 %v6614_v62, %v6615_v15  ;;  %v6624_v19 = vsub.f32 %v11654_v27, %v6613_v18  ;;  %v6625_v51 = vsub.f32 %v11659_v28, %v6613_v18 }
 0xf26   :  { %v6617_v30 = vmax.f32 %v6616_v13, 0.0 }
 0xf28   :  { %v6626_v38 = vadd.f32 1e-05, %v6617_v30 }
 0xf2a   :  { %10137 = vrsqrt.f32 %v6626_v38 }
 0xf34   :  { %v10138_v20 = vpop.eup %10137 }
 0xf35   :  { %v6628_v41 = vmul.f32 %v10138_v20, %v6618_v25  ;;  %v6629_v16 = vmul.f32 %v10138_v20, %v6619_v32  ;;  %v6630_v48 = vmul.f32 %v10138_v20, %v6620_v9  ;;  %v6631_v60 = vmul.f32 %v10138_v20, %v6621_v31 }
 0xf36   :  { %v6632_v45 = vmul.f32 %v10138_v20, %v6622_v44  ;;  %v6633_v50 = vmul.f32 %v10138_v20, %v6623_v37  ;;  %v6634_v6 = vmul.f32 %v10138_v20, %v6624_v19  ;;  %v6635_v52 = vmul.f32 %v10138_v20, %v6625_v51 }
 0xf37   :  { %v6636_v63 = vmul.f32 %v6628_v41, %v11142_v57  ;;  %v6637_v24 = vmul.f32 %v6629_v16, %v11142_v57  ;;  %v6638_v14 = vmul.f32 %v6630_v48, %v11142_v57  ;;  %v6639_v36 = vmul.f32 %v6631_v60, %v11142_v57 }
 0xf38   :  { %v6640_v39 = vmul.f32 %v6632_v45, %v11142_v57  ;;  %v6641_v42 = vmul.f32 %v6633_v50, %v11142_v57  ;;  %v6642_v54 = vmul.f32 %v6634_v6, %v11142_v57 }
 0xf39   :  { %v6644_v8 = vadd.f32 %v6636_v63, %v11150_v49  ;;  %v6645_v4 = vadd.f32 %v6637_v24, %v11150_v49  ;;  %v6646_v40 = vadd.f32 %v6638_v14, %v11150_v49  ;;  %v6647_v55 = vadd.f32 %v6639_v36, %v11150_v49 }
 0xf3a   :  { %v6648_v33 = vadd.f32 %v6640_v39, %v11150_v49  ;;  %v6649_v34 = vadd.f32 %v6641_v42, %v11150_v49  ;;  %v6650_v27 = vadd.f32 %v6642_v54, %v11150_v49 }
 0xf3b   :  { %v6652_v35 = vmax.f32 %v6644_v8, 0.0  ;;  %v6653_v29 = vmax.f32 %v6645_v4, 0.0  ;;  %v6654_v21 = vmax.f32 %v6646_v40, 0.0  ;;  %v6655_v58 = vmax.f32 %v6647_v55, 0.0 }
 0xf3c   :  { %v6656_v3 = vmax.f32 %v6648_v33, 0.0  ;;  %v6657_v59 = vmax.f32 %v6649_v34, 0.0  ;;  %v6658_v23 = vmax.f32 %v6650_v27, 0.0 }
 0xf3d   :  { %9596 = vmatprep.mubr.msk.f32.mxu1 %vm77_vm1, %v6652_v35 }
 0xf3e   :  { %9597 = vmatmul.mubr.msk.f32.vlgmr.msra.gmra.mrb[36].mxu1 %vm77_vm1, %v6653_v29 }
 0xf3f   :  { %9599 = vmatprep.mubr.msk.f32.mxu1 %vm77_vm1, %v6654_v21  ;;  %9606 = vmatpush3.msk.msra.mxu1 %vm120_vm0, %v11547_v43  ;;  %v6643_v43 = vmul.f32 %v6635_v52, %v11142_v57 }
 0xf40   :  { %9647 = vmatprep.subr.mxu1 %v10195_v47 }
 0xf41   :  { %v6651_v28 = vadd.f32 %v6643_v43, %v11150_v49 }
 0xf42   :  { %9600 = vmatmul.mubr.msk.f32.gmra.mrb[38].mxu1 %vm77_vm1, %v6655_v58 }
 0xf43   :  { %9602 = vmatprep.mubr.msk.f32.mxu1 %vm77_vm1, %v6656_v3  ;;  %v6659_v1 = vmax.f32 %v6651_v28, 0.0 }
 0xf46   :  { %9603 = vmatmul.mubr.msk.f32.gmra.mrb[40].mxu1 %vm77_vm1, %v6657_v59 }
 0xf47   :  { %9607 = vmatprep.mubr.msk.f32.mxu1 %vm77_vm1, %v6654_v21 }
 0xf4a   :  { %9608 = vmatmul.mubr.msk.f32.vlgmr.msra.gmra.mrb[36].mxu1 %vm77_vm1, %v6655_v58 }
 0xf4b   :  { %9610 = vmatprep.mubr.msk.f32.mxu1 %vm77_vm1, %v6656_v3 }
 0xf4e   :  { %9611 = vmatmul.mubr.msk.f32.gmra.mrb[38].mxu1 %vm77_vm1, %v6657_v59 }
 0xf4f   :  { %9613 = vmatprep.mubr.msk.f32.mxu1 %vm77_vm1, %v6658_v23 }
 0xf52   :  { %9614 = vmatmul.mubr.msk.f32.gmra.mrb[40].mxu1 %vm77_vm1, %v6659_v1 }
 0xf53   :  { %9649 = vmatprep.mubr.msk.f32.mxu1 %vm10206_vm10, %v10195_v47 }
0x101d   :  { %v9609_v26 = vpop.f32.mrb[36].mxu1 }
0x101e   :  { %v11713_v0 = vadd.f32 %v10189_v7, %v9609_v26  ;;  %v6851_v12 = vpop.f32.mrb[37].mxu1 }
0x101f   :  { %v11715_v56 = vadd.f32 %v10189_v7, %v6851_v12 }
0x1020   :  { %v9005_v18 = vmul.f32 -1.442695, %v11713_v0  ;;  %6960 = vrot.lane.b32.xlu1 %v11713_v0, %s10193_s23 }
0x1021   :  { %v9004_v11 = vmul.f32 -1.442695, %v11715_v56  ;;  %6958 = vrot.lane.b32.xlu0 %v11715_v56, %s10193_s23  ;;  %v9612_v62 = vpop.f32.mrb[38].mxu1 }
0x1022   :  { %10139 = vpow2.f32 %v9005_v18  ;;  %v9815_v15 = vadd.f32 %v10189_v7, %v9612_v62  ;;  %v6861_v13 = vpop.f32.mrb[39].mxu1 }
0x1023   :  { %10141 = vpow2.f32 %v9004_v11  ;;  %v11723_v30 = vadd.f32 %v10189_v7, %v6861_v13 }
0x1024   :  { %v9007_v38 = vmul.f32 -1.442695, %v9815_v15  ;;  %6964 = vrot.lane.b32.xlu1 %v9815_v15, %s10193_s23 }
0x1025   :  { %v9006_v25 = vmul.f32 -1.442695, %v11723_v30  ;;  %6962 = vrot.lane.b32.xlu0 %v11723_v30, %s10193_s23  ;;  %v9615_v32 = vpop.f32.mrb[40].mxu1 }
0x1026   :  { %10143 = vpow2.f32 %v9007_v38  ;;  %v11729_v9 = vadd.f32 %v10189_v7, %v9615_v32  ;;  %v6871_v31 = vpop.f32.mrb[41].mxu1 }
0x1027   :  { %10145 = vpow2.f32 %v9006_v25  ;;  %v9818_v20 = vadd.f32 %v10189_v7, %v6871_v31 }
0x1028   :  { %v9009_v44 = vmul.f32 -1.442695, %v11729_v9 }
0x1029   :  { %v9008_v41 = vmul.f32 -1.442695, %v9818_v20 }
0x102a   :  { %10147 = vpow2.f32 %v9009_v44 }
0x102b   :  { %10149 = vpow2.f32 %v9008_v41 }
0x102c   :  { %v10140_v16 = vpop.eup %10139 }
0x102d   :  { %v10142_v48 = vpop.eup %10141  ;;  %v6905_v60 = vadd.f32 1.0, %v10140_v16 }
0x102e   :  { %v6904_v45 = vadd.f32 1.0, %v10142_v48 }
0x102f   :  { %10151 = vrcp.f32 %v6905_v60 }
0x1030   :  { %v10144_v37 = vpop.eup %10143  ;;  %10153 = vrcp.f32 %v6904_v45 }
0x1031   :  { %v10146_v63 = vpop.eup %10145  ;;  %v6907_v24 = vadd.f32 1.0, %v10144_v37 }
0x1032   :  { %v6906_v14 = vadd.f32 1.0, %v10146_v63 }
0x1033   :  { %10155 = vrcp.f32 %v6907_v24 }
0x1034   :  { %v10148_v36 = vpop.eup %10147  ;;  %10157 = vrcp.f32 %v6906_v14 }
0x1035   :  { %v10150_v50 = vpop.eup %10149  ;;  %v6909_v4 = vadd.f32 1.0, %v10148_v36 }
0x1036   :  { %v6908_v8 = vadd.f32 1.0, %v10150_v50 }
0x1038   :  { %10159 = vrcp.f32 %v6908_v8 }
0x1039   :  { %v10152_v40 = vpop.eup %10151  ;;  %10161 = vrcp.f32 %v6909_v4 }
0x103a   :  { %v10154_v39 = vpop.eup %10153  ;;  %6930 = vrot.lane.b32.xlu0 %v10152_v40, %s10194_s27 }
0x103b   :  { %6928 = vrot.lane.b32.xlu1 %v10154_v39, %s10194_s27 }
0x103d   :  { %v10156_v35 = vpop.eup %10155 }
0x103e   :  { %v10158_v29 = vpop.eup %10157 }
0x103f   :  { %6934 = vrot.lane.b32.xlu1 %v10156_v35, %s10194_s27 }
0x1042   :  { %v10160_v55 = vpop.eup %10159 }
0x1043   :  { %6932 = vrot.lane.b32.xlu1 %v10158_v29, %s10194_s27  ;;  %6936 = vrot.lane.b32.xlu0 %v10160_v55, %s10194_s27  ;;  %v10162_v42 = vpop.eup %10161 }
0x1047   :  { %6938 = vrot.lane.b32.xlu1 %v10162_v42, %s10194_s27  ;;  %6966 = vrot.lane.b32.xlu0 %v9818_v20, %s10193_s23 }
0x104b   :  { %6968 = vrot.lane.b32.xlu1 %v11729_v9, %s10193_s23 }
0x1092   :  { %v6961_v33 = vpop.permute.xlu1 %6960 }
0x1093   :  { %v6959_v21 = vpop.permute.xlu0 %6958 }
0x1096   :  { %v6965_v58 = vpop.permute.xlu1 %6964 }
0x1097   :  { %v6963_v19 = vpop.permute.xlu0 %6962 }
0x10ac   :  { %v6931_v34 = vpop.permute.xlu0 %6930 }
0x10ad   :  { %v6947_v3 = vmul.f32 %v11713_v0, %v6931_v34  ;;  %v6929_v6 = vpop.permute.xlu1 %6928 }
0x10ae   :  { %v6946_v51 = vmul.f32 %v11715_v56, %v6929_v6 }
0x10af   :  { %v6977_v59 = vadd.f32 %v6961_v33, %v6947_v3 }
0x10b0   :  { %v6976_v52 = vadd.f32 %v6959_v21, %v6946_v51 }
0x10b1   :  { %v6935_v54 = vpop.permute.xlu1 %6934  ;;  %v6983_v28 = vmax.f32 %v6977_v59, 0.0 }
0x10b2   :  { %v6982_v43 = vmax.f32 %v6976_v52, 0.0  ;;  %v6949_v27 = vmul.f32 %v9815_v15, %v6935_v54 }
0x10b4   :  { %v6979_v23 = vadd.f32 %v6965_v58, %v6949_v27  ;;  %9620 = vmatprep.mubr.msk.f32.mxu0 %vm681_vm2, %v6982_v43 }
0x10b5   :  { %9621 = vmatmul.mubr.msk.f32.vlgmr.msra.gmra.mrb[40].mxu0 %vm681_vm2, %v6983_v28  ;;  %v6933_v1 = vpop.permute.xlu1 %6932  ;;  %v6937_v26 = vpop.permute.xlu0 %6936 }
0x10b6   :  { %v6985_v7 = vmax.f32 %v6979_v23, 0.0  ;;  %v6948_v12 = vmul.f32 %v11723_v30, %v6933_v1  ;;  %v6950_v11 = vmul.f32 %v9818_v20, %v6937_v26 }
0x10b8   :  { %v6978_v0 = vadd.f32 %v6963_v19, %v6948_v12  ;;  %v7117_v18 = vcombine.low %v6983_v28, %v6985_v7  ;;  %v7118_v13 = vcombine.high %v6983_v28, %v6985_v7 }
0x10b9   :  { %v6939_v56 = vpop.permute.xlu1 %6938  ;;  %v6967_v62 = vpop.permute.xlu0 %6966 }
0x10ba   :  { %v6984_v38 = vmax.f32 %v6978_v0, 0.0  ;;  %v6980_v25 = vadd.f32 %v6967_v62, %v6950_v11  ;;  %v6951_v31 = vmul.f32 %v11729_v9, %v6939_v56  ;;  %v7125_v44 = vrot.slane %v7117_v18, %v10491_v22 }
0x10bb   :  { %v7132_v16 = vrot.slane %v7118_v13, %v10491_v22 }
0x10bc   :  { %v7101_v15 = vcombine.low %v6982_v43, %v6984_v38  ;;  %v7102_v32 = vcombine.high %v6982_v43, %v6984_v38  ;;  %9623 = vmatprep.mubr.msk.f32.mxu0 %vm681_vm2, %v6984_v38  ;;  %v6986_v41 = vmax.f32 %v6980_v25, 0.0 }
0x10bd   :  { %9624 = vmatmul.mubr.msk.f32.gmra.mrb[42].mxu0 %vm681_vm2, %v6985_v7  ;;  %v6969_v30 = vpop.permute.xlu1 %6968 }
0x10be   :  { %v7109_v20 = vrot.slane %v7101_v15, %v10491_v22  ;;  %v7116_v48 = vrot.slane %v7102_v32, %v10491_v22  ;;  %v6981_v60 = vadd.f32 %v6969_v30, %v6951_v31  ;;  %9626 = vmatprep.mubr.msk.f32.mxu0 %vm681_vm2, %v6986_v41  ;;  %v7133_v24 = vcombine.high %v6986_v41, %v10195_v47 }
0x10bf   :  { %v7140_v40 = vrot.slane %v6986_v41, %v10491_v22 }
0x10c0   :  { %v7163_v45 = vcombine.low %v7109_v20, %v7125_v44  ;;  %v7164_v37 = vcombine.high %v7109_v20, %v7125_v44  ;;  %v7179_v9 = vcombine.low %v7116_v48, %v7132_v16  ;;  %v7180_v63 = vcombine.high %v7116_v48, %v7132_v16 }
0x10c1   :  { %v6987_v14 = vmax.f32 %v6981_v60, 0.0  ;;  %v7147_v33 = vrot.slane %v7133_v24, %v10491_v22 }
0x10c2   :  { %v7171_v36 = vrot.slane %v7163_v45, %v10502_v53  ;;  %v7178_v50 = vrot.slane %v7164_v37, %v10502_v53  ;;  %v7187_v8 = vrot.slane %v7179_v9, %v10502_v53  ;;  %v7194_v4 = vrot.slane %v7180_v63, %v10502_v53 }
0x10c3   :  { %v7148_v39 = vcombine.high %v6987_v14, %v10195_v47  ;;  %v7155_v35 = vrot.slane %v6987_v14, %v10491_v22  ;;  %9627 = vmatmul.mubr.msk.f32.gmra.mrb[44].mxu0 %vm681_vm2, %v6987_v14 }
0x10c4   :  { %v9016_v29 = vcombine.low %v7171_v36, %v7178_v50  ;;  %v9018_v55 = vcombine.high %v7171_v36, %v7178_v50  ;;  %v9020_v42 = vcombine.low %v7187_v8, %v7194_v4  ;;  %v9022_v21 = vcombine.high %v7187_v8, %v7194_v4  ;;  %9631 = vmatprep.mubr.msk.f32.mxu0 %vm10206_vm10, %v10195_v47 }
0x10c5   :  { %v7162_v19 = vrot.slane %v7148_v39, %v10491_v22  ;;  %v7195_v58 = vcombine.low %v7140_v40, %v7155_v35  ;;  %v7196_v34 = vcombine.high %v7140_v40, %v7155_v35 }
0x10c6   :  { %v7243_v3 = vrot.slane %v9016_v29, %v10491_v22  ;;  %v7259_v6 = vrot.slane %v9018_v55, %v10491_v22  ;;  %v7275_v51 = vrot.slane %v9020_v42, %v10491_v22  ;;  %v7291_v59 = vrot.slane %v9022_v21, %v10491_v22  ;;  %v10190_v55 = vld [vmem:[%s11955_s3] sm:$0xff] }
0x10c7   :  { %v7203_v52 = vrot.slane %v7195_v58, %v10502_v53  ;;  %v7210_v54 = vrot.slane %v7196_v34, %v10502_v53  ;;  %v7211_v43 = vcombine.low %v7147_v33, %v7162_v19  ;;  %v7212_v27 = vcombine.high %v7147_v33, %v7162_v19 }
0x10c8   :  { %v7300_v28 = vcombine.high %v7243_v3, %v7259_v6  ;;  %v7324_v23 = vcombine.high %v7275_v51, %v7291_v59  ;;  %v7299_v1 = vcombine.low %v7243_v3, %v7259_v6  ;;  %v7323_v26 = vcombine.low %v7275_v51, %v7291_v59 }
0x10c9   :  { %v7219_v7 = vrot.slane %v7211_v43, %v10502_v53  ;;  %v7226_v12 = vrot.slane %v7212_v27, %v10502_v53  ;;  %v9017_v0 = vcombine.low %v7203_v52, %v7210_v54  ;;  %v9019_v18 = vcombine.high %v7203_v52, %v7210_v54 }
0x10ca   :  { %v7314_v11 = vrot.slane %v7300_v28, %v10502_v53  ;;  %v7338_v56 = vrot.slane %v7324_v23, %v10502_v53  ;;  %v7307_v62 = vrot.slane %v7299_v1, %v10502_v53  ;;  %v7331_v13 = vrot.slane %v7323_v26, %v10502_v53 }
0x10cb   :  { %v9021_v38 = vcombine.low %v7219_v7, %v7226_v12  ;;  %v9023_v25 = vcombine.high %v7219_v7, %v7226_v12  ;;  %v7250_v15 = vrot.slane %v9017_v0, %v10491_v22  ;;  %v7266_v32 = vrot.slane %v9019_v18, %v10491_v22 }
0x10cc   :  { %v7349_v31 = vcombine.low %v7314_v11, %v7338_v56  ;;  %v7348_v44 = vcombine.high %v7307_v62, %v7331_v13  ;;  %v7347_v41 = vcombine.low %v7307_v62, %v7331_v13  ;;  %v7350_v60 = vcombine.high %v7314_v11, %v7338_v56 }
0x10cd   :  { %v7282_v30 = vrot.slane %v9021_v38, %v10491_v22  ;;  %v7298_v16 = vrot.slane %v9023_v25, %v10491_v22  ;;  %v7315_v20 = vcombine.low %v7250_v15, %v7266_v32 }
0x10ce   :  { %7358 = vrot.lane.b32.xlu1 %v7349_v31, %s10198_s28  ;;  %7354 = vrot.lane.b32.xlu0 %v7348_v44, %s10199_s29 }
0x10cf   :  { %v7339_v48 = vcombine.low %v7282_v30, %v7298_v16  ;;  %v7322_v45 = vrot.slane %v7315_v20, %v10502_v53 }
0x10d1   :  { %v7346_v37 = vrot.slane %v7339_v48, %v10502_v53 }
0x10d2   :  { %7362 = vrot.lane.b32.xlu0 %v7350_v60, %s10200_s30 }
0x10d3   :  { %v7351_v9 = vcombine.low %v7322_v45, %v7346_v37  ;;  %v7352_v63 = vcombine.high %v7322_v45, %v7346_v37 }
0x10d5   :  { %7366 = vrot.lane.b32.xlu1 %v7351_v9, %s10201_s13 }
0x10d6   :  { %7370 = vrot.lane.b32.xlu0 %v7352_v63, %s10202_s14 }
0x1140   :  { %v7355_v24 = vpop.permute.xlu0 %7354  ;;  %v7359_v14 = vpop.permute.xlu1 %7358 }
0x1141   :  { %v7373_v36 = vsel %vm681_vm2, %v7347_v41, %v7355_v24 }
0x1142   :  { %v7374_v50 = vsel %vm1432_vm3, %v7373_v36, %v7359_v14 }
0x1144   :  { %v7363_v8 = vpop.permute.xlu0 %7362 }
0x1145   :  { %v7375_v4 = vsel %vm1434_vm4, %v7374_v50, %v7363_v8 }
0x1147   :  { %v7367_v40 = vpop.permute.xlu1 %7366 }
0x1148   :  { %v7376_v39 = vsel %vm1436_vm5, %v7375_v4, %v7367_v40  ;;  %v7371_v35 = vpop.permute.xlu0 %7370 }
0x1149   :  { %v11795_v29 = vsel %vm1438_vm6, %v7376_v39, %v7371_v35 }
0x114a   :  { %9630 = vmatpush3.msra.mxu0 %v11795_v29 }
0x114b   :  { %9632 = vmatmul.mubr.msk.f32.vlgmr.msra.gmra.mrb[46].mxu0 %vm1449_vm9, %v10190_v55  ;;  %9730 = vmatprep.subr.bf16.mxu0 %v10662_v61 }
0x114c   :  { %9732 = vmatpush3.bf16.msra.mxu0 %v10662_v61 }
0x114d   :  { %9734 = vmatprep.subr.bf16.mxu0 %v10770_v5 }
0x121e   :  { %v7444_v42 = vpop.f32.mrb[46].mxu0 }
0x121f   :  { %7452 = vrot.lane.b32.xlu0 %v7444_v42, %s10193_s23  ;;  %7449 = vrot.lane.b32.xlu1 %v7444_v42, %s10194_s27  ;;  %v9633_v21 = vpop.f32.mrb[47].mxu0 }
0x1220   :  { %9648 = vmatpush3.msra.mxu1 %v7444_v42 }
0x1221   :  { %9650 = vmatmul.mubr.msk.f32.vlgmr.msra.gmra.mrb[42].mxu1 %vm1449_vm9, %v10190_v55  ;;  %9738 = vmatprep.subr.bf16.mxu1 %v10878_v2 }
0x1222   :  { %9740 = vmatpush3.bf16.msra.mxu1 %v10878_v2 }
0x1223   :  { %7455 = vrot.lane.b32.xlu1 %v7444_v42, %s10202_s14  ;;  %7458 = vrot.lane.b32.xlu0 %v7444_v42, %s10201_s13 }
0x1224   :  { %9742 = vmatprep.subr.bf16.mxu1 %v10888_v46 }
0x1227   :  { %7461 = vrot.lane.b32.xlu1 %v7444_v42, %s10200_s30 }
0x1291   :  { %v7453_v61 = vpop.permute.xlu0 %7452  ;;  %v7450_v33 = vpop.permute.xlu1 %7449 }
0x1292   :  { %v7464_v19 = vcombine.low %v7444_v42, %v7453_v61  ;;  %v7465_v58 = vcombine.high %v7444_v42, %v7453_v61 }
0x1294   :  { %v7472_v59 = vrot.slane %v7464_v19, %v10491_v22  ;;  %v7479_v2 = vrot.slane %v7465_v58, %v10491_v22 }
0x1295   :  { %v7456_v34 = vpop.permute.xlu1 %7455  ;;  %v7459_v51 = vpop.permute.xlu0 %7458 }
0x1296   :  { %v7480_v3 = vcombine.low %v7450_v33, %v7456_v34  ;;  %v7481_v6 = vcombine.high %v7450_v33, %v7456_v34  ;;  %v7496_v43 = vcombine.high %v7459_v51, %v10195_v47  ;;  %v7503_v7 = vrot.slane %v7459_v51, %v10491_v22 }
0x1298   :  { %v7488_v52 = vrot.slane %v7480_v3, %v10491_v22  ;;  %v7495_v54 = vrot.slane %v7481_v6, %v10491_v22  ;;  %v7510_v13 = vrot.slane %v7496_v43, %v10491_v22 }
0x1299   :  { %v7462_v27 = vpop.permute.xlu1 %7461 }
0x129a   :  { %v7526_v28 = vcombine.low %v7472_v59, %v7488_v52  ;;  %v7527_v23 = vcombine.high %v7472_v59, %v7488_v52  ;;  %v7542_v1 = vcombine.low %v7479_v2, %v7495_v54  ;;  %v7543_v26 = vcombine.high %v7479_v2, %v7495_v54 }
0x129b   :  { %v7511_v12 = vcombine.high %v7462_v27, %v10195_v47  ;;  %v7518_v0 = vrot.slane %v7462_v27, %v10491_v22 }
0x129c   :  { %v7534_v18 = vrot.slane %v7526_v28, %v10502_v53  ;;  %v7541_v11 = vrot.slane %v7527_v23, %v10502_v53  ;;  %v7550_v56 = vrot.slane %v7542_v1, %v10502_v53  ;;  %v7557_v62 = vrot.slane %v7543_v26, %v10502_v53 }
0x129d   :  { %v7525_v38 = vrot.slane %v7511_v12, %v10491_v22  ;;  %v7558_v25 = vcombine.low %v7503_v7, %v7518_v0  ;;  %v7559_v15 = vcombine.high %v7503_v7, %v7518_v0 }
0x129e   :  { %v9025_v32 = vcombine.low %v7534_v18, %v7541_v11  ;;  %v9027_v31 = vcombine.high %v7534_v18, %v7541_v11  ;;  %v9029_v44 = vcombine.low %v7550_v56, %v7557_v62  ;;  %v9031_v41 = vcombine.high %v7550_v56, %v7557_v62 }
0x129f   :  { %v7566_v30 = vrot.slane %v7558_v25, %v10502_v53  ;;  %v7573_v16 = vrot.slane %v7559_v15, %v10502_v53  ;;  %v7574_v20 = vcombine.low %v7510_v13, %v7525_v38  ;;  %v7575_v48 = vcombine.high %v7510_v13, %v7525_v38 }
0x12a0   :  { %v7606_v60 = vrot.slane %v9025_v32, %v10491_v22  ;;  %v7622_v45 = vrot.slane %v9027_v31, %v10491_v22  ;;  %v7638_v37 = vrot.slane %v9029_v44, %v10491_v22  ;;  %v7654_v9 = vrot.slane %v9031_v41, %v10491_v22 }
0x12a1   :  { %v7582_v63 = vrot.slane %v7574_v20, %v10502_v53  ;;  %v7589_v24 = vrot.slane %v7575_v48, %v10502_v53  ;;  %v9026_v14 = vcombine.low %v7566_v30, %v7573_v16  ;;  %v9028_v36 = vcombine.high %v7566_v30, %v7573_v16 }
0x12a2   :  { %v7662_v50 = vcombine.low %v7606_v60, %v7622_v45  ;;  %v7686_v8 = vcombine.low %v7638_v37, %v7654_v9  ;;  %v7663_v4 = vcombine.high %v7606_v60, %v7622_v45  ;;  %v7687_v40 = vcombine.high %v7638_v37, %v7654_v9 }
0x12a3   :  { %v7613_v39 = vrot.slane %v9026_v14, %v10491_v22  ;;  %v7629_v35 = vrot.slane %v9028_v36, %v10491_v22  ;;  %v9030_v55 = vcombine.low %v7582_v63, %v7589_v24  ;;  %v9032_v42 = vcombine.high %v7582_v63, %v7589_v24 }
0x12a4   :  { %v7670_v21 = vrot.slane %v7662_v50, %v10502_v53  ;;  %v7694_v61 = vrot.slane %v7686_v8, %v10502_v53  ;;  %v7677_v33 = vrot.slane %v7663_v4, %v10502_v53  ;;  %v7701_v19 = vrot.slane %v7687_v40, %v10502_v53 }
0x12a5   :  { %v7645_v58 = vrot.slane %v9030_v55, %v10491_v22  ;;  %v7661_v34 = vrot.slane %v9032_v42, %v10491_v22  ;;  %v7678_v51 = vcombine.low %v7613_v39, %v7629_v35 }
0x12a6   :  { %v7710_v3 = vcombine.low %v7670_v21, %v7694_v61  ;;  %v7711_v6 = vcombine.high %v7670_v21, %v7694_v61  ;;  %v7712_v2 = vcombine.low %v7677_v33, %v7701_v19  ;;  %v7713_v43 = vcombine.high %v7677_v33, %v7701_v19 }
0x12a7   :  { %v7702_v59 = vcombine.low %v7645_v58, %v7661_v34  ;;  %v7685_v54 = vrot.slane %v7678_v51, %v10502_v53 }
0x12a8   :  { %9638 = vmatprep.mubr.msk.f32.mxu0 %vm681_vm2, %v7710_v3 }
0x12a9   :  { %9639 = vmatmul.mubr.msk.f32.vlgmr.msra.gmra.mrb[40].mxu0 %vm681_vm2, %v7711_v6  ;;  %v7709_v52 = vrot.slane %v7702_v59, %v10502_v53 }
0x12aa   :  { %9641 = vmatprep.mubr.msk.f32.mxu0 %vm681_vm2, %v7712_v2  ;;  %9736 = vmatpush3.bf16.msra.mxu0 %v10770_v5 }
0x12ab   :  { %v7714_v27 = vcombine.low %v7685_v54, %v7709_v52  ;;  %v7715_v28 = vcombine.high %v7685_v54, %v7709_v52 }
0x12ad   :  { %9642 = vmatmul.mubr.msk.f32.gmra.mrb[42].mxu0 %vm681_vm2, %v7713_v43 }
0x12ae   :  { %9644 = vmatprep.mubr.msk.f32.mxu0 %vm681_vm2, %v7714_v27 }
0x12b1   :  { %9645 = vmatmul.mubr.msk.f32.gmra.mrb[44].mxu0 %vm681_vm2, %v7715_v28 }
0x12f4   :  { %v7901_v23 = vpop.f32.mrb[42].mxu1 }
0x12f5   :  { %v7905_v1 = vmul.f32 2.0, %v7901_v23  ;;  %v9651_v26 = vpop.f32.mrb[43].mxu1 }
0x12f7   :  { %v7906_v7 = vsub.f32 %v7905_v1, %v11795_v29 }
0x12f9   :  { %7911 = vrot.lane.b32.xlu1 %v7906_v7, %s10193_s23  ;;  %7908 = vrot.lane.b32.xlu0 %v7906_v7, %s10194_s27 }
0x12fd   :  { %7917 = vrot.lane.b32.xlu1 %v7906_v7, %s10201_s13  ;;  %7914 = vrot.lane.b32.xlu0 %v7906_v7, %s10202_s14 }
0x1301   :  { %7920 = vrot.lane.b32.xlu0 %v7906_v7, %s10200_s30 }
0x136b   :  { %v7912_v5 = vpop.permute.xlu1 %7911  ;;  %v7909_v12 = vpop.permute.xlu0 %7908 }
0x136c   :  { %v7923_v0 = vcombine.low %v7906_v7, %v7912_v5  ;;  %v7924_v18 = vcombine.high %v7906_v7, %v7912_v5 }
0x136e   :  { %v7931_v29 = vrot.slane %v7923_v0, %v10491_v22  ;;  %v7938_v38 = vrot.slane %v7924_v18, %v10491_v22 }
0x136f   :  { %v7915_v11 = vpop.permute.xlu0 %7914  ;;  %v7918_v56 = vpop.permute.xlu1 %7917 }
0x1370   :  { %v7939_v62 = vcombine.low %v7909_v12, %v7915_v11  ;;  %v7940_v13 = vcombine.high %v7909_v12, %v7915_v11  ;;  %v7955_v32 = vcombine.high %v7918_v56, %v10195_v47  ;;  %v7962_v20 = vrot.slane %v7918_v56, %v10491_v22 }
0x1372   :  { %v7947_v25 = vrot.slane %v7939_v62, %v10491_v22  ;;  %v7954_v15 = vrot.slane %v7940_v13, %v10491_v22  ;;  %v7969_v24 = vrot.slane %v7955_v32, %v10491_v22  ;;  %v10191_v32 = vld [vmem:[%s11957_s5] ss:$0 sm:$0xff] }
0x1373   :  { %v7921_v31 = vpop.permute.xlu0 %7920 }
0x1374   :  { %v7985_v44 = vcombine.low %v7931_v29, %v7947_v25  ;;  %v7986_v41 = vcombine.high %v7931_v29, %v7947_v25  ;;  %v8001_v30 = vcombine.low %v7938_v38, %v7954_v15  ;;  %v8002_v16 = vcombine.high %v7938_v38, %v7954_v15 }
0x1375   :  { %v7970_v48 = vcombine.high %v7921_v31, %v10195_v47  ;;  %v7977_v60 = vrot.slane %v7921_v31, %v10491_v22 }
0x1376   :  { %v7993_v45 = vrot.slane %v7985_v44, %v10502_v53  ;;  %v8000_v37 = vrot.slane %v7986_v41, %v10502_v53  ;;  %v8009_v9 = vrot.slane %v8001_v30, %v10502_v53  ;;  %v8016_v63 = vrot.slane %v8002_v16, %v10502_v53 }
0x1377   :  { %v7984_v14 = vrot.slane %v7970_v48, %v10491_v22  ;;  %v8017_v36 = vcombine.low %v7962_v20, %v7977_v60  ;;  %v8018_v50 = vcombine.high %v7962_v20, %v7977_v60 }
0x1378   :  { %v9040_v8 = vcombine.low %v7993_v45, %v8000_v37  ;;  %v9042_v4 = vcombine.high %v7993_v45, %v8000_v37  ;;  %v9044_v40 = vcombine.low %v8009_v9, %v8016_v63  ;;  %v9046_v47 = vcombine.high %v8009_v9, %v8016_v63 }
0x1379   :  { %v8025_v39 = vrot.slane %v8017_v36, %v10502_v53  ;;  %v8032_v35 = vrot.slane %v8018_v50, %v10502_v53  ;;  %v8033_v55 = vcombine.low %v7969_v24, %v7984_v14  ;;  %v8034_v42 = vcombine.high %v7969_v24, %v7984_v14 }
0x137a   :  { %v8065_v21 = vrot.slane %v9040_v8, %v10491_v22  ;;  %v8081_v61 = vrot.slane %v9042_v4, %v10491_v22  ;;  %v8097_v33 = vrot.slane %v9044_v40, %v10491_v22  ;;  %v8113_v19 = vrot.slane %v9046_v47, %v10491_v22 }
0x137b   :  { %v8041_v58 = vrot.slane %v8033_v55, %v10502_v53  ;;  %v8048_v34 = vrot.slane %v8034_v42, %v10502_v53  ;;  %v9041_v3 = vcombine.low %v8025_v39, %v8032_v35  ;;  %v9043_v6 = vcombine.high %v8025_v39, %v8032_v35 }
0x137c   :  { %v8121_v51 = vcombine.low %v8065_v21, %v8081_v61  ;;  %v8145_v59 = vcombine.low %v8097_v33, %v8113_v19  ;;  %v8122_v2 = vcombine.high %v8065_v21, %v8081_v61  ;;  %v8146_v52 = vcombine.high %v8097_v33, %v8113_v19 }
0x137d   :  { %v8072_v54 = vrot.slane %v9041_v3, %v10491_v22  ;;  %v8088_v43 = vrot.slane %v9043_v6, %v10491_v22  ;;  %v9045_v27 = vcombine.low %v8041_v58, %v8048_v34  ;;  %v9047_v28 = vcombine.high %v8041_v58, %v8048_v34 }
0x137e   :  { %v8129_v23 = vrot.slane %v8121_v51, %v10502_v53  ;;  %v8153_v1 = vrot.slane %v8145_v59, %v10502_v53  ;;  %v8136_v26 = vrot.slane %v8122_v2, %v10502_v53  ;;  %v8160_v7 = vrot.slane %v8146_v52, %v10502_v53 }
0x137f   :  { %v8104_v5 = vrot.slane %v9045_v27, %v10491_v22  ;;  %v8120_v12 = vrot.slane %v9047_v28, %v10491_v22  ;;  %v8137_v11 = vcombine.low %v8072_v54, %v8088_v43 }
0x1380   :  { %v8169_v0 = vcombine.low %v8129_v23, %v8153_v1  ;;  %v8170_v18 = vcombine.high %v8129_v23, %v8153_v1  ;;  %v8171_v62 = vcombine.low %v8136_v26, %v8160_v7  ;;  %v8172_v38 = vcombine.high %v8136_v26, %v8160_v7 }
0x1381   :  { %v8161_v56 = vcombine.low %v8104_v5, %v8120_v12  ;;  %v8144_v29 = vrot.slane %v8137_v11, %v10502_v53 }
0x1382   :  { %9656 = vmatprep.mubr.msk.f32.mxu0 %vm681_vm2, %v8169_v0 }
0x1383   :  { %9657 = vmatmul.mubr.msk.f32.vlgmr.msra.gmra.mrb[40].mxu0 %vm681_vm2, %v8170_v18  ;;  %v8168_v13 = vrot.slane %v8161_v56, %v10502_v53 }
0x1384   :  { %9659 = vmatprep.mubr.msk.f32.mxu0 %vm681_vm2, %v8171_v62 }
0x1385   :  { %v8173_v25 = vcombine.low %v8144_v29, %v8168_v13  ;;  %v8174_v22 = vcombine.high %v8144_v29, %v8168_v13 }
0x1387   :  { %9660 = vmatmul.mubr.msk.f32.gmra.mrb[42].mxu0 %vm681_vm2, %v8172_v38 }
0x1388   :  { %9662 = vmatprep.mubr.msk.f32.mxu0 %vm681_vm2, %v8173_v25 }
0x138b   :  { %9663 = vmatmul.mubr.msk.f32.gmra.mrb[44].mxu0 %vm681_vm2, %v8174_v22 }
0x1456   :  { %v9658_v15 = vpop.f32.mrb[40].mxu0 }
0x1457   :  { %v9819_v31 = vadd.f32 %v10191_v32, %v9658_v15  ;;  %v8259_v44 = vpop.f32.mrb[41].mxu0 }
0x1458   :  { %v9820_v41 = vadd.f32 %v10191_v32, %v8259_v44 }
0x1459   :  { %v8295_v53 = vmax.f32 %v9819_v31, 0.0 }
0x145a   :  { %v8294_v30 = vmax.f32 %v9820_v41, 0.0  ;;  %v9661_v16 = vpop.f32.mrb[42].mxu0 }
0x145b   :  { %v9821_v20 = vadd.f32 %v10191_v32, %v9661_v16  ;;  %v8269_v48 = vpop.f32.mrb[43].mxu0 }
0x145c   :  { %v9822_v60 = vadd.f32 %v10191_v32, %v8269_v48  ;;  %9669 = vmatprep.mubr.msk.f32.mxu1 %vm681_vm2, %v8294_v30 }
0x145d   :  { %9670 = vmatmul.mubr.msk.f32.vlgmr.msra.gmra.mrb[44].mxu1 %vm681_vm2, %v8295_v53  ;;  %v8297_v9 = vmax.f32 %v9821_v20, 0.0 }
0x145e   :  { %v8296_v45 = vmax.f32 %v9822_v60, 0.0  ;;  %v9664_v37 = vpop.f32.mrb[44].mxu0  ;;  %9744 = vmatpush3.bf16.msra.mxu1 %v10888_v46  ;;  %v10192_v46 = vld [vmem:[%s11958_s7] ss:$0 sm:$0xff] }
0x145f   :  { %v8279_v63 = vpop.f32.mrb[45].mxu0  ;;  %v9823_v14 = vadd.f32 %v10191_v32, %v9664_v37 }
0x1460   :  { %v9824_v24 = vadd.f32 %v10191_v32, %v8279_v63  ;;  %9672 = vmatprep.mubr.msk.f32.mxu1 %vm681_vm2, %v8296_v45 }
0x1461   :  { %9673 = vmatmul.mubr.msk.f32.gmra.mrb[46].mxu1 %vm681_vm2, %v8297_v9  ;;  %v8299_v50 = vmax.f32 %v9823_v14, 0.0  ;;  %v17_v14 = vstv %s11961_s11 }
0x1462   :  { %9679 = vmatprep.mubr.msk.f32.mxu1 %vm681_vm2, %v8296_v45  ;;  %v8298_v36 = vmax.f32 %v9824_v24, 0.0  ;;  %18 = vst [vmem:[#allocation2] sm:$0x1] %v17_v14 }
0x1465   :  { %9680 = vmatmul.mubr.msk.f32.vlgmr.msra.gmra.mrb[44].mxu1 %vm681_vm2, %v8297_v9 }
0x1466   :  { %9682 = vmatprep.mubr.msk.f32.mxu1 %vm681_vm2, %v8298_v36 }
0x1469   :  { %9683 = vmatmul.mubr.msk.f32.gmra.mrb[46].mxu1 %vm681_vm2, %v8299_v50 }
0x1538   :  { %v9681_v8 = vpop.f32.mrb[44].mxu1 }
0x1539   :  { %v9825_v4 = vadd.f32 %v10192_v46, %v9681_v8  ;;  %v8473_v40 = vpop.f32.mrb[45].mxu1 }
0x153a   :  { %v9826_v47 = vadd.f32 %v10192_v46, %v8473_v40 }
0x153b   :  { %v9063_v39 = vmul.f32 -1.442695, %v9825_v4  ;;  %8546 = vrot.lane.b32.xlu1 %v9825_v4, %s10203_s4 }
0x153c   :  { %v9062_v35 = vmul.f32 -1.442695, %v9826_v47  ;;  %8544 = vrot.lane.b32.xlu0 %v9826_v47, %s10203_s4  ;;  %v9684_v55 = vpop.f32.mrb[46].mxu1 }
0x153d   :  { %10163 = vpow2.f32 %v9063_v39  ;;  %v9827_v42 = vadd.f32 %v10192_v46, %v9684_v55  ;;  %v8483_v21 = vpop.f32.mrb[47].mxu1 }
0x153e   :  { %10165 = vpow2.f32 %v9062_v35  ;;  %v9828_v61 = vadd.f32 %v10192_v46, %v8483_v21 }
0x153f   :  { %v9065_v33 = vmul.f32 -1.442695, %v9827_v42 }
0x1540   :  { %v9064_v19 = vmul.f32 -1.442695, %v9828_v61 }
0x1541   :  { %10167 = vpow2.f32 %v9065_v33 }
0x1542   :  { %10169 = vpow2.f32 %v9064_v19 }
0x1547   :  { %v10164_v58 = vpop.eup %10163 }
0x1548   :  { %v10166_v34 = vpop.eup %10165  ;;  %v8509_v3 = vadd.f32 1.0, %v10164_v58 }
0x1549   :  { %v8508_v6 = vadd.f32 1.0, %v10166_v34 }
0x154a   :  { %10171 = vrcp.f32 %v8509_v3 }
0x154b   :  { %v10168_v51 = vpop.eup %10167  ;;  %10173 = vrcp.f32 %v8508_v6 }
0x154c   :  { %v10170_v59 = vpop.eup %10169  ;;  %v8511_v2 = vadd.f32 1.0, %v10168_v51 }
0x154d   :  { %v8510_v52 = vadd.f32 1.0, %v10170_v59 }
0x154e   :  { %10175 = vrcp.f32 %v8511_v2 }
0x154f   :  { %10177 = vrcp.f32 %v8510_v52 }
0x1554   :  { %v10172_v54 = vpop.eup %10171 }
0x1555   :  { %v10174_v43 = vpop.eup %10173  ;;  %8526 = vrot.lane.b32.xlu0 %v10172_v54, %s10204_s15 }
0x1556   :  { %8524 = vrot.lane.b32.xlu1 %v10174_v43, %s10204_s15 }
0x1558   :  { %v10176_v27 = vpop.eup %10175 }
0x1559   :  { %v10178_v28 = vpop.eup %10177  ;;  %8530 = vrot.lane.b32.xlu0 %v10176_v27, %s10204_s15 }
0x155a   :  { %8528 = vrot.lane.b32.xlu1 %v10178_v28, %s10204_s15 }
0x155d   :  { %8550 = vrot.lane.b32.xlu0 %v9827_v42, %s10203_s4 }
0x155e   :  { %8548 = vrot.lane.b32.xlu1 %v9828_v61, %s10203_s4 }
0x15ad   :  { %v8547_v1 = vpop.permute.xlu1 %8546 }
0x15ae   :  { %v8545_v23 = vpop.permute.xlu0 %8544 }
0x15c7   :  { %v8527_v26 = vpop.permute.xlu0 %8526 }
0x15c8   :  { %v8537_v7 = vmul.f32 %v9825_v4, %v8527_v26  ;;  %v8525_v5 = vpop.permute.xlu1 %8524 }
0x15c9   :  { %v8536_v12 = vmul.f32 %v9826_v47, %v8525_v5 }
0x15ca   :  { %v8557_v0 = vadd.f32 %v8547_v1, %v8537_v7 }
0x15cb   :  { %v8556_v18 = vadd.f32 %v8545_v23, %v8536_v12  ;;  %v8531_v11 = vpop.permute.xlu0 %8530 }
0x15cc   :  { %v8561_v56 = vmax.f32 %v8557_v0, 0.0  ;;  %v8529_v62 = vpop.permute.xlu1 %8528  ;;  %v8539_v29 = vmul.f32 %v9827_v42, %v8531_v11 }
0x15cd   :  { %v8560_v13 = vmax.f32 %v8556_v18, 0.0  ;;  %v8538_v22 = vmul.f32 %v9828_v61, %v8529_v62  ;;  %v9066_v62 = vld [vmem:[%s11962_s10] ss:$0 sm:$0xff] }
0x15ce   :  { %v8567_v38 = vsel %vm77_vm1, %v8561_v56, 0.0  ;;  %v8580_v25 = vmul.f32 %v8561_v56, %v8561_v56 }
0x15cf   :  { %8568 = vadd.xlane.f32.xlu0 %v8567_v38  ;;  %v8551_v15 = vpop.permute.xlu0 %8550  ;;  %v8564_v32 = vsel %vm77_vm1, %v8560_v13, 0.0  ;;  %v8579_v31 = vmul.f32 %v8560_v13, %v8560_v13 }
0x15d0   :  { %v8559_v44 = vadd.f32 %v8551_v15, %v8539_v29  ;;  %8565 = vadd.xlane.f32.xlu1 %v8564_v32  ;;  %v8549_v41 = vpop.permute.xlu1 %8548  ;;  %v8586_v16 = vsel %vm77_vm1, %v8580_v25, 0.0 }
0x15d1   :  { %v8558_v30 = vadd.f32 %v8549_v41, %v8538_v22  ;;  %v8583_v48 = vsel %vm77_vm1, %v8579_v31, 0.0 }
0x15d2   :  { %v8563_v53 = vmax.f32 %v8559_v44, 0.0 }
0x15d3   :  { %v8562_v20 = vmax.f32 %v8558_v30, 0.0  ;;  %8587 = vadd.xlane.f32.xlu0 %v8586_v16  ;;  %v9067_v30 = vld [vmem:[#allocation2] ss:$0 sm:$0xff] }
0x15d4   :  { %8584 = vadd.xlane.f32.xlu1 %v8583_v48  ;;  %v8573_v37 = vsel %vm77_vm1, %v8563_v53, 0.0  ;;  %v8582_v9 = vmul.f32 %v8563_v53, %v8563_v53 }
0x15d5   :  { %v8570_v60 = vsel %vm77_vm1, %v8562_v20, 0.0  ;;  %v8581_v45 = vmul.f32 %v8562_v20, %v8562_v20 }
0x15d6   :  { %v8592_v24 = vsel %vm77_vm1, %v8582_v9, 0.0 }
0x15d7   :  { %8571 = vadd.xlane.f32.xlu0 %v8570_v60  ;;  %v8589_v63 = vsel %vm77_vm1, %v8581_v45, 0.0 }
0x15d8   :  { %8574 = vadd.xlane.f32.xlu1 %v8573_v37 }
0x15db   :  { %8590 = vadd.xlane.f32.xlu0 %v8589_v63 }
0x15dc   :  { %8593 = vadd.xlane.f32.xlu1 %v8592_v24 }
0x165c   :  { %v8569_v36 = vpop.xlane.xlu0 %8568 }
0x165d   :  { %v8566_v50 = vpop.xlane.xlu1 %8565 }
0x165e   :  { %v8576_v4 = vadd.f32 %v8569_v36, %v8566_v50 }
0x1660   :  { %v8588_v8 = vpop.xlane.xlu0 %8587 }
0x1661   :  { %v8585_v46 = vpop.xlane.xlu1 %8584 }
0x1662   :  { %v8595_v35 = vadd.f32 %v8588_v8, %v8585_v46 }
0x1664   :  { %v8572_v40 = vpop.xlane.xlu0 %8571 }
0x1665   :  { %v8577_v47 = vadd.f32 %v8576_v4, %v8572_v40  ;;  %v8575_v39 = vpop.xlane.xlu1 %8574 }
0x1667   :  { %v8578_v55 = vadd.f32 %v8577_v47, %v8575_v39 }
0x1668   :  { %v8591_v42 = vpop.xlane.xlu0 %8590 }
0x1669   :  { %v8598_v21 = vmul.f32 0.0625, %v8578_v55  ;;  %v8596_v61 = vadd.f32 %v8595_v35, %v8591_v42  ;;  %v8594_v33 = vpop.xlane.xlu1 %8593 }
0x166b   :  { %v8597_v19 = vadd.f32 %v8596_v61, %v8594_v33  ;;  %v8600_v58 = vmul.f32 %v8598_v21, %v8598_v21  ;;  %v8604_v59 = vsub.f32 %v8561_v56, %v8598_v21  ;;  %v8603_v2 = vsub.f32 %v8560_v13, %v8598_v21 }
0x166c   :  { %v8606_v52 = vsub.f32 %v8563_v53, %v8598_v21  ;;  %v8605_v54 = vsub.f32 %v8562_v20, %v8598_v21  ;;  %v8667_v20 = vand.u32 127, %v864_v10 }
0x166d   :  { %v8599_v34 = vmul.f32 0.0625, %v8597_v19 }
0x166e   :  { %v8670_v60 = vsub.s32 %v8667_v20, %v10486_v17 }
0x166f   :  { %v8601_v3 = vsub.f32 %v8599_v34, %v8600_v58 }
0x1671   :  { %v8602_v6 = vmax.f32 %v8601_v3, 0.0 }
0x1673   :  { %v8607_v51 = vadd.f32 1e-05, %v8602_v6 }
0x1675   :  { %10179 = vrsqrt.f32 %v8607_v51 }
0x167f   :  { %v10180_v43 = vpop.eup %10179 }
0x1680   :  { %v8610_v27 = vmul.f32 %v10180_v43, %v8604_v59  ;;  %v8609_v28 = vmul.f32 %v10180_v43, %v8603_v2  ;;  %v8612_v23 = vmul.f32 %v10180_v43, %v8606_v52  ;;  %v8611_v1 = vmul.f32 %v10180_v43, %v8605_v54 }
0x1682   :  { %v8614_v26 = vmul.f32 %v8610_v27, %v11142_v57  ;;  %v8613_v7 = vmul.f32 %v8609_v28, %v11142_v57  ;;  %v8616_v5 = vmul.f32 %v8612_v23, %v11142_v57  ;;  %v8615_v12 = vmul.f32 %v8611_v1, %v11142_v57 }
0x1684   :  { %v8618_v0 = vadd.f32 %v8614_v26, %v11150_v49  ;;  %v8617_v18 = vadd.f32 %v8613_v7, %v11150_v49  ;;  %v8620_v11 = vadd.f32 %v8616_v5, %v11150_v49  ;;  %v8619_v56 = vadd.f32 %v8615_v12, %v11150_v49 }
0x1686   :  { %v8622_v13 = vmax.f32 %v8618_v0, 0.0  ;;  %v8621_v29 = vmax.f32 %v8617_v18, 0.0  ;;  %v8624_v38 = vmax.f32 %v8620_v11, 0.0  ;;  %v8623_v25 = vmax.f32 %v8619_v56, 0.0 }
0x1688   :  { %v8633_v22 = vmul.f32 %v9066_v62, %v8622_v13  ;;  %v8632_v15 = vmul.f32 %v9066_v62, %v8621_v29  ;;  %v8635_v31 = vmul.f32 %v9066_v62, %v8624_v38  ;;  %v8634_v44 = vmul.f32 %v9066_v62, %v8623_v25 }
0x168a   :  { %v8639_v57 = vsel %vm77_vm1, %v8633_v22, 0.0  ;;  %v8636_v32 = vsel %vm77_vm1, %v8632_v15, 0.0  ;;  %v8645_v49 = vsel %vm77_vm1, %v8635_v31, 0.0  ;;  %v8642_v41 = vsel %vm77_vm1, %v8634_v44, 0.0 }
0x168b   :  { %8640 = vadd.xlane.f32.xlu1 %v8639_v57  ;;  %8637 = vadd.xlane.f32.xlu0 %v8636_v32 }
0x168f   :  { %8646 = vadd.xlane.f32.xlu1 %v8645_v49  ;;  %8643 = vadd.xlane.f32.xlu0 %v8642_v41 }
0x16a5   :  { %8655 = vperm.xlu0 %9958, %v9067_v30  }
0x1718   :  { %v8638_v16 = vpop.xlane.xlu0 %8637  ;;  %v8641_v53 = vpop.xlane.xlu1 %8640 }
0x171c   :  { %v8644_v48 = vpop.xlane.xlu0 %8643  ;;  %v8647_v45 = vpop.xlane.xlu1 %8646 }
0x1724   :  { %v8656_v37 = vpop.permute.xlu0 %8655 }
0x1725   :  { %v8658_v9 = vadd.f32 %v8656_v37, %v8638_v16  ;;  %v8659_v63 = vadd.f32 %v8656_v37, %v8641_v53  ;;  %v8660_v24 = vadd.f32 %v8656_v37, %v8644_v48  ;;  %v8661_v14 = vadd.f32 %v8656_v37, %v8647_v45 }
0x1727   :  { %v8671_v36 = vrot.slane %v8658_v9, %v8670_v60  ;;  %v8675_v50 = vrot.slane %v8659_v63, %v8670_v60  ;;  %v8679_v8 = vrot.slane %v8660_v24, %v8670_v60  ;;  %v8683_v46 = vrot.slane %v8661_v14, %v8670_v60 }
0x1729   :  { %v8685_v4 = vsel %vm8684_vm11, %v8675_v50, %v8671_v36 }
0x172a   :  { %v8687_v40 = vsel %vm8686_vm12, %v8679_v8, %v8685_v4 }
0x172b   :  { %v8689_v10 = vsel %vm8688_vm13, %v8683_v46, %v8687_v40 }
0x172c   :  { %8692 = vst.msk [vmem:[%s11963_s12] sm:$0xf] %vm8691_vm14, %v8689_v10 }

</bundles_post_ra>
